<compile_context>
chip_gen: v5e
topology: v5e:2x2
jax: 0.10.0
libtpu: 0.0.40
codegen_flags: <defaults>
</compile_context>

<pallas_src>
import functools
import math

import jax
import jax.numpy as jnp
import numpy as np
from jax.experimental import pallas as pl
from jax.experimental.pallas import tpu as pltpu

EPS = 1e-5   # nn.LayerNorm default


def _round_up(x, m):
    return (x + m - 1) // m * m


def _layer_norm(x, gamma, beta):
    # One-pass statistics: E[x] and E[x^2] computed independently (better ILP,
    # ~40% less reduction traffic than the (x - mu)**2 formulation).
    mu = jnp.mean(x, axis=-1, keepdims=True)
    ms = jnp.mean(x * x, axis=-1, keepdims=True)
    var = ms - mu * mu
    return (x - mu) * jax.lax.rsqrt(var + EPS) * gamma + beta


def _softmax_last(x):
    m = jnp.max(x, axis=-1, keepdims=True)
    p = jnp.exp(x - m)
    return p * pl.reciprocal(jnp.sum(p, axis=-1, keepdims=True), approx=True)


def attention_model_kernel(
    x_ref, pos_ref, wb_ref, bb_ref, g_att_ref, b_att_ref,
    w1_ref, b1_ref, w2_ref, b2_ref, g_enc_ref, b_enc_ref,
    dec_in_ref, wd_ref, bd_ref,
    dec_out_ref, attn_out_ref, *, seq_len,
):
    BB, S_pad = attn_out_ref.shape
    H = wb_ref.shape[1]
    inv_scale = 1.0 / math.sqrt(H)
    f32, bf16 = jnp.float32, jnp.bfloat16

    g_att = g_att_ref[...]                     # (1, H) — loaded once, reused
    b_att = b_att_ref[...]

    # Additive f32 masks over padded key positions (sequence padded seq_len ->
    # S_pad).  Masks stay f32: bf16 casts apply only to MXU operands.
    mask_enc = mask_d2 = mask_d3 = None
    if S_pad != seq_len:
        k3 = jax.lax.broadcasted_iota(jnp.int32, (1, 1, S_pad), 2)
        mask_enc = jnp.where(k3 < seq_len, jnp.float32(0.0), jnp.float32(-1e30))
        k2 = jax.lax.broadcasted_iota(jnp.int32, (1, S_pad), 1)
        mask_d2 = jnp.where(k2 < seq_len, jnp.float32(0.0), jnp.float32(-1e30))
        kd = jax.lax.broadcasted_iota(jnp.int32, (1, S_pad, 1), 1)
        mask_d3 = jnp.where(kd < seq_len, jnp.float32(0.0), jnp.float32(-1e30))

    # ---- enc_base_dense on the flattened (BB*S_pad, V) token slab (big-M) ----
    enc_flat = jnp.dot(x_ref[...], wb_ref[...],
                       preferred_element_type=f32) + bb_ref[...]
    enc = enc_flat.reshape(BB, S_pad, H) + pos_ref[...][None]   # + positional enc

    # ---- encoder self-attention (bf16 MXU operands, f32 accumulate/softmax) ----
    enc_b = enc.astype(bf16)
    scores = jnp.einsum("bqd,bkd->bqk", enc_b, enc_b,
                        preferred_element_type=f32) * inv_scale
    if mask_enc is not None:
        scores = scores + mask_enc
    attn = _softmax_last(scores)                                # (BB, S_pad, S_pad)
    ws = jnp.einsum("bqk,bkd->bqd", attn.astype(bf16), enc_b,
                    preferred_element_type=f32)
    enc = _layer_norm(ws + enc, g_att, b_att)

    # ---- position-wise feed-forward on the flat slab (M = BB*S_pad) ----
    enc_flat = enc.reshape(BB * S_pad, H)
    dense = jnp.maximum(
        jnp.dot(enc_flat.astype(bf16), w1_ref[...],
                preferred_element_type=f32) + b1_ref[...],
        0.0,
    )
    enc_flat = enc_flat + jnp.dot(dense.astype(bf16), w2_ref[...],
                                  preferred_element_type=f32) + b2_ref[...]
    enc_flat = _layer_norm(enc_flat, g_enc_ref[...], b_enc_ref[...])
    enc = enc_flat.reshape(BB, S_pad, H)

    # ---- decoder cross-attention with the shared learned query (2-D tail) ----
    q = dec_in_ref[...]                        # (1, H), identical for all samples
    prod = enc * q[None]                       # (BB, S_pad, H), f32 on the VPU

    # (a) returned attention weights: 2-D (BB, S_pad) with exact normalization.
    scores2 = jnp.sum(prod, axis=-1) * inv_scale
    if mask_d2 is not None:
        scores2 = scores2 + mask_d2
    m2 = jnp.max(scores2, axis=-1, keepdims=True)
    p2 = jnp.exp(scores2 - m2)
    attn2 = p2 / jnp.sum(p2, axis=-1, keepdims=True)            # (BB, S_pad)

    # (b) weighted sum over keys in flash-style keepdims layout so the sublane
    #     reduction lands directly on a dense (BB, H) slab (no relayout slices).
    scores3 = jnp.sum(prod, axis=-1, keepdims=True) * inv_scale  # (BB, S_pad, 1)
    if mask_d3 is not None:
        scores3 = scores3 + mask_d3
    m3 = jnp.max(scores3, axis=1, keepdims=True)
    p3 = jnp.exp(scores3 - m3)
    attn3 = p3 / jnp.sum(p3, axis=1, keepdims=True)
    wsum = jnp.sum(attn3 * enc, axis=1)                          # (BB, H)
    dec = _layer_norm(wsum + q, g_att, b_att)                    # shared att_layer_norm

    # ---- decoder_dense: (BB, H) @ (H, N_dec) — lane-dense (128) output ----
    out = jnp.dot(dec.astype(bf16), wd_ref[...],
                  preferred_element_type=f32) + bd_ref[...]

    dec_out_ref[...] = out                   # unmasked, 128-lane dense store
    attn_out_ref[...] = attn2
    # TODO(synk): pack 8 samples per row ((BB//8, 8*S_pad)) to make the attn
    # store fully lane-dense; kept as a plain (BB, S_pad) store for robustness.


def attention_model_forward(x, params, block_b=None):
    B, S, V = x.shape
    H = params["wb"].shape[1]
    ML1 = params["wd"].shape[1]
    S_pad = _round_up(S, 8)        # sublane-aligned sequence -> tile-aligned reshapes
    N_dec = _round_up(ML1, 128)    # lane-dense decoder output (unmasked vst)

    if block_b is None:
        # >=2 grid steps when possible (v7x has 2 TensorCores), multiple of 8
        # for sublane tiling, capped so per-step intermediates fit comfortably
        # inside the smallest default scoped-VMEM limit (16 MiB on v5e).
        block_b = min(128, max(8, _round_up(pl.cdiv(B, 2), 8)))
    BB = block_b
    B_pad = _round_up(B, BB)
    grid = (B_pad // BB,)

    f32, bf16 = jnp.float32, jnp.bfloat16
    xp = jnp.pad(x.astype(f32), ((0, B_pad - B), (0, S_pad - S), (0, 0)))
    x_flat = xp.reshape(B_pad * S_pad, V).astype(bf16)   # bf16 MXU operand, half DMA
    pos_p = jnp.pad(params["pos"], ((0, S_pad - S), (0, 0)))
    wd_p = jnp.pad(params["wd"], ((0, 0), (0, N_dec - ML1))).astype(bf16)
    bd_p = jnp.pad(params["bd"], ((0, 0), (0, N_dec - ML1)))
    wb_b = params["wb"].astype(bf16)
    w1_b = params["w1"].astype(bf16)
    w2_b = params["w2"].astype(bf16)

    def full(shape):
        n = len(shape)
        return pl.BlockSpec(shape, lambda b, _n=n: (0,) * _n)

    # TODO(synk): constant-weight specs could use pipeline_mode=pl.Buffered(1)
    # to drop the second VMEM buffer; left at the default for compatibility.
    # TODO(synk): x block is only V=3/128 lane-dense; repack tokens in the
    # wrapper if B grows large enough for the input DMA to matter.
    in_specs = [
        pl.BlockSpec((BB * S_pad, V), lambda b: (b, 0)),   # x, flattened tokens
        full((S_pad, H)),                                  # input_pos_enc
        full((V, H)), full((1, H)),                        # enc_base_dense
        full((1, H)), full((1, H)),                        # att_layer_norm gamma/beta
        full((H, 2 * H)), full((1, 2 * H)),                # enc_increase_hidden[0]
        full((2 * H, H)), full((1, H)),                    # enc_decrease_hidden[0]
        full((1, H)), full((1, H)),                        # enc_layer_norm[0]
        full((1, H)),                                      # decoder_input
        full((H, N_dec)), full((1, N_dec)),                # decoder_dense (padded)
    ]
    out_specs = [
        pl.BlockSpec((BB, N_dec), lambda b: (b, 0)),       # dec: 2-D, lane-dense
        pl.BlockSpec((BB, S_pad), lambda b: (b, 0)),       # attn weights: 2-D
    ]
    out_shape = [
        jax.ShapeDtypeStruct((B_pad, N_dec), f32),
        jax.ShapeDtypeStruct((B_pad, S_pad), f32),
    ]

    # Advisory cost estimate for the XLA scheduler.
    T = B_pad * S_pad
    flops = int(
        2 * T * V * H                      # base dense
        + 4 * B_pad * S_pad * S_pad * H    # self-attention
        + 8 * T * H * H                    # FFN
        + B_pad * (6 * S_pad * H + 2 * H * N_dec)   # decoder tail
    )
    transcendentals = int(B_pad * S_pad * S_pad + 2 * B_pad * S_pad + 4 * T)
    param_bytes = sum(
        int(np.prod(a.shape)) * a.dtype.itemsize
        for a in (pos_p, wb_b, params["bb"], params["g_att"], params["b_att"],
                  w1_b, params["b1"], w2_b, params["b2"],
                  params["g_enc"], params["b_enc"], params["dec_in"], wd_p, bd_p)
    )
    bytes_accessed = int(x_flat.size * 2 + param_bytes
                         + (B_pad * N_dec + B_pad * S_pad) * 4)

    dec, attn = pl.pallas_call(
        functools.partial(attention_model_kernel, seq_len=S),
        grid=grid,
        in_specs=in_specs,
        out_specs=out_specs,
        out_shape=out_shape,
        compiler_params=pltpu.CompilerParams(dimension_semantics=("parallel",)),
        cost_estimate=pl.CostEstimate(
            flops=flops, transcendentals=transcendentals,
            bytes_accessed=bytes_accessed),
    )(
        x_flat, pos_p, wb_b, params["bb"], params["g_att"], params["b_att"],
        w1_b, params["b1"], w2_b, params["b2"],
        params["g_enc"], params["b_enc"], params["dec_in"], wd_p, bd_p,
    )

    dec = dec[:B, :ML1].reshape(B, 1, ML1)
    attn = attn[:B, :S].reshape(B, 1, S)
    # Module also returns self.input_pos_enc with shape (1, max_len + 1, hidden).
    return dec, attn, params["pos"][None]


def make_params(key, max_len=10, vocab_size=3, hidden=64):
    S, H, V, ML1 = max_len + 1, hidden, vocab_size, max_len + 1
    ks = jax.random.split(key, 12)
    f32 = jnp.float32
    return {
        # learned tensors (zeros in __init__; small random here to exercise the kernel)
        "pos":    0.02 * jax.random.normal(ks[0], (S, H), f32),
        "dec_in": 0.02 * jax.random.normal(ks[1], (1, H), f32),
        # linear layers, stored as (in, out)
        "wb": 0.1 * jax.random.normal(ks[2], (V, H), f32),
        "bb": 0.1 * jax.random.normal(ks[3], (1, H), f32),
        "w1": 0.1 * jax.random.normal(ks[4], (H, 2 * H), f32),
        "b1": 0.1 * jax.random.normal(ks[5], (1, 2 * H), f32),
        "w2": 0.1 * jax.random.normal(ks[6], (2 * H, H), f32),
        "b2": 0.1 * jax.random.normal(ks[7], (1, H), f32),
        "wd": 0.1 * jax.random.normal(ks[8], (H, ML1), f32),
        "bd": 0.1 * jax.random.normal(ks[9], (1, ML1), f32),
        # layer norms
        "g_att": jnp.ones((1, H), f32),
        "b_att": jnp.zeros((1, H), f32),
        "g_enc": jnp.ones((1, H), f32),
        "b_enc": jnp.zeros((1, H), f32),
    }


def reference_forward(x, p):
    """Pure-JAX mirror of AttentionModel.forward for verification."""
    def ln(v, g, b):
        mu = v.mean(-1, keepdims=True)
        var = ((v - mu) ** 2).mean(-1, keepdims=True)
        return (v - mu) / jnp.sqrt(var + EPS) * g + b

    def attn_block(q, k, v, g, b):
        scale = jnp.sqrt(jnp.float32(q.shape[-1]))
        s = jnp.einsum("bqd,bkd->bqk", q, k) / scale
        w = jax.nn.softmax(s, axis=-1)
        o = jnp.einsum("bqk,bkd->bqd", w, v) + q
        return ln(o, g, b), w

    enc = x @ p["wb"] + p["bb"] + p["pos"][None]
    enc, _ = attn_block(enc, enc, enc, p["g_att"], p["b_att"])
    d = jax.nn.relu(enc @ p["w1"] + p["b1"])
    enc = enc + d @ p["w2"] + p["b2"]
    enc = ln(enc, p["g_enc"], p["b_enc"])
    q = jnp.broadcast_to(p["dec_in"][None], (x.shape[0], 1, p["dec_in"].shape[-1]))
    dec, w = attn_block(q, enc, enc, p["g_att"], p["b_att"])
    dec = dec @ p["wd"] + p["bd"]
    return dec, w


if __name__ == "__main__":
    max_len, vocab_size, hidden, batch = 10, 3, 64, 16
    seq = max_len + 1

    key = jax.random.PRNGKey(0)
    kx, kp = jax.random.split(key)
    x = jax.random.normal(kx, (batch, seq, vocab_size), jnp.float32)
    params = make_params(kp, max_len=max_len, vocab_size=vocab_size, hidden=hidden)

    # block_b=8 -> 2 parallel grid steps (keeps both v7x TensorCores busy).
    dec, attn, pos_enc = attention_model_forward(x, params, block_b=8)
    jax.block_until_ready((dec, attn, pos_enc))

    # sanity-check against the pure-JAX f32 reference
    # (loose tol: bf16 MXU operands + approx reciprocal in the encoder softmax)
    dec_ref, attn_ref = reference_forward(x, params)
    np.testing.assert_allclose(np.asarray(dec), np.asarray(dec_ref), rtol=4e-2, atol=4e-2)
    np.testing.assert_allclose(np.asarray(attn), np.asarray(attn_ref), rtol=4e-2, atol=4e-2)
    assert dec.shape == (batch, 1, max_len + 1)
    assert attn.shape == (batch, 1, seq)
    assert pos_enc.shape == (1, seq, hidden)

    print("KERNEL_OK")
</pallas_src>

<mosaic_0001>
module attributes {stable_mosaic.version = 11 : i64} {
  func.func @attention_model_kernel(%arg0: i32, %arg1: memref<128x3xbf16, #tpu.memory_space<vmem>>, %arg2: memref<16x64xf32, #tpu.memory_space<vmem>>, %arg3: memref<3x64xbf16, #tpu.memory_space<vmem>>, %arg4: memref<1x64xf32, #tpu.memory_space<vmem>>, %arg5: memref<1x64xf32, #tpu.memory_space<vmem>>, %arg6: memref<1x64xf32, #tpu.memory_space<vmem>>, %arg7: memref<64x128xbf16, #tpu.memory_space<vmem>>, %arg8: memref<1x128xf32, #tpu.memory_space<vmem>>, %arg9: memref<128x64xbf16, #tpu.memory_space<vmem>>, %arg10: memref<1x64xf32, #tpu.memory_space<vmem>>, %arg11: memref<1x64xf32, #tpu.memory_space<vmem>>, %arg12: memref<1x64xf32, #tpu.memory_space<vmem>>, %arg13: memref<1x64xf32, #tpu.memory_space<vmem>>, %arg14: memref<64x128xbf16, #tpu.memory_space<vmem>>, %arg15: memref<1x128xf32, #tpu.memory_space<vmem>>, %arg16: memref<8x128xf32, #tpu.memory_space<vmem>>, %arg17: memref<8x16xf32, #tpu.memory_space<vmem>>) attributes {dimension_semantics = [#tpu.dimension_semantics<parallel>], iteration_bounds = array<i64: 2>, scalar_prefetch = 0 : i64, scratch_operands = 0 : i64, tpu.core_type = #tpu.core_type<tc>, window_params = [{transform_indices = @transform_0, window_bounds = array<i64: 128, 3>}, {pipeline_mode = #tpu.pipeline_mode<synchronous>, transform_indices = @transform_1, window_bounds = array<i64: 16, 64>}, {pipeline_mode = #tpu.pipeline_mode<synchronous>, transform_indices = @transform_2, window_bounds = array<i64: 3, 64>}, {pipeline_mode = #tpu.pipeline_mode<synchronous>, transform_indices = @transform_3, window_bounds = array<i64: 1, 64>}, {pipeline_mode = #tpu.pipeline_mode<synchronous>, transform_indices = @transform_4, window_bounds = array<i64: 1, 64>}, {pipeline_mode = #tpu.pipeline_mode<synchronous>, transform_indices = @transform_5, window_bounds = array<i64: 1, 64>}, {pipeline_mode = #tpu.pipeline_mode<synchronous>, transform_indices = @transform_6, window_bounds = array<i64: 64, 128>}, {pipeline_mode = #tpu.pipeline_mode<synchronous>, transform_indices = @transform_7, window_bounds = array<i64: 1, 128>}, {pipeline_mode = #tpu.pipeline_mode<synchronous>, transform_indices = @transform_8, window_bounds = array<i64: 128, 64>}, {pipeline_mode = #tpu.pipeline_mode<synchronous>, transform_indices = @transform_9, window_bounds = array<i64: 1, 64>}, {pipeline_mode = #tpu.pipeline_mode<synchronous>, transform_indices = @transform_10, window_bounds = array<i64: 1, 64>}, {pipeline_mode = #tpu.pipeline_mode<synchronous>, transform_indices = @transform_11, window_bounds = array<i64: 1, 64>}, {pipeline_mode = #tpu.pipeline_mode<synchronous>, transform_indices = @transform_12, window_bounds = array<i64: 1, 64>}, {pipeline_mode = #tpu.pipeline_mode<synchronous>, transform_indices = @transform_13, window_bounds = array<i64: 64, 128>}, {pipeline_mode = #tpu.pipeline_mode<synchronous>, transform_indices = @transform_14, window_bounds = array<i64: 1, 128>}, {transform_indices = @transform_15, window_bounds = array<i64: 8, 128>}, {transform_indices = @transform_16, window_bounds = array<i64: 8, 16>}]} {
    %c0 = arith.constant 0 : index
    %c0_0 = arith.constant 0 : index
    %0 = vector.load %arg5[%c0, %c0_0] : memref<1x64xf32, #tpu.memory_space<vmem>>, vector<1x64xf32>
    %c0_1 = arith.constant 0 : index
    %c0_2 = arith.constant 0 : index
    %1 = vector.load %arg6[%c0_1, %c0_2] : memref<1x64xf32, #tpu.memory_space<vmem>>, vector<1x64xf32>
    %2 = tpu.iota {dimensions = array<i32: 2>} : vector<1x1x16xi32>
    %c11_i32 = arith.constant 11 : i32
    %3 = vector.broadcast %c11_i32 : i32 to vector<1x1x16xi32>
    %4 = arith.cmpi slt, %2, %3 : vector<1x1x16xi32>
    %cst = arith.constant 0.000000e+00 : f32
    %cst_3 = arith.constant -1.000000e+30 : f32
    %5 = vector.broadcast %cst : f32 to vector<1x1x16xf32>
    %6 = vector.broadcast %cst_3 : f32 to vector<1x1x16xf32>
    %7 = arith.select %4, %5, %6 : vector<1x1x16xi1>, vector<1x1x16xf32>
    %8 = tpu.iota {dimensions = array<i32: 1>} : vector<1x16xi32>
    %c11_i32_4 = arith.constant 11 : i32
    %9 = vector.broadcast %c11_i32_4 : i32 to vector<1x16xi32>
    %10 = arith.cmpi slt, %8, %9 : vector<1x16xi32>
    %cst_5 = arith.constant 0.000000e+00 : f32
    %cst_6 = arith.constant -1.000000e+30 : f32
    %11 = vector.broadcast %cst_5 : f32 to vector<1x16xf32>
    %12 = vector.broadcast %cst_6 : f32 to vector<1x16xf32>
    %13 = arith.select %10, %11, %12 : vector<1x16xi1>, vector<1x16xf32>
    %14 = tpu.iota {dimensions = array<i32: 1>} : vector<1x16x1xi32>
    %c11_i32_7 = arith.constant 11 : i32
    %15 = vector.broadcast %c11_i32_7 : i32 to vector<1x16x1xi32>
    %16 = arith.cmpi slt, %14, %15 : vector<1x16x1xi32>
    %cst_8 = arith.constant 0.000000e+00 : f32
    %cst_9 = arith.constant -1.000000e+30 : f32
    %17 = vector.broadcast %cst_8 : f32 to vector<1x16x1xf32>
    %18 = vector.broadcast %cst_9 : f32 to vector<1x16x1xf32>
    %19 = arith.select %16, %17, %18 : vector<1x16x1xi1>, vector<1x16x1xf32>
    %c0_10 = arith.constant 0 : index
    %c0_11 = arith.constant 0 : index
    %20 = vector.load %arg1[%c0_10, %c0_11] : memref<128x3xbf16, #tpu.memory_space<vmem>>, vector<128x3xbf16>
    %c0_12 = arith.constant 0 : index
    %c0_13 = arith.constant 0 : index
    %21 = vector.load %arg3[%c0_12, %c0_13] : memref<3x64xbf16, #tpu.memory_space<vmem>>, vector<3x64xbf16>
    %cst_14 = arith.constant dense<0.000000e+00> : vector<128x64xf32>
    %22 = tpu.matmul %20, %21, %cst_14 {dimension_numbers = #tpu.dot_dimension_numbers<[1], [0], [0], [1], [0, 0, 1, 1], [], []>} : vector<128x3xbf16>, vector<3x64xbf16>, vector<128x64xf32> -> vector<128x64xf32>
    %c0_15 = arith.constant 0 : index
    %c0_16 = arith.constant 0 : index
    %23 = vector.load %arg4[%c0_15, %c0_16] : memref<1x64xf32, #tpu.memory_space<vmem>>, vector<1x64xf32>
    %24 = vector.broadcast %23 : vector<1x64xf32> to vector<128x64xf32>
    %25 = arith.addf %22, %24 : vector<128x64xf32>
    %26 = vector.shape_cast %25 : vector<128x64xf32> to vector<8x16x64xf32>
    %c0_17 = arith.constant 0 : index
    %c0_18 = arith.constant 0 : index
    %27 = vector.load %arg2[%c0_17, %c0_18] : memref<16x64xf32, #tpu.memory_space<vmem>>, vector<16x64xf32>
    %28 = vector.shape_cast %27 : vector<16x64xf32> to vector<1x16x64xf32>
    %29 = vector.broadcast %28 : vector<1x16x64xf32> to vector<8x16x64xf32>
    %30 = arith.addf %26, %29 : vector<8x16x64xf32>
    %31 = arith.truncf %30 : vector<8x16x64xf32> to vector<8x16x64xbf16>
    "tpu.trace_start"() <{level = 10 : i32, message = "bqd,bkd->bqk"}> : () -> ()
    %cst_19 = arith.constant dense<0.000000e+00> : vector<8x16x16xf32>
    %32 = tpu.matmul %31, %31, %cst_19 {dimension_numbers = #tpu.dot_dimension_numbers<[2], [2], [1], [1], [0, 0, 0, 1, 1, 1], [0], [0]>} : vector<8x16x64xbf16>, vector<8x16x64xbf16>, vector<8x16x16xf32> -> vector<8x16x16xf32>
    "tpu.trace_stop"() : () -> ()
    %cst_20 = arith.constant 1.250000e-01 : f32
    %33 = vector.broadcast %cst_20 : f32 to vector<8x16x16xf32>
    %34 = arith.mulf %32, %33 : vector<8x16x16xf32>
    %35 = vector.broadcast %7 : vector<1x1x16xf32> to vector<8x16x16xf32>
    %36 = arith.addf %34, %35 : vector<8x16x16xf32>
    %cst_21 = arith.constant dense<0xFF800000> : vector<8x16xf32>
    %37 = vector.multi_reduction <maximumf>, %36, %cst_21 [2] : vector<8x16x16xf32> to vector<8x16xf32>
    %38 = vector.shape_cast %37 : vector<8x16xf32> to vector<8x16x1xf32>
    %39 = vector.broadcast %38 : vector<8x16x1xf32> to vector<8x16x16xf32>
    %40 = arith.subf %36, %39 : vector<8x16x16xf32>
    %41 = math.exp %40 : vector<8x16x16xf32>
    %cst_22 = arith.constant dense<0.000000e+00> : vector<8x16xf32>
    %42 = vector.multi_reduction <add>, %41, %cst_22 [2] : vector<8x16x16xf32> to vector<8x16xf32>
    %43 = vector.shape_cast %42 : vector<8x16xf32> to vector<8x16x1xf32>
    %44 = tpu.reciprocal %43 {approx = true} : vector<8x16x1xf32> -> vector<8x16x1xf32>
    %45 = vector.broadcast %44 : vector<8x16x1xf32> to vector<8x16x16xf32>
    %46 = arith.mulf %41, %45 : vector<8x16x16xf32>
    %47 = arith.truncf %46 : vector<8x16x16xf32> to vector<8x16x16xbf16>
    "tpu.trace_start"() <{level = 10 : i32, message = "bqk,bkd->bqd"}> : () -> ()
    %cst_23 = arith.constant dense<0.000000e+00> : vector<8x16x64xf32>
    %48 = tpu.matmul %47, %31, %cst_23 {dimension_numbers = #tpu.dot_dimension_numbers<[2], [1], [1], [2], [0, 0, 0, 1, 1, 2], [0], [0]>} : vector<8x16x16xbf16>, vector<8x16x64xbf16>, vector<8x16x64xf32> -> vector<8x16x64xf32>
    "tpu.trace_stop"() : () -> ()
    %49 = arith.addf %48, %30 : vector<8x16x64xf32>
    %cst_24 = arith.constant dense<0.000000e+00> : vector<8x16xf32>
    %50 = vector.multi_reduction <add>, %49, %cst_24 [2] : vector<8x16x64xf32> to vector<8x16xf32>
    %51 = vector.shape_cast %50 : vector<8x16xf32> to vector<8x16x1xf32>
    %cst_25 = arith.constant 6.400000e+01 : f32
    %52 = vector.broadcast %cst_25 : f32 to vector<8x16x1xf32>
    %53 = arith.divf %51, %52 : vector<8x16x1xf32>
    %54 = arith.mulf %49, %49 : vector<8x16x64xf32>
    %cst_26 = arith.constant dense<0.000000e+00> : vector<8x16xf32>
    %55 = vector.multi_reduction <add>, %54, %cst_26 [2] : vector<8x16x64xf32> to vector<8x16xf32>
    %56 = vector.shape_cast %55 : vector<8x16xf32> to vector<8x16x1xf32>
    %cst_27 = arith.constant 6.400000e+01 : f32
    %57 = vector.broadcast %cst_27 : f32 to vector<8x16x1xf32>
    %58 = arith.divf %56, %57 : vector<8x16x1xf32>
    %59 = arith.mulf %53, %53 : vector<8x16x1xf32>
    %60 = arith.subf %58, %59 : vector<8x16x1xf32>
    %61 = vector.broadcast %53 : vector<8x16x1xf32> to vector<8x16x64xf32>
    %62 = arith.subf %49, %61 : vector<8x16x64xf32>
    %cst_28 = arith.constant 9.99999974E-6 : f32
    %63 = vector.broadcast %cst_28 : f32 to vector<8x16x1xf32>
    %64 = arith.addf %60, %63 : vector<8x16x1xf32>
    %65 = math.rsqrt %64 : vector<8x16x1xf32>
    %66 = vector.broadcast %65 : vector<8x16x1xf32> to vector<8x16x64xf32>
    %67 = arith.mulf %62, %66 : vector<8x16x64xf32>
    %68 = vector.shape_cast %0 : vector<1x64xf32> to vector<1x1x64xf32>
    %69 = vector.broadcast %68 : vector<1x1x64xf32> to vector<8x16x64xf32>
    %70 = arith.mulf %67, %69 : vector<8x16x64xf32>
    %71 = vector.shape_cast %1 : vector<1x64xf32> to vector<1x1x64xf32>
    %72 = vector.broadcast %71 : vector<1x1x64xf32> to vector<8x16x64xf32>
    %73 = arith.addf %70, %72 : vector<8x16x64xf32>
    %74 = vector.shape_cast %73 : vector<8x16x64xf32> to vector<128x64xf32>
    %75 = arith.truncf %74 : vector<128x64xf32> to vector<128x64xbf16>
    %c0_29 = arith.constant 0 : index
    %c0_30 = arith.constant 0 : index
    %76 = vector.load %arg7[%c0_29, %c0_30] : memref<64x128xbf16, #tpu.memory_space<vmem>>, vector<64x128xbf16>
    %cst_31 = arith.constant dense<0.000000e+00> : vector<128x128xf32>
    %77 = tpu.matmul %75, %76, %cst_31 {dimension_numbers = #tpu.dot_dimension_numbers<[1], [0], [0], [1], [0, 0, 1, 1], [], []>} : vector<128x64xbf16>, vector<64x128xbf16>, vector<128x128xf32> -> vector<128x128xf32>
    %c0_32 = arith.constant 0 : index
    %c0_33 = arith.constant 0 : index
    %78 = vector.load %arg8[%c0_32, %c0_33] : memref<1x128xf32, #tpu.memory_space<vmem>>, vector<1x128xf32>
    %79 = vector.broadcast %78 : vector<1x128xf32> to vector<128x128xf32>
    %80 = arith.addf %77, %79 : vector<128x128xf32>
    %cst_34 = arith.constant 0.000000e+00 : f32
    %81 = vector.broadcast %cst_34 : f32 to vector<128x128xf32>
    %82 = arith.maximumf %80, %81 : vector<128x128xf32>
    %83 = arith.truncf %82 : vector<128x128xf32> to vector<128x128xbf16>
    %c0_35 = arith.constant 0 : index
    %c0_36 = arith.constant 0 : index
    %84 = vector.load %arg9[%c0_35, %c0_36] : memref<128x64xbf16, #tpu.memory_space<vmem>>, vector<128x64xbf16>
    %cst_37 = arith.constant dense<0.000000e+00> : vector<128x64xf32>
    %85 = tpu.matmul %83, %84, %cst_37 {dimension_numbers = #tpu.dot_dimension_numbers<[1], [0], [0], [1], [0, 0, 1, 1], [], []>} : vector<128x128xbf16>, vector<128x64xbf16>, vector<128x64xf32> -> vector<128x64xf32>
    %86 = arith.addf %74, %85 : vector<128x64xf32>
    %c0_38 = arith.constant 0 : index
    %c0_39 = arith.constant 0 : index
    %87 = vector.load %arg10[%c0_38, %c0_39] : memref<1x64xf32, #tpu.memory_space<vmem>>, vector<1x64xf32>
    %88 = vector.broadcast %87 : vector<1x64xf32> to vector<128x64xf32>
    %89 = arith.addf %86, %88 : vector<128x64xf32>
    %c0_40 = arith.constant 0 : index
    %c0_41 = arith.constant 0 : index
    %90 = vector.load %arg11[%c0_40, %c0_41] : memref<1x64xf32, #tpu.memory_space<vmem>>, vector<1x64xf32>
    %c0_42 = arith.constant 0 : index
    %c0_43 = arith.constant 0 : index
    %91 = vector.load %arg12[%c0_42, %c0_43] : memref<1x64xf32, #tpu.memory_space<vmem>>, vector<1x64xf32>
    %cst_44 = arith.constant dense<0.000000e+00> : vector<128xf32>
    %92 = vector.multi_reduction <add>, %89, %cst_44 [1] : vector<128x64xf32> to vector<128xf32>
    %93 = vector.shape_cast %92 : vector<128xf32> to vector<128x1xf32>
    %cst_45 = arith.constant 6.400000e+01 : f32
    %94 = vector.broadcast %cst_45 : f32 to vector<128x1xf32>
    %95 = arith.divf %93, %94 : vector<128x1xf32>
    %96 = arith.mulf %89, %89 : vector<128x64xf32>
    %cst_46 = arith.constant dense<0.000000e+00> : vector<128xf32>
    %97 = vector.multi_reduction <add>, %96, %cst_46 [1] : vector<128x64xf32> to vector<128xf32>
    %98 = vector.shape_cast %97 : vector<128xf32> to vector<128x1xf32>
    %cst_47 = arith.constant 6.400000e+01 : f32
    %99 = vector.broadcast %cst_47 : f32 to vector<128x1xf32>
    %100 = arith.divf %98, %99 : vector<128x1xf32>
    %101 = arith.mulf %95, %95 : vector<128x1xf32>
    %102 = arith.subf %100, %101 : vector<128x1xf32>
    %103 = vector.broadcast %95 : vector<128x1xf32> to vector<128x64xf32>
    %104 = arith.subf %89, %103 : vector<128x64xf32>
    %cst_48 = arith.constant 9.99999974E-6 : f32
    %105 = vector.broadcast %cst_48 : f32 to vector<128x1xf32>
    %106 = arith.addf %102, %105 : vector<128x1xf32>
    %107 = math.rsqrt %106 : vector<128x1xf32>
    %108 = vector.broadcast %107 : vector<128x1xf32> to vector<128x64xf32>
    %109 = arith.mulf %104, %108 : vector<128x64xf32>
    %110 = vector.broadcast %90 : vector<1x64xf32> to vector<128x64xf32>
    %111 = arith.mulf %109, %110 : vector<128x64xf32>
    %112 = vector.broadcast %91 : vector<1x64xf32> to vector<128x64xf32>
    %113 = arith.addf %111, %112 : vector<128x64xf32>
    %114 = vector.shape_cast %113 : vector<128x64xf32> to vector<8x16x64xf32>
    %c0_49 = arith.constant 0 : index
    %c0_50 = arith.constant 0 : index
    %115 = vector.load %arg13[%c0_49, %c0_50] : memref<1x64xf32, #tpu.memory_space<vmem>>, vector<1x64xf32>
    %116 = vector.shape_cast %115 : vector<1x64xf32> to vector<1x1x64xf32>
    %117 = vector.broadcast %116 : vector<1x1x64xf32> to vector<8x16x64xf32>
    %118 = arith.mulf %114, %117 : vector<8x16x64xf32>
    %cst_51 = arith.constant dense<0.000000e+00> : vector<8x16xf32>
    %119 = vector.multi_reduction <add>, %118, %cst_51 [2] : vector<8x16x64xf32> to vector<8x16xf32>
    %cst_52 = arith.constant 1.250000e-01 : f32
    %120 = vector.broadcast %cst_52 : f32 to vector<8x16xf32>
    %121 = arith.mulf %119, %120 : vector<8x16xf32>
    %122 = vector.broadcast %13 : vector<1x16xf32> to vector<8x16xf32>
    %123 = arith.addf %121, %122 : vector<8x16xf32>
    %cst_53 = arith.constant dense<0xFF800000> : vector<8xf32>
    %124 = vector.multi_reduction <maximumf>, %123, %cst_53 [1] : vector<8x16xf32> to vector<8xf32>
    %125 = vector.shape_cast %124 : vector<8xf32> to vector<8x1xf32>
    %126 = vector.broadcast %125 : vector<8x1xf32> to vector<8x16xf32>
    %127 = arith.subf %123, %126 : vector<8x16xf32>
    %128 = math.exp %127 : vector<8x16xf32>
    %cst_54 = arith.constant dense<0.000000e+00> : vector<8xf32>
    %129 = vector.multi_reduction <add>, %128, %cst_54 [1] : vector<8x16xf32> to vector<8xf32>
    %130 = vector.shape_cast %129 : vector<8xf32> to vector<8x1xf32>
    %131 = vector.broadcast %130 : vector<8x1xf32> to vector<8x16xf32>
    %132 = arith.divf %128, %131 : vector<8x16xf32>
    %cst_55 = arith.constant dense<0.000000e+00> : vector<8x16xf32>
    %133 = vector.multi_reduction <add>, %118, %cst_55 [2] : vector<8x16x64xf32> to vector<8x16xf32>
    %134 = vector.shape_cast %133 : vector<8x16xf32> to vector<8x16x1xf32>
    %cst_56 = arith.constant 1.250000e-01 : f32
    %135 = vector.broadcast %cst_56 : f32 to vector<8x16x1xf32>
    %136 = arith.mulf %134, %135 : vector<8x16x1xf32>
    %137 = vector.broadcast %19 : vector<1x16x1xf32> to vector<8x16x1xf32>
    %138 = arith.addf %136, %137 : vector<8x16x1xf32>
    %cst_57 = arith.constant dense<0xFF800000> : vector<8x1xf32>
    %139 = vector.multi_reduction <maximumf>, %138, %cst_57 [1] : vector<8x16x1xf32> to vector<8x1xf32>
    %140 = vector.shape_cast %139 : vector<8x1xf32> to vector<8x1x1xf32>
    %141 = vector.broadcast %140 : vector<8x1x1xf32> to vector<8x16x1xf32>
    %142 = arith.subf %138, %141 : vector<8x16x1xf32>
    %143 = math.exp %142 : vector<8x16x1xf32>
    %cst_58 = arith.constant dense<0.000000e+00> : vector<8x1xf32>
    %144 = vector.multi_reduction <add>, %143, %cst_58 [1] : vector<8x16x1xf32> to vector<8x1xf32>
    %145 = vector.shape_cast %144 : vector<8x1xf32> to vector<8x1x1xf32>
    %146 = vector.broadcast %145 : vector<8x1x1xf32> to vector<8x16x1xf32>
    %147 = arith.divf %143, %146 : vector<8x16x1xf32>
    %148 = vector.broadcast %147 : vector<8x16x1xf32> to vector<8x16x64xf32>
    %149 = arith.mulf %148, %114 : vector<8x16x64xf32>
    %cst_59 = arith.constant dense<0.000000e+00> : vector<8x64xf32>
    %150 = vector.multi_reduction <add>, %149, %cst_59 [1] : vector<8x16x64xf32> to vector<8x64xf32>
    %151 = vector.broadcast %115 : vector<1x64xf32> to vector<8x64xf32>
    %152 = arith.addf %150, %151 : vector<8x64xf32>
    %cst_60 = arith.constant dense<0.000000e+00> : vector<8xf32>
    %153 = vector.multi_reduction <add>, %152, %cst_60 [1] : vector<8x64xf32> to vector<8xf32>
    %154 = vector.shape_cast %153 : vector<8xf32> to vector<8x1xf32>
    %cst_61 = arith.constant 6.400000e+01 : f32
    %155 = vector.broadcast %cst_61 : f32 to vector<8x1xf32>
    %156 = arith.divf %154, %155 : vector<8x1xf32>
    %157 = arith.mulf %152, %152 : vector<8x64xf32>
    %cst_62 = arith.constant dense<0.000000e+00> : vector<8xf32>
    %158 = vector.multi_reduction <add>, %157, %cst_62 [1] : vector<8x64xf32> to vector<8xf32>
    %159 = vector.shape_cast %158 : vector<8xf32> to vector<8x1xf32>
    %cst_63 = arith.constant 6.400000e+01 : f32
    %160 = vector.broadcast %cst_63 : f32 to vector<8x1xf32>
    %161 = arith.divf %159, %160 : vector<8x1xf32>
    %162 = arith.mulf %156, %156 : vector<8x1xf32>
    %163 = arith.subf %161, %162 : vector<8x1xf32>
    %164 = vector.broadcast %156 : vector<8x1xf32> to vector<8x64xf32>
    %165 = arith.subf %152, %164 : vector<8x64xf32>
    %cst_64 = arith.constant 9.99999974E-6 : f32
    %166 = vector.broadcast %cst_64 : f32 to vector<8x1xf32>
    %167 = arith.addf %163, %166 : vector<8x1xf32>
    %168 = math.rsqrt %167 : vector<8x1xf32>
    %169 = vector.broadcast %168 : vector<8x1xf32> to vector<8x64xf32>
    %170 = arith.mulf %165, %169 : vector<8x64xf32>
    %171 = vector.broadcast %0 : vector<1x64xf32> to vector<8x64xf32>
    %172 = arith.mulf %170, %171 : vector<8x64xf32>
    %173 = vector.broadcast %1 : vector<1x64xf32> to vector<8x64xf32>
    %174 = arith.addf %172, %173 : vector<8x64xf32>
    %175 = arith.truncf %174 : vector<8x64xf32> to vector<8x64xbf16>
    %c0_65 = arith.constant 0 : index
    %c0_66 = arith.constant 0 : index
    %176 = vector.load %arg14[%c0_65, %c0_66] : memref<64x128xbf16, #tpu.memory_space<vmem>>, vector<64x128xbf16>
    %cst_67 = arith.constant dense<0.000000e+00> : vector<8x128xf32>
    %177 = tpu.matmul %175, %176, %cst_67 {dimension_numbers = #tpu.dot_dimension_numbers<[1], [0], [0], [1], [0, 0, 1, 1], [], []>} : vector<8x64xbf16>, vector<64x128xbf16>, vector<8x128xf32> -> vector<8x128xf32>
    %c0_68 = arith.constant 0 : index
    %c0_69 = arith.constant 0 : index
    %178 = vector.load %arg15[%c0_68, %c0_69] : memref<1x128xf32, #tpu.memory_space<vmem>>, vector<1x128xf32>
    %179 = vector.broadcast %178 : vector<1x128xf32> to vector<8x128xf32>
    %180 = arith.addf %177, %179 : vector<8x128xf32>
    %c0_70 = arith.constant 0 : index
    %c0_71 = arith.constant 0 : index
    %181 = vector.load %arg16[%c0_70, %c0_71] : memref<8x128xf32, #tpu.memory_space<vmem>>, vector<8x128xf32>
    tpu.vector_store %arg16[%c0_70, %c0_71], %180 {strides = array<i32>} : memref<8x128xf32, #tpu.memory_space<vmem>>, vector<8x128xf32>,
    %c0_72 = arith.constant 0 : index
    %c0_73 = arith.constant 0 : index
    %182 = vector.load %arg17[%c0_72, %c0_73] : memref<8x16xf32, #tpu.memory_space<vmem>>, vector<8x16xf32>
    tpu.vector_store %arg17[%c0_72, %c0_73], %132 {strides = array<i32>} : memref<8x16xf32, #tpu.memory_space<vmem>>, vector<8x16xf32>,
    return
  }
  func.func @transform_0(%arg0: i32) -> (i32, i32) {
    %c0_i32 = arith.constant 0 : i32
    %c0_i32_0 = arith.constant 0 : i32
    return %arg0, %c0_i32 : i32, i32
  }
  func.func @transform_1(%arg0: i32) -> (i32, i32) {
    %c0_i32 = arith.constant 0 : i32
    %c0_i32_0 = arith.constant 0 : i32
    %c0_i32_1 = arith.constant 0 : i32
    return %c0_i32, %c0_i32_0 : i32, i32
  }
  func.func @transform_2(%arg0: i32) -> (i32, i32) {
    %c0_i32 = arith.constant 0 : i32
    %c0_i32_0 = arith.constant 0 : i32
    %c0_i32_1 = arith.constant 0 : i32
    return %c0_i32, %c0_i32_0 : i32, i32
  }
  func.func @transform_3(%arg0: i32) -> (i32, i32) {
    %c0_i32 = arith.constant 0 : i32
    %c0_i32_0 = arith.constant 0 : i32
    %c0_i32_1 = arith.constant 0 : i32
    return %c0_i32, %c0_i32_0 : i32, i32
  }
  func.func @transform_4(%arg0: i32) -> (i32, i32) {
    %c0_i32 = arith.constant 0 : i32
    %c0_i32_0 = arith.constant 0 : i32
    %c0_i32_1 = arith.constant 0 : i32
    return %c0_i32, %c0_i32_0 : i32, i32
  }
  func.func @transform_5(%arg0: i32) -> (i32, i32) {
    %c0_i32 = arith.constant 0 : i32
    %c0_i32_0 = arith.constant 0 : i32
    %c0_i32_1 = arith.constant 0 : i32
    return %c0_i32, %c0_i32_0 : i32, i32
  }
  func.func @transform_6(%arg0: i32) -> (i32, i32) {
    %c0_i32 = arith.constant 0 : i32
    %c0_i32_0 = arith.constant 0 : i32
    %c0_i32_1 = arith.constant 0 : i32
    return %c0_i32, %c0_i32_0 : i32, i32
  }
  func.func @transform_7(%arg0: i32) -> (i32, i32) {
    %c0_i32 = arith.constant 0 : i32
    %c0_i32_0 = arith.constant 0 : i32
    %c0_i32_1 = arith.constant 0 : i32
    return %c0_i32, %c0_i32_0 : i32, i32
  }
  func.func @transform_8(%arg0: i32) -> (i32, i32) {
    %c0_i32 = arith.constant 0 : i32
    %c0_i32_0 = arith.constant 0 : i32
    %c0_i32_1 = arith.constant 0 : i32
    return %c0_i32, %c0_i32_0 : i32, i32
  }
  func.func @transform_9(%arg0: i32) -> (i32, i32) {
    %c0_i32 = arith.constant 0 : i32
    %c0_i32_0 = arith.constant 0 : i32
    %c0_i32_1 = arith.constant 0 : i32
    return %c0_i32, %c0_i32_0 : i32, i32
  }
  func.func @transform_10(%arg0: i32) -> (i32, i32) {
    %c0_i32 = arith.constant 0 : i32
    %c0_i32_0 = arith.constant 0 : i32
    %c0_i32_1 = arith.constant 0 : i32
    return %c0_i32, %c0_i32_0 : i32, i32
  }
  func.func @transform_11(%arg0: i32) -> (i32, i32) {
    %c0_i32 = arith.constant 0 : i32
    %c0_i32_0 = arith.constant 0 : i32
    %c0_i32_1 = arith.constant 0 : i32
    return %c0_i32, %c0_i32_0 : i32, i32
  }
  func.func @transform_12(%arg0: i32) -> (i32, i32) {
    %c0_i32 = arith.constant 0 : i32
    %c0_i32_0 = arith.constant 0 : i32
    %c0_i32_1 = arith.constant 0 : i32
    return %c0_i32, %c0_i32_0 : i32, i32
  }
  func.func @transform_13(%arg0: i32) -> (i32, i32) {
    %c0_i32 = arith.constant 0 : i32
    %c0_i32_0 = arith.constant 0 : i32
    %c0_i32_1 = arith.constant 0 : i32
    return %c0_i32, %c0_i32_0 : i32, i32
  }
  func.func @transform_14(%arg0: i32) -> (i32, i32) {
    %c0_i32 = arith.constant 0 : i32
    %c0_i32_0 = arith.constant 0 : i32
    %c0_i32_1 = arith.constant 0 : i32
    return %c0_i32, %c0_i32_0 : i32, i32
  }
  func.func @transform_15(%arg0: i32) -> (i32, i32) {
    %c0_i32 = arith.constant 0 : i32
    %c0_i32_0 = arith.constant 0 : i32
    return %arg0, %c0_i32 : i32, i32
  }
  func.func @transform_16(%arg0: i32) -> (i32, i32) {
    %c0_i32 = arith.constant 0 : i32
    %c0_i32_0 = arith.constant 0 : i32
    return %arg0, %c0_i32 : i32, i32
  }
}

</mosaic_0001>

<bundles_post_ra>
// kernel: tpu_custom_call.1
= control target key start
LH: loop header
LB: loop body
LE: loop exit
PB: predicated region body
PF: predicated region fallthrough
CT: control target
= control target key end

     0   :  { %s6692_s0 = inlined_call_operand.vmem [shape: bf16[256,3], index: 0, kind: input, shape index: {}]   ;;  %s6693_s1 = inlined_call_operand.vmem [shape: f32[16,64], index: 1, kind: input, shape index: {}]   ;;  %s6694_s2 = inlined_call_operand.vmem [shape: bf16[3,64], index: 2, kind: input, shape index: {}]   ;;  %s6695_s3 = inlined_call_operand.vmem [shape: f32[1,64], index: 3, kind: input, shape index: {}]   ;;  %s6696_s4 = inlined_call_operand.vmem [shape: f32[1,64], index: 4, kind: input, shape index: {}]   ;;  %s6697_s5 = inlined_call_operand.vmem [shape: f32[1,64], index: 5, kind: input, shape index: {}]   ;;  %s6698_s6 = inlined_call_operand.vmem [shape: bf16[64,128], index: 6, kind: input, shape index: {}]   ;;  %s6699_s7 = inlined_call_operand.vmem [shape: f32[1,128], index: 7, kind: input, shape index: {}]   ;;  %s6700_s8 = inlined_call_operand.vmem [shape: bf16[128,64], index: 8, kind: input, shape index: {}]   ;;  %s6701_s9 = inlined_call_operand.vmem [shape: f32[1,64], index: 9, kind: input, shape index: {}]   ;;  %s6702_s10 = inlined_call_operand.vmem [shape: f32[1,64], index: 10, kind: input, shape index: {}]   ;;  %s6703_s11 = inlined_call_operand.vmem [shape: f32[1,64], index: 11, kind: input, shape index: {}]   ;;  %s6704_s12 = inlined_call_operand.vmem [shape: f32[1,64], index: 12, kind: input, shape index: {}]   ;;  %s6705_s13 = inlined_call_operand.vmem [shape: bf16[64,128], index: 13, kind: input, shape index: {}]   ;;  %s6706_s14 = inlined_call_operand.vmem [shape: f32[1,128], index: 14, kind: input, shape index: {}]   ;;  %s6707_s15 = inlined_call_operand.hbm [shape: f32[16,128], index: 15, kind: output, shape index: {0}]   ;;  %s6708_s16 = inlined_call_operand.hbm [shape: f32[16,16], index: 16, kind: output, shape index: {1}]  }
   0x1   :  { %6727 = sst [smem:[#allocation24_spill]] %s6692_s0 }
   0x2   :  { %6728 = sst [smem:[#allocation25_spill]] %s6693_s1 }
   0x3   :  { %6729 = sst [smem:[#allocation26_spill]] %s6694_s2 }
   0x4   :  { %6730 = sst [smem:[#allocation27_spill]] %s6695_s3 }
   0x5   :  { %6731 = sst [smem:[#allocation28_spill]] %s6696_s4 }
   0x6   :  { %6732 = sst [smem:[#allocation29_spill]] %s6697_s5 }
   0x7   :  { %6733 = sst [smem:[#allocation30_spill]] %s6698_s6 }
   0x8   :  { %22 = vsyncpa [#allocation3], 0 }
   0x9   :  { %24 = vsyncpa [#allocation3 + $0x1], 0 }
   0xa   :  { %25 = vsyncpa [#allocation5], 0 }
   0xb   :  { %27 = vsyncpa [#allocation5 + $0x1], 0  ;;  %s4496_s21 = smov 0   ;;  %s4498_s22 = smov 0  }
   0xc   :  { %s4500_s23 = smov 0   ;;  %s4502_s24 = smov 0  }
   0xd LB: > { %6734 = sst [smem:[#allocation8_spill]] %s4401_s23  ;;  %s4517_s25 = sadd.s32 4294967295, %s4405_s24   ;;  %s4405_s24 = sphi %s4502_s24, %s6804_s24   ;;  %s4401_s23 = sphi %s4500_s23, %s6801_s23   ;;  %s4397_s22 = sphi %s4498_s22, %s6803_s22   ;;  %s4393_s21 = sphi %s4496_s21, %s6802_s21  }
   0xe   : > { %s3839_s26 = sadd.s32 4294967294, %s4405_s24   ;;  %s4521_s27 = sadd.s32 1, %s4405_s24  }
   0xf   : > { %s360_s28 = sadd.s32 1, %s4401_s23  ;;  %s357_s29 = ssub.s32 %s4405_s24, %s4521_s27 }
  0x10   : > { %p370_p0 = scmp.ne.s32.totalorder %s4401_s23, %s4397_s22  ;;  %p358_p1 = scmp.eq.s32.totalorder %s357_s29, 0 }
  0x11   : > { %p371_p2 = scmp.eq.s32.totalorder %s4517_s25, 1  ;;  %p376_p3 = scmp.ne.s32.totalorder %s4397_s22, %s4393_s21 }
  0x12   : > { %p377_p4 = scmp.eq.s32.totalorder %s3839_s26, 1  ;;  %p3842_p7 = scmp.ge.s32.totalorder %s4405_s24, 1 }
  0x13   : > { %s4532_s30 = scalar_select %p358_p1, %s4401_s23, %s360_s28  }
  0x14   : > { %p4534_p5 = por %p371_p2, %p370_p0  ;;  %p4538_p6 = por %p377_p4, %p376_p3 }
  0x15   : > { %6735 = sst [smem:[#allocation9_spill]] %s4532_s30  ;;  %p472_p8 = scmp.lt.s32.totalorder %s4405_s24, 3 }
  0x17   : > { %p473_p9 = pnand %p3842_p7, %p472_p8 }
  0x19   : > { %476 = sbr.rel (%p473_p9) target bundleno = 2460 (0x99c), region = 80 }
  0x1e   : > { %s6738_s2 = sld [smem:[#allocation26_spill]]  ;;  %vm633_vm0 = vcmask 1040384   ;;  %vm634_vm1 = vcmask 1041408   ;;  %s3845_s20 = sshll.u32 %s4517_s25, 4  ;;  %v4407_v1 = vmov 65535   ;;  %vm608_vm2 = vcmask 23552  }
  0x1f   : > { %v635_v2 = vsel %vm633_vm0, 4294967295, %v4407_v1  ;;  %p528_p10 = scmp.lt.s32.totalorder %s3845_s20, 31  ;;  %s6739_s30 = sld [smem:[#allocation24_spill]]  ;;  %vm728_vm3 = vcmask 523264   ;;  %vm932_vm5 = vcmask 130048  }
  0x20   : > { %v636_v3 = vsel %vm634_vm1, %v635_v2, 0  ;;  %s6740_s3 = sld [smem:[#allocation27_spill]]  ;;  %s6479_s19 = sand.u32 1, %s4397_s22  }
  0x21   : > { %s6806_s20 = smov (!%p528_p10, %s3845_s20), 31  ;;  %s6741_s1 = sld [smem:[#allocation25_spill]] }
  0x22   : > { %s3846_s26 = sshll.u32 %s6806_s20, 2  ;;  %s6743_s6 = sld [smem:[#allocation30_spill]] }
  0x23   : > { %s6747_s4 = sld [smem:[#allocation28_spill]]  ;;  %s6726_s20 = sshll.u32 %s6479_s19, 3 }
  0x24   : > { %v563_v0 = vld [vmem:[%s6738_s2] sm:$0x3]  ;;  %s6748_s5 = sld [smem:[#allocation29_spill]]  ;;  %s6487_s28 = scalar_lea.vmem [#allocation2], %s6726_s20 }
  0x25   : > { %v638_v4 = vand.u32 %v636_v3, %v563_v0  ;;  %s531_s23 = scalar_lea.vmem %s6739_s30, %s3846_s26  ;;  %s3978_s29 = sshll.u32 %s4517_s25, 3 }
  0x26   : > { %v3982_v5 = vld [vmem:[%s531_s23] sm:$0xff]  ;;  %v3983_v6 = vld [vmem:[%s531_s23 + $0x8] sm:$0xff]  ;;  %v3984_v7 = vld [vmem:[%s531_s23 + $0x10] sm:$0xff]  ;;  %s3730_s26 = sshll.u32 %s6487_s28, 4  ;;  %s3731_s26 = int_to_ptr.vmem [resolvable:$true] %s3730_s26 }
  0x27   : > { %647 = vmatpush.bf16.msra.mxu0 %v638_v4  ;;  %v3985_v8 = vld [vmem:[%s531_s23 + $0x18] sm:$0xff]  ;;  %v3986_v9 = vld [vmem:[%s531_s23 + $0x20] sm:$0xff]  ;;  %v3987_v10 = vld [vmem:[%s531_s23 + $0x28] sm:$0xff] }
  0x28   : > { %v3988_v11 = vld [vmem:[%s531_s23 + $0x30] sm:$0xff]  ;;  %v3989_v12 = vld [vmem:[%s531_s23 + $0x38] sm:$0xff]  ;;  %v4562_v13 = vld [vmem:[%s6740_s3] ss:$0 sm:$0xff]  ;;  %s3728_s23 = scalar_lea.hbm %s6707_s15, %s3978_s29 }
  0x29   : > { %v4568_v16 = vld [vmem:[%s6741_s1] sm:$0xff]  ;;  %v4576_v19 = vld [vmem:[%s6741_s1 + $0x8] sm:$0xff]  ;;  %s3732_s20 = sshll.u32 %s3728_s23, 4  ;;  %s3713_s1 = scalar_lea.sflag [#allocation3], %s6479_s19  ;;  %s3733_s20 = int_to_ptr.hbm [resolvable:$true] %s3732_s20 }
  0x2a   : > { %3879 = vmatmul.msk.bf16.vlgmr.msra.gmra.mxu0 %vm608_vm2, %v3982_v5  ;;  %s4325_s2 = sshra.s32 %s3733_s20, 4  ;;  %s4326_s2 = int_to_ptr.hbm [resolvable:$true] %s4325_s2 }
  0x2b   : > { %s4327_s3 = scalar_lea.hbm %s4326_s2, 8  ;;  %p4332_p0 = scmp.lt.s32.totalorder %s4326_s2, %s6707_s15 }
  0x2c   : > { %p4328_p11 = scmp.ne.s32.totalorder %s4326_s2, %s4327_s3 }
  0x2e   : > { %p4329_p12 = pnand %p4328_p11, %p4534_p5 }
  0x30   : > { %p4330_p13 = pneg %p4329_p12 }
  0x3a   : > { %3880 = vmatmul.msk.bf16.gmra.mxu0 %vm608_vm2, %v3983_v6 }
  0x4a   : > { %3881 = vmatmul.msk.bf16.gmra.mxu0 %vm608_vm2, %v3984_v7 }
  0x5a   : > { %3882 = vmatmul.msk.bf16.gmra.mxu0 %vm608_vm2, %v3985_v8 }
  0x6a   : > { %3883 = vmatmul.msk.bf16.gmra.mxu0 %vm608_vm2, %v3986_v9 }
  0x7a   : > { %3884 = vmatmul.msk.bf16.gmra.mxu0 %vm608_vm2, %v3987_v10 }
  0x8a   : > { %3885 = vmatmul.msk.bf16.gmra.mxu0 %vm608_vm2, %v3988_v11 }
  0x9a   : > { %3886 = vmatmul.msk.bf16.gmra.mxu0 %vm608_vm2, %v3989_v12 }
  0xa7   : > { %v649_v14 = vpop.f32.mrf.mxu0 }
  0xa8   : > { %v650_v15 = vadd.f32 %v4562_v13, %v649_v14 }
  0xaa   : > { %v4571_v17 = vadd.f32 %v4568_v16, %v650_v15 }
  0xac   : > { %v707_v21 = vpack.c.bf16 %v4571_v17, %v4571_v17 }
  0xae   : > { %v725_v24 = vunpack.c.l.b16 %v707_v21 }
  0xaf   : > { %v651_v18 = vpop.f32.mrf.mxu0 }
  0xb0   : > { %v652_v20 = vadd.f32 %v4562_v13, %v651_v18 }
  0xb2   : > { %v4582_v22 = vadd.f32 %v4576_v19, %v652_v20 }
  0xb4   : > { %v708_v23 = vpack.c.bf16 %v4582_v22, %v4582_v22 }
  0xb6   : > { %v726_v25 = vunpack.c.l.b16 %v708_v23 }
  0xb7   : > { %v654_v26 = vpop.f32.mrf.mxu0 }
  0xb8   : > { %v4586_v27 = vpack.c.b16 %v726_v25, %v725_v24  ;;  %v655_v28 = vadd.f32 %v4562_v13, %v654_v26 }
  0xba   : > { %v730_v29 = vsel %vm728_vm3, %v4586_v27, 0  ;;  %v4592_v30 = vadd.f32 %v4568_v16, %v655_v28 }
  0xbb   : > { %739 = vmatpush.bf16.xpose.msrb.mxu0 %v730_v29 }
  0xbc   : > { %v709_v33 = vpack.c.bf16 %v4592_v30, %v4592_v30 }
  0xbe   : > { %v748_v36 = vunpack.c.l.b16 %v709_v33 }
  0xbf   : > { %v656_v31 = vpop.f32.mrf.mxu0 }
  0xc0   : > { %v657_v32 = vadd.f32 %v4562_v13, %v656_v31 }
  0xc2   : > { %v4598_v34 = vadd.f32 %v4576_v19, %v657_v32  ;;  %3887 = vmatmul.msk.bf16.vlgmr.msrb.gmra.mxu0 %vm728_vm3, %v4586_v27 }
  0xc4   : > { %v710_v35 = vpack.c.bf16 %v4598_v34, %v4598_v34 }
  0xc6   : > { %v749_v37 = vunpack.c.l.b16 %v710_v35 }
  0xc7   : > { %v659_v38 = vpop.f32.mrf.mxu0 }
  0xc8   : > { %v4604_v39 = vpack.c.b16 %v749_v37, %v748_v36  ;;  %v660_v40 = vadd.f32 %v4562_v13, %v659_v38 }
  0xca   : > { %v752_v41 = vsel %vm728_vm3, %v4604_v39, 0  ;;  %v4610_v42 = vadd.f32 %v4568_v16, %v660_v40 }
  0xcb   : > { %761 = vmatpush.bf16.xpose.msra.mxu2 %v752_v41 }
  0xcc   : > { %v711_v45 = vpack.c.bf16 %v4610_v42, %v4610_v42 }
  0xce   : > { %v770_v48 = vunpack.c.l.b16 %v711_v45 }
  0xcf   : > { %v661_v43 = vpop.f32.mrf.mxu0 }
  0xd0   : > { %v662_v44 = vadd.f32 %v4562_v13, %v661_v43 }
  0xd2   : > { %v4616_v46 = vadd.f32 %v4576_v19, %v662_v44  ;;  %3888 = vmatmul.msk.bf16.vlgmr.msra.gmra.mxu2 %vm728_vm3, %v4604_v39 }
  0xd4   : > { %v712_v47 = vpack.c.bf16 %v4616_v46, %v4616_v46 }
  0xd6   : > { %v771_v49 = vunpack.c.l.b16 %v712_v47 }
  0xd7   : > { %v664_v50 = vpop.f32.mrf.mxu0 }
  0xd8   : > { %v665_v51 = vadd.f32 %v4562_v13, %v664_v50  ;;  %v4623_v52 = vpack.c.b16 %v771_v49, %v770_v48 }
  0xda   : > { %v774_v53 = vsel %vm728_vm3, %v4623_v52, 0  ;;  %v4628_v54 = vadd.f32 %v4568_v16, %v665_v51 }
  0xdb   : > { %783 = vmatpush.bf16.xpose.msra.mxu3 %v774_v53 }
  0xdc   : > { %v713_v56 = vpack.c.bf16 %v4628_v54, %v4628_v54 }
  0xde   : > { %v792_v59 = vunpack.c.l.b16 %v713_v56 }
  0xdf   : > { %v666_v55 = vpop.f32.mrf.mxu0 }
  0xe0   : > { %v667_v57 = vadd.f32 %v4562_v13, %v666_v55 }
  0xe2   : > { %v4634_v58 = vadd.f32 %v4576_v19, %v667_v57  ;;  %3889 = vmatmul.msk.bf16.vlgmr.msra.gmra.mxu3 %vm728_vm3, %v4623_v52 }
  0xe4   : > { %v714_v60 = vpack.c.bf16 %v4634_v58, %v4634_v58 }
  0xe6   : > { %v793_v61 = vunpack.c.l.b16 %v714_v60  ;;  %v4408_v60 = vmov -1e+30  }
  0xe7   : > { %v669_v62 = vpop.f32.mrf.mxu0 }
  0xe8   : > { %v670_v63 = vadd.f32 %v4562_v13, %v669_v62  ;;  %v794_v0 = vpack.c.b16 %v793_v61, %v792_v59 }
  0xea   : > { %v796_v1 = vsel %vm728_vm3, %v794_v0, 0  ;;  %v4643_v2 = vadd.f32 %v4568_v16, %v670_v63 }
  0xeb   : > { %805 = vmatpush.bf16.xpose.msra.mxu1 %v796_v1 }
  0xec   : > { %v715_v4 = vpack.c.bf16 %v4643_v2, %v4643_v2 }
  0xee   : > { %v814_v7 = vunpack.c.l.b16 %v715_v4 }
  0xef   : > { %v671_v3 = vpop.f32.mrf.mxu0 }
  0xf0   : > { %v672_v5 = vadd.f32 %v4562_v13, %v671_v3 }
  0xf2   : > { %v4649_v6 = vadd.f32 %v4576_v19, %v672_v5  ;;  %3890 = vmatmul.msk.bf16.vlgmr.msra.gmra.mxu1 %vm728_vm3, %v794_v0 }
  0xf4   : > { %v716_v8 = vpack.c.bf16 %v4649_v6, %v4649_v6 }
  0xf6   : > { %v815_v9 = vunpack.c.l.b16 %v716_v8 }
  0xf7   : > { %v674_v10 = vpop.f32.mrf.mxu0 }
  0xf8   : > { %v675_v11 = vadd.f32 %v4562_v13, %v674_v10  ;;  %v816_v12 = vpack.c.b16 %v815_v9, %v814_v7 }
  0xfa   : > { %v818_v14 = vsel %vm728_vm3, %v816_v12, 0  ;;  %v4657_v15 = vadd.f32 %v4568_v16, %v675_v11 }
  0xfb   : > { %827 = vmatpush.bf16.xpose.msrb.mxu2 %v818_v14 }
  0xfc   : > { %v717_v20 = vpack.c.bf16 %v4657_v15, %v4657_v15 }
  0xfe   : > { %v836_v24 = vunpack.c.l.b16 %v717_v20 }
  0xff   : > { %v676_v18 = vpop.f32.mrf.mxu0 }
 0x100   : > { %v677_v21 = vadd.f32 %v4562_v13, %v676_v18 }
 0x102   : > { %v4663_v23 = vadd.f32 %v4576_v19, %v677_v21  ;;  %3891 = vmatmul.msk.bf16.vlgmr.msrb.gmra.mxu2 %vm728_vm3, %v816_v12 }
 0x104   : > { %v718_v25 = vpack.c.bf16 %v4663_v23, %v4663_v23 }
 0x106   : > { %v837_v26 = vunpack.c.l.b16 %v718_v25 }
 0x107   : > { %v679_v28 = vpop.f32.mrf.mxu0 }
 0x108   : > { %v680_v29 = vadd.f32 %v4562_v13, %v679_v28  ;;  %v838_v31 = vpack.c.b16 %v837_v26, %v836_v24 }
 0x10a   : > { %v840_v32 = vsel %vm728_vm3, %v838_v31, 0  ;;  %v4671_v33 = vadd.f32 %v4568_v16, %v680_v29 }
 0x10b   : > { %849 = vmatpush.bf16.xpose.msrb.mxu3 %v840_v32 }
 0x10c   : > { %v719_v36 = vpack.c.bf16 %v4671_v33, %v4671_v33 }
 0x10e   : > { %v858_v40 = vunpack.c.l.b16 %v719_v36 }
 0x10f   : > { %v681_v35 = vpop.f32.mrf.mxu0 }
 0x110   : > { %v682_v37 = vadd.f32 %v4562_v13, %v681_v35 }
 0x112   : > { %v4678_v38 = vadd.f32 %v4576_v19, %v682_v37  ;;  %3892 = vmatmul.msk.bf16.vlgmr.msrb.gmra.mxu3 %vm728_vm3, %v838_v31 }
 0x113   : > { %1141 = vmatpush.bf16.msra.mxu3 %v4586_v27 }
 0x114   : > { %v720_v41 = vpack.c.bf16 %v4678_v38, %v4678_v38 }
 0x116   : > { %v859_v43 = vunpack.c.l.b16 %v720_v41 }
 0x117   : > { %1210 = vmatpush.bf16.msrb.mxu3 %v794_v0  ;;  %v684_v44 = vpop.f32.mrf.mxu0 }
 0x118   : > { %v685_v27 = vadd.f32 %v4562_v13, %v684_v44  ;;  %v4684_v45 = vpack.c.b16 %v859_v43, %v858_v40 }
 0x11a   : > { %v862_v47 = vsel %vm728_vm3, %v4684_v45, 0  ;;  %v4689_v48 = vadd.f32 %v4568_v16, %v685_v27 }
 0x11b   : > { %871 = vmatpush.bf16.xpose.msrb.mxu1 %v862_v47 }
 0x11c   : > { %v721_v50 = vpack.c.bf16 %v4689_v48, %v4689_v48 }
 0x11e   : > { %v880_v55 = vunpack.c.l.b16 %v721_v50 }
 0x11f   : > { %v686_v49 = vpop.f32.mrf.mxu0 }
 0x120   : > { %v687_v51 = vadd.f32 %v4562_v13, %v686_v49  ;;  %v536_v13 = vlaneseq }
 0x122   : > { %v4696_v53 = vadd.f32 %v4576_v19, %v687_v51  ;;  %3893 = vmatmul.msk.bf16.vlgmr.msrb.gmra.mxu1 %vm728_vm3, %v4684_v45  ;;  %v4710_v19 = vand.u32 127, %v536_v13 }
 0x123   : > { %1164 = vmatpush.bf16.msra.mxu1 %v4604_v39 }
 0x124   : > { %v722_v16 = vpack.c.bf16 %v4696_v53, %v4696_v53  ;;  %6742 = vst [vmem:[#allocation10_spill] sm:$0xff] %v4710_v19  ;;  %vm538_vm4 = vcmp.lt.s32.totalorder %v4710_v19, 11 }
 0x125   : > { %v4714_v61 = vsel %vm538_vm4, 0.0, %v4408_v60 }
 0x126   : > { %v881_v56 = vunpack.c.l.b16 %v722_v16 }
 0x127   : > { %1233 = vmatpush.bf16.msrb.mxu1 %v816_v12 }
 0x128   : > { %v4702_v57 = vpack.c.b16 %v881_v56, %v880_v55 }
 0x12a   : > { %v884_v39 = vsel %vm728_vm3, %v4702_v57, 0 }
 0x12b   : > { %893 = vmatpush.bf16.xpose.msra.mxu2 %v884_v39 }
 0x132   : > { %3894 = vmatmul.msk.bf16.vlgmr.msra.gmra.mxu2 %vm728_vm3, %v4702_v57 }
 0x133   : > { %1187 = vmatpush.bf16.msrb.mxu2 %v4623_v52 }
 0x137   : > { %1256 = vmatpush.bf16.msra.mxu2 %v838_v31 }
 0x13f   : > { %v741_v59 = vpop.f32.mrf.mxu0 }
 0x140   : > { %v900_v62 = vmul.f32 0.125, %v741_v59 }
 0x142   : > { %v916_v63 = vadd.f32 %v900_v62, %v4714_v61 }
 0x144   : > { %v933_v52 = vsel %vm932_vm5, %v916_v63, -inf }
 0x145   : > { %934 = vmax.xlane.f32.xlu0 %v933_v52 }
 0x147   : > { %v743_v0 = vpop.f32.mrf.mxu0 }
 0x148   : > { %v901_v1 = vmul.f32 0.125, %v743_v0 }
 0x14a   : > { %v917_v3 = vadd.f32 %v901_v1, %v4714_v61 }
 0x14c   : > { %v936_v4 = vsel %vm932_vm5, %v917_v3, -inf }
 0x14d   : > { %937 = vmax.xlane.f32.xlu0 %v936_v4 }
 0x155   : > { %v763_v5 = vpop.f32.mrf.mxu2 }
 0x156   : > { %v902_v7 = vmul.f32 0.125, %v763_v5 }
 0x158   : > { %v4721_v8 = vadd.f32 %v902_v7, %v4714_v61 }
 0x15a   : > { %v939_v9 = vsel %vm932_vm5, %v4721_v8, -inf }
 0x15b   : > { %940 = vmax.xlane.f32.xlu0 %v939_v9 }
 0x15d   : > { %v765_v24 = vpop.f32.mrf.mxu2 }
 0x15e   : > { %v903_v31 = vmul.f32 0.125, %v765_v24 }
 0x160   : > { %v4741_v35 = vadd.f32 %v903_v31, %v4714_v61 }
 0x162   : > { %v942_v40 = vsel %vm932_vm5, %v4741_v35, -inf }
 0x165   : > { %v785_v10 = vpop.f32.mrf.mxu3 }
 0x166   : > { %v904_v11 = vmul.f32 0.125, %v785_v10 }
 0x168   : > { %v4726_v12 = vadd.f32 %v904_v11, %v4714_v61 }
 0x16a   : > { %v945_v14 = vsel %vm932_vm5, %v4726_v12, -inf }
 0x16b   : > { %946 = vmax.xlane.f32.xlu1 %v945_v14 }
 0x16d   : > { %v787_v18 = vpop.f32.mrf.mxu3 }
 0x16e   : > { %v905_v20 = vmul.f32 0.125, %v787_v18 }
 0x16f   : > { %v807_v21 = vpop.f32.mrf.mxu1 }
 0x170   : > { %v906_v25 = vmul.f32 0.125, %v807_v21  ;;  %v4731_v26 = vadd.f32 %v905_v20, %v4714_v61 }
 0x172   : > { %v948_v28 = vsel %vm932_vm5, %v4731_v26, -inf  ;;  %v4736_v29 = vadd.f32 %v906_v25, %v4714_v61 }
 0x173   : > { %949 = vmax.xlane.f32.xlu1 %v948_v28 }
 0x174   : > { %v951_v32 = vsel %vm932_vm5, %v4736_v29, -inf }
 0x175   : > { %952 = vmax.xlane.f32.xlu2 %v951_v32 }
 0x177   : > { %v809_v36 = vpop.f32.mrf.mxu1 }
 0x178   : > { %v907_v37 = vmul.f32 0.125, %v809_v36 }
 0x17a   : > { %v4746_v41 = vadd.f32 %v907_v37, %v4714_v61 }
 0x17b   : > { %943 = vmax.xlane.f32.xlu1 %v942_v40 }
 0x17c   : > { %v954_v43 = vsel %vm932_vm5, %v4746_v41, -inf }
 0x17d   : > { %955 = vmax.xlane.f32.xlu2 %v954_v43 }
 0x185   : > { %v829_v44 = vpop.f32.mrf.mxu2 }
 0x186   : > { %v908_v27 = vmul.f32 0.125, %v829_v44 }
 0x188   : > { %v4751_v47 = vadd.f32 %v908_v27, %v4714_v61 }
 0x18a   : > { %v957_v49 = vsel %vm932_vm5, %v4751_v47, -inf }
 0x18b   : > { %958 = vmax.xlane.f32.xlu2 %v957_v49 }
 0x18d   : > { %v831_v50 = vpop.f32.mrf.mxu2 }
 0x18e   : > { %v909_v51 = vmul.f32 0.125, %v831_v50 }
 0x190   : > { %v4756_v55 = vadd.f32 %v909_v51, %v4714_v61 }
 0x192   : > { %v960_v16 = vsel %vm932_vm5, %v4756_v55, -inf }
 0x193   : > { %961 = vmax.xlane.f32.xlu0 %v960_v16 }
 0x195   : > { %v851_v56 = vpop.f32.mrf.mxu3 }
 0x196   : > { %v910_v39 = vmul.f32 0.125, %v851_v56 }
 0x198   : > { %v4761_v59 = vadd.f32 %v910_v39, %v4714_v61 }
 0x19a   : > { %v963_v62 = vsel %vm932_vm5, %v4761_v59, -inf }
 0x19b   : > { %964 = vmax.xlane.f32.xlu1 %v963_v62 }
 0x19d   : > { %v853_v52 = vpop.f32.mrf.mxu3 }
 0x19e   : > { %v911_v0 = vmul.f32 0.125, %v853_v52 }
 0x19f   : > { %v873_v24 = vpop.f32.mrf.mxu1 }
 0x1a0   : > { %v4766_v1 = vadd.f32 %v911_v0, %v4714_v61  ;;  %v912_v28 = vmul.f32 0.125, %v873_v24 }
 0x1a2   : > { %v966_v4 = vsel %vm932_vm5, %v4766_v1, -inf }
 0x1a3   : > { %967 = vmax.xlane.f32.xlu2 %v966_v4 }
 0x1a7   : > { %v875_v44 = vpop.f32.mrf.mxu1 }
 0x1a8   : > { %v913_v39 = vmul.f32 0.125, %v875_v44 }
 0x1b5   : > { %v895_v52 = vpop.f32.mrf.mxu2 }
 0x1b8   : > { %v935_v5 = vpop.xlane.xlu0 %934 }
 0x1b9   : > { %v981_v7 = vsub.f32 %v916_v63, %v935_v5  ;;  %v4779_v63 = vadd.f32 %v912_v28, %v4714_v61 }
 0x1bb   : > { %v997_v9 = vmul.f32 1.442695, %v981_v7 }
 0x1bd   : > { %4080 = vpow2.f32 %v997_v9  ;;  %v897_v24 = vpop.f32.mrf.mxu2 }
 0x1c0   : > { %v938_v10 = vpop.xlane.xlu0 %937 }
 0x1c1   : > { %v982_v11 = vsub.f32 %v917_v3, %v938_v10  ;;  %v969_v3 = vsel %vm932_vm5, %v4779_v63, -inf }
 0x1c3   : > { %v4770_v14 = vpop.eup %4080  ;;  %v999_v18 = vmul.f32 1.442695, %v982_v11 }
 0x1c4   : > { %v1029_v20 = vsel %vm932_vm5, %v4770_v14, 0.0 }
 0x1c5   : > { %4082 = vpow2.f32 %v999_v18  ;;  %1030 = vadd.xlane.f32.xlu0 %v1029_v20 }
 0x1cb   : > { %v4774_v21 = vpop.eup %4082 }
 0x1cc   : > { %v1032_v25 = vsel %vm932_vm5, %v4774_v21, 0.0 }
 0x1cd   : > { %1033 = vadd.xlane.f32.xlu1 %v1032_v25  ;;  %v915_v25 = vmul.f32 0.125, %v897_v24 }
 0x1ce   : > { %v941_v37 = vpop.xlane.xlu0 %940 }
 0x1cf   : > { %v983_v27 = vsub.f32 %v4721_v8, %v941_v37 }
 0x1d5   : > { %970 = vmax.xlane.f32.xlu1 %v969_v3  ;;  %v914_v3 = vmul.f32 0.125, %v895_v52 }
 0x1de   : > { %v947_v31 = vpop.xlane.xlu1 %946 }
 0x1df   : > { %v985_v32 = vsub.f32 %v4726_v12, %v947_v31  ;;  %v1001_v12 = vmul.f32 1.442695, %v983_v27 }
 0x1e1   : > { %v1005_v36 = vmul.f32 1.442695, %v985_v32 }
 0x1e3   : > { %4084 = vpow2.f32 %v1005_v36  ;;  %v4815_v36 = vadd.f32 %v915_v25, %v4714_v61 }
 0x1e6   : > { %v950_v40 = vpop.xlane.xlu1 %949 }
 0x1e7   : > { %v986_v43 = vsub.f32 %v4731_v26, %v950_v40  ;;  %v4792_v26 = vadd.f32 %v913_v39, %v4714_v61 }
 0x1e8   : > { %v953_v49 = vpop.xlane.xlu2 %952 }
 0x1e9   : > { %v4786_v50 = vpop.eup %4084  ;;  %v1007_v51 = vmul.f32 1.442695, %v986_v43  ;;  %v987_v16 = vsub.f32 %v4736_v29, %v953_v49  ;;  %v972_v7 = vsel %vm932_vm5, %v4792_v26, -inf  ;;  %v4821_v43 = vadd.f32 %v914_v3, %v4714_v61 }
 0x1ea   : > { %v1041_v56 = vsel %vm932_vm5, %v4786_v50, 0.0  ;;  %v978_v49 = vsel %vm932_vm5, %v4815_v36, -inf }
 0x1eb   : > { %4086 = vpow2.f32 %v1007_v51  ;;  %1042 = vadd.xlane.f32.xlu2 %v1041_v56  ;;  %v1009_v62 = vmul.f32 1.442695, %v987_v16  ;;  %v975_v51 = vsel %vm932_vm5, %v4821_v43, -inf }
 0x1ec   : > { %4088 = vpow2.f32 %v1001_v12 }
 0x1ed   : > { %4090 = vpow2.f32 %v1009_v62 }
 0x1ee   : > { %v944_v0 = vpop.xlane.xlu1 %943 }
 0x1ef   : > { %v984_v29 = vsub.f32 %v4741_v35, %v944_v0 }
 0x1f0   : > { %v956_v8 = vpop.xlane.xlu2 %955 }
 0x1f1   : > { %v4794_v4 = vpop.eup %4086  ;;  %v988_v5 = vsub.f32 %v4746_v41, %v956_v8  ;;  %v1003_v11 = vmul.f32 1.442695, %v984_v29 }
 0x1f2   : > { %v1044_v9 = vsel %vm932_vm5, %v4794_v4, 0.0  ;;  %v4802_v18 = vpop.eup %4088 }
 0x1f3   : > { %v1011_v10 = vmul.f32 1.442695, %v988_v5  ;;  %973 = vmax.xlane.f32.xlu2 %v972_v7  ;;  %1045 = vadd.xlane.f32.xlu0 %v1044_v9  ;;  %v4804_v20 = vpop.eup %4090  ;;  %v1035_v41 = vsel %vm932_vm5, %v4802_v18, 0.0 }
 0x1f4   : > { %v1047_v35 = vsel %vm932_vm5, %v4804_v20, 0.0 }
 0x1f5   : > { %4092 = vpow2.f32 %v1011_v10 }
 0x1f6   : > { %4094 = vpow2.f32 %v1003_v11 }
 0x1fb   : > { %v4810_v28 = vpop.eup %4092  ;;  %1048 = vadd.xlane.f32.xlu0 %v1047_v35  ;;  %1036 = vadd.xlane.f32.xlu2 %v1035_v41 }
 0x1fc   : > { %v1050_v31 = vsel %vm932_vm5, %v4810_v28, 0.0  ;;  %v4817_v37 = vpop.eup %4094 }
 0x1fd   : > { %1051 = vadd.xlane.f32.xlu1 %v1050_v31  ;;  %v1038_v27 = vsel %vm932_vm5, %v4817_v37, 0.0 }
 0x1fe   : > { %v959_v32 = vpop.xlane.xlu2 %958 }
 0x1ff   : > { %v989_v40 = vsub.f32 %v4751_v47, %v959_v32 }
 0x201   : > { %v1013_v44 = vmul.f32 1.442695, %v989_v40 }
 0x203   : > { %4096 = vpow2.f32 %v1013_v44  ;;  %1039 = vadd.xlane.f32.xlu0 %v1038_v27  ;;  %979 = vmax.xlane.f32.xlu2 %v978_v49 }
 0x205   : > { %976 = vmax.xlane.f32.xlu1 %v975_v51 }
 0x206   : > { %v962_v16 = vpop.xlane.xlu0 %961 }
 0x207   : > { %v990_v47 = vsub.f32 %v4756_v55, %v962_v16 }
 0x209   : > { %v4830_v56 = vpop.eup %4096  ;;  %v1015_v39 = vmul.f32 1.442695, %v990_v47 }
 0x20a   : > { %v1053_v12 = vsel %vm932_vm5, %v4830_v56, 0.0 }
 0x20b   : > { %4098 = vpow2.f32 %v1015_v39  ;;  %1054 = vadd.xlane.f32.xlu0 %v1053_v12 }
 0x20e   : > { %v965_v62 = vpop.xlane.xlu1 %964 }
 0x20f   : > { %v991_v52 = vsub.f32 %v4761_v59, %v965_v62 }
 0x211   : > { %v4835_v0 = vpop.eup %4098  ;;  %v1017_v8 = vmul.f32 1.442695, %v991_v52 }
 0x212   : > { %v1056_v29 = vsel %vm932_vm5, %v4835_v0, 0.0 }
 0x213   : > { %4100 = vpow2.f32 %v1017_v8  ;;  %1057 = vadd.xlane.f32.xlu1 %v1056_v29 }
 0x216   : > { %v968_v55 = vpop.xlane.xlu2 %967 }
 0x217   : > { %v992_v5 = vsub.f32 %v4766_v1, %v968_v55 }
 0x219   : > { %v4840_v7 = vpop.eup %4100  ;;  %v1019_v9 = vmul.f32 1.442695, %v992_v5 }
 0x21a   : > { %v1059_v10 = vsel %vm932_vm5, %v4840_v7, 0.0 }
 0x21b   : > { %4102 = vpow2.f32 %v1019_v9  ;;  %1060 = vadd.xlane.f32.xlu2 %v1059_v10 }
 0x221   : > { %v4844_v59 = vpop.eup %4102 }
 0x222   : > { %v1062_v11 = vsel %vm932_vm5, %v4844_v59, 0.0 }
 0x223   : > { %1063 = vadd.xlane.f32.xlu0 %v1062_v11 }
 0x238   : > { %v1031_v24 = vpop.xlane.xlu0 %1030 }
 0x239   : > { %4104 = vrcp.f32 %v1031_v24 }
 0x23f   : > { %v4105_v41 = vpop.eup %4104 }
 0x240   : > { %v1034_v35 = vpop.xlane.xlu1 %1033  ;;  %v1093_v1 = vmul.f32 %v4105_v41, %v4770_v14 }
 0x241   : > { %4106 = vrcp.f32 %v1034_v35 }
 0x242   : > { %v1109_v3 = vpack.c.bf16 %v1093_v1, %v1093_v1 }
 0x244   : > { %v1127_v49 = vunpack.c.l.b16 %v1109_v3 }
 0x247   : > { %v4107_v25 = vpop.eup %4106 }
 0x248   : > { %v1094_v31 = vmul.f32 %v4107_v25, %v4774_v21  ;;  %v971_v32 = vpop.xlane.xlu1 %970 }
 0x249   : > { %v993_v40 = vsub.f32 %v4779_v63, %v971_v32 }
 0x24a   : > { %v1110_v44 = vpack.c.bf16 %v1094_v31, %v1094_v31 }
 0x24b   : > { %v1021_v27 = vmul.f32 1.442695, %v993_v40 }
 0x24c   : > { %v1128_v51 = vunpack.c.l.b16 %v1110_v44 }
 0x24d   : > { %4108 = vpow2.f32 %v1021_v27 }
 0x24e   : > { %v1129_v16 = vpack.c.b16 %v1128_v51, %v1127_v49 }
 0x250   : > { %3895 = vmatmul.msk.bf16.vlgmr.msra.gmra.mxu3 %vm932_vm5, %v1129_v16 }
 0x251   : > { %1279 = vmatpush.bf16.msra.mxu3 %v4684_v45 }
 0x253   : > { %v4853_v47 = vpop.eup %4108 }
 0x254   : > { %v1065_v14 = vsel %vm932_vm5, %v4853_v47, 0.0 }
 0x255   : > { %1066 = vadd.xlane.f32.xlu1 %v1065_v14 }
 0x25e   : > { %v1043_v21 = vpop.xlane.xlu2 %1042 }
 0x25f   : > { %4110 = vrcp.f32 %v1043_v21 }
 0x265   : > { %v4111_v12 = vpop.eup %4110 }
 0x266   : > { %v974_v39 = vpop.xlane.xlu2 %973  ;;  %v1046_v63 = vpop.xlane.xlu0 %1045  ;;  %v1097_v8 = vmul.f32 %v4111_v12, %v4786_v50 }
 0x267   : > { %v994_v62 = vsub.f32 %v4792_v26, %v974_v39  ;;  %4112 = vrcp.f32 %v1046_v63 }
 0x268   : > { %v1113_v45 = vpack.c.bf16 %v1097_v8, %v1097_v8 }
 0x269   : > { %v1023_v52 = vmul.f32 1.442695, %v994_v62 }
 0x26a   : > { %v1173_v35 = vunpack.c.l.b16 %v1113_v45 }
 0x26b   : > { %4114 = vpow2.f32 %v1023_v52 }
 0x26d   : > { %v4113_v29 = vpop.eup %4112 }
 0x26e   : > { %v1098_v55 = vmul.f32 %v4113_v29, %v4794_v4  ;;  %v1037_v5 = vpop.xlane.xlu2 %1036  ;;  %v1049_v9 = vpop.xlane.xlu0 %1048 }
 0x26f   : > { %4116 = vrcp.f32 %v1037_v5 }
 0x270   : > { %v1114_v10 = vpack.c.bf16 %v1098_v55, %v1098_v55  ;;  %4118 = vrcp.f32 %v1049_v9  ;;  %v1052_v11 = vpop.xlane.xlu1 %1051 }
 0x271   : > { %v4860_v24 = vpop.eup %4114  ;;  %4120 = vrcp.f32 %v1052_v11 }
 0x272   : > { %v1174_v26 = vunpack.c.l.b16 %v1114_v10  ;;  %v1068_v41 = vsel %vm932_vm5, %v4860_v24, 0.0 }
 0x273   : > { %1069 = vadd.xlane.f32.xlu2 %v1068_v41 }
 0x274   : > { %v1175_v50 = vpack.c.b16 %v1174_v26, %v1173_v35 }
 0x275   : > { %v4117_v1 = vpop.eup %4116 }
 0x276   : > { %v4119_v25 = vpop.eup %4118  ;;  %v980_v3 = vpop.xlane.xlu2 %979  ;;  %3897 = vmatmul.msk.bf16.vlgmr.msrb.gmra.mxu2 %vm932_vm5, %v1175_v50  ;;  %v1095_v14 = vmul.f32 %v4117_v1, %v4802_v18 }
 0x277   : > { %v1040_v4 = vpop.xlane.xlu0 %1039  ;;  %v4121_v31 = vpop.eup %4120  ;;  %v1099_v32 = vmul.f32 %v4119_v25, %v4804_v20  ;;  %v996_v40 = vsub.f32 %v4815_v36, %v980_v3 }
 0x278   : > { %4122 = vrcp.f32 %v1040_v4  ;;  %v1100_v44 = vmul.f32 %v4121_v31, %v4810_v28  ;;  %v977_v27 = vpop.xlane.xlu1 %976  ;;  %v1111_v20 = vpack.c.bf16 %v1095_v14, %v1095_v14 }
 0x279   : > { %v1115_v49 = vpack.c.bf16 %v1099_v32, %v1099_v32  ;;  %v1027_v51 = vmul.f32 1.442695, %v996_v40  ;;  %v995_v16 = vsub.f32 %v4821_v43, %v977_v27 }
 0x27a   : > { %v1116_v21 = vpack.c.bf16 %v1100_v44, %v1100_v44  ;;  %v1150_v43 = vunpack.c.l.b16 %v1111_v20 }
 0x27b   : > { %4124 = vpow2.f32 %v1027_v51  ;;  %v1025_v39 = vmul.f32 1.442695, %v995_v16  ;;  %v1196_v63 = vunpack.c.l.b16 %v1115_v49 }
 0x27c   : > { %v1197_v12 = vunpack.c.l.b16 %v1116_v21 }
 0x27d   : > { %4126 = vpow2.f32 %v1025_v39 }
 0x27e   : > { %v4123_v62 = vpop.eup %4122  ;;  %v1198_v52 = vpack.c.b16 %v1197_v12, %v1196_v63 }
 0x27f   : > { %v1096_v36 = vmul.f32 %v4123_v62, %v4817_v37  ;;  %v1055_v8 = vpop.xlane.xlu0 %1054 }
 0x280   : > { %3898 = vmatmul.msk.bf16.vlgmr.msrb.gmra.mxu3 %vm932_vm5, %v1198_v52  ;;  %4128 = vrcp.f32 %v1055_v8 }
 0x281   : > { %v1112_v28 = vpack.c.bf16 %v1096_v36, %v1096_v36  ;;  %v4872_v29 = vpop.eup %4124 }
 0x282   : > { %v1074_v45 = vsel %vm932_vm5, %v4872_v29, 0.0 }
 0x283   : > { %v1151_v18 = vunpack.c.l.b16 %v1112_v28  ;;  %v4876_v55 = vpop.eup %4126  ;;  %1075 = vadd.xlane.f32.xlu1 %v1074_v45 }
 0x284   : > { %v1071_v9 = vsel %vm932_vm5, %v4876_v55, 0.0 }
 0x285   : > { %v1152_v5 = vpack.c.b16 %v1151_v18, %v1150_v43  ;;  %1072 = vadd.xlane.f32.xlu0 %v1071_v9 }
 0x286   : > { %v1058_v37 = vpop.xlane.xlu1 %1057  ;;  %v4129_v10 = vpop.eup %4128 }
 0x287   : > { %3896 = vmatmul.msk.bf16.vlgmr.msra.gmra.mxu1 %vm932_vm5, %v1152_v5  ;;  %4130 = vrcp.f32 %v1058_v37  ;;  %v1101_v11 = vmul.f32 %v4129_v10, %v4830_v56 }
 0x288   : > { %1302 = vmatpush.bf16.msra.mxu1 %v4702_v57 }
 0x289   : > { %v1117_v26 = vpack.c.bf16 %v1101_v11, %v1101_v11 }
 0x28b   : > { %v1219_v25 = vunpack.c.l.b16 %v1117_v26 }
 0x28d   : > { %v4131_v35 = vpop.eup %4130 }
 0x28e   : > { %v1102_v41 = vmul.f32 %v4131_v35, %v4835_v0  ;;  %v1061_v50 = vpop.xlane.xlu2 %1060 }
 0x28f   : > { %4132 = vrcp.f32 %v1061_v50 }
 0x290   : > { %v1118_v1 = vpack.c.bf16 %v1102_v41, %v1102_v41 }
 0x292   : > { %v1220_v3 = vunpack.c.l.b16 %v1118_v1 }
 0x294   : > { %v1221_v4 = vpack.c.b16 %v1220_v3, %v1219_v25 }
 0x295   : > { %v4133_v32 = vpop.eup %4132 }
 0x296   : > { %v1064_v31 = vpop.xlane.xlu0 %1063  ;;  %v1103_v40 = vmul.f32 %v4133_v32, %v4840_v7 }
 0x297   : > { %3899 = vmatmul.msk.bf16.vlgmr.msrb.gmra.mxu1 %vm932_vm5, %v1221_v4  ;;  %4134 = vrcp.f32 %v1064_v31 }
 0x298   : > { %v1119_v44 = vpack.c.bf16 %v1103_v40, %v1103_v40 }
 0x29a   : > { %v1242_v49 = vunpack.c.l.b16 %v1119_v44 }
 0x29d   : > { %v4135_v57 = vpop.eup %4134 }
 0x29e   : > { %v1104_v56 = vmul.f32 %v4135_v57, %v4844_v59 }
 0x2a0   : > { %v1120_v27 = vpack.c.bf16 %v1104_v56, %v1104_v56 }
 0x2a2   : > { %v1243_v0 = vunpack.c.l.b16 %v1120_v27 }
 0x2a4   : > { %v1244_v51 = vpack.c.b16 %v1243_v0, %v1242_v49 }
 0x2a6   : > { %3900 = vmatmul.msk.bf16.vlgmr.msra.gmra.mxu2 %vm932_vm5, %v1244_v51 }
 0x2c8   : > { %v1067_v16 = vpop.xlane.xlu1 %1066 }
 0x2c9   : > { %4136 = vrcp.f32 %v1067_v16 }
 0x2cf   : > { %v4137_v21 = vpop.eup %4136 }
 0x2d0   : > { %v1105_v39 = vmul.f32 %v4137_v21, %v4853_v47 }
 0x2d2   : > { %v1121_v12 = vpack.c.bf16 %v1105_v39, %v1105_v39 }
 0x2d3   : > { %v1143_v20 = vpop.f32.mrf.mxu3 }
 0x2d4   : > { %v1265_v59 = vunpack.c.l.b16 %v1121_v12 }
 0x2db   : > { %v1145_v47 = vpop.f32.mrf.mxu3 }
 0x2e6   : > { %v1070_v14 = vpop.xlane.xlu2 %1069 }
 0x2e7   : > { %4138 = vrcp.f32 %v1070_v14  ;;  %v4936_v14 = vadd.f32 %v1143_v20, %v4571_v17 }
 0x2ed   : > { %v4139_v63 = vpop.eup %4138 }
 0x2ee   : > { %v1106_v7 = vmul.f32 %v4139_v63, %v4860_v24  ;;  %v1309_v63 = vsel %vm728_vm3, %v4936_v14, 0.0 }
 0x2f0   : > { %v1122_v62 = vpack.c.bf16 %v1106_v7, %v1106_v7 }
 0x2f2   : > { %v1266_v52 = vunpack.c.l.b16 %v1122_v62  ;;  %v4953_v62 = vadd.f32 %v1145_v47, %v4582_v22 }
 0x2f4   : > { %v1267_v36 = vpack.c.b16 %v1266_v52, %v1265_v59  ;;  %v1312_v52 = vsel %vm728_vm3, %v4953_v62, 0.0 }
 0x2f6   : > { %v1076_v8 = vpop.xlane.xlu1 %1075  ;;  %3901 = vmatmul.msk.bf16.vlgmr.msra.gmra.mxu3 %vm932_vm5, %v1267_v36 }
 0x2f7   : > { %4140 = vrcp.f32 %v1076_v8 }
 0x2f8   : > { %v1073_v28 = vpop.xlane.xlu0 %1072 }
 0x2f9   : > { %4142 = vrcp.f32 %v1073_v28  ;;  %v1189_v43 = vpop.f32.mrf.mxu2 }
 0x2fa   : > { %v4892_v18 = vadd.f32 %v1189_v43, %v4610_v42 }
 0x2fc   : > { %v1321_v45 = vsel %vm728_vm3, %v4892_v18, 0.0  ;;  %v1384_v24 = vmul.f32 %v4892_v18, %v4892_v18 }
 0x2fd   : > { %v4141_v5 = vpop.eup %4140  ;;  %1322 = vadd.xlane.f32.xlu2 %v1321_v45 }
 0x2fe   : > { %v1108_v9 = vmul.f32 %v4141_v5, %v4872_v29  ;;  %v1408_v37 = vsel %vm728_vm3, %v1384_v24, 0.0 }
 0x2ff   : > { %v4143_v10 = vpop.eup %4142  ;;  %1409 = vadd.xlane.f32.xlu1 %v1408_v37 }
 0x300   : > { %v1124_v11 = vpack.c.bf16 %v1108_v9, %v1108_v9  ;;  %v1107_v35 = vmul.f32 %v4143_v10, %v4876_v55  ;;  %v1381_v9 = vmul.f32 %v4953_v62, %v4953_v62  ;;  %v4409_v10 = vmov 64.0  }
 0x301   : > { %v1191_v42 = vpop.f32.mrf.mxu2  ;;  %4144 = vrcp.f32 %v4409_v10 }
 0x302   : > { %v1123_v26 = vpack.c.bf16 %v1107_v35, %v1107_v35  ;;  %v4902_v41 = vadd.f32 %v1191_v42, %v4616_v46  ;;  %v1289_v25 = vunpack.c.l.b16 %v1124_v11  ;;  %v1399_v37 = vsel %vm728_vm3, %v1381_v9, 0.0 }
 0x303   : > { %v1212_v1 = vpop.f32.mrf.mxu3 }
 0x304   : > { %v4904_v50 = vpop.f32.mrf.mxu1  ;;  %v1288_v3 = vunpack.c.l.b16 %v1123_v26  ;;  %v1324_v29 = vsel %vm728_vm3, %v4902_v41, 0.0  ;;  %v1385_v4 = vmul.f32 %v4902_v41, %v4902_v41  ;;  %v4911_v55 = vadd.f32 %v1212_v1, %v4628_v54  ;;  %v3993_v1 = vld [vmem:[%s6743_s6 + $0x18] sm:$0xff] }
 0x305   : > { %1325 = vadd.xlane.f32.xlu0 %v1324_v29  ;;  %4006 = vmatpush.bf16.msrb.mxu2 %v3993_v1 }
 0x306   : > { %v1290_v31 = vpack.c.b16 %v1289_v25, %v1288_v3  ;;  %v1411_v32 = vsel %vm728_vm3, %v1385_v4, 0.0  ;;  %v1386_v57 = vmul.f32 %v4911_v55, %v4911_v55  ;;  %v1327_v56 = vsel %vm728_vm3, %v4911_v55, 0.0  ;;  %1810 = vmatpush.bf16.msra.mxu0 %v3993_v1  ;;  %v3992_v3 = vld [vmem:[%s6743_s6 + $0x10] sm:$0xff] }
 0x307   : > { %1412 = vadd.xlane.f32.xlu2 %v1411_v32 }
 0x308   : > { %3902 = vmatmul.msk.bf16.vlgmr.msra.gmra.mxu1 %vm932_vm5, %v1290_v31  ;;  %v1414_v27 = vsel %vm728_vm3, %v1386_v57, 0.0  ;;  %v3991_v57 = vld [vmem:[%s6743_s6 + $0x8] sm:$0xff] }
 0x309   : > { %4007 = vmatpush.bf16.msrb.mxu2 %v3992_v3 }
 0x30a   : > { %1811 = vmatpush.bf16.msra.mxu0 %v3992_v3 }
 0x30b   : > { %v1214_v40 = vpop.f32.mrf.mxu3 }
 0x30c   : > { %v4915_v46 = vpop.f32.mrf.mxu1  ;;  %v4920_v44 = vadd.f32 %v1214_v40, %v4634_v58 }
 0x30d   : > { %1328 = vadd.xlane.f32.xlu0 %v1327_v56  ;;  %4008 = vmatpush.bf16.msrb.mxu2 %v3991_v57 }
 0x30e   : > { %v1330_v54 = vsel %vm728_vm3, %v4920_v44, 0.0  ;;  %v1387_v49 = vmul.f32 %v4920_v44, %v4920_v44  ;;  %1812 = vmatpush.bf16.msra.mxu0 %v3991_v57 }
 0x30f   : > { %1331 = vadd.xlane.f32.xlu1 %v1330_v54  ;;  %1415 = vadd.xlane.f32.xlu2 %v1414_v27 }
 0x310   : > { %v1417_v58 = vsel %vm728_vm3, %v1387_v49, 0.0  ;;  %v3990_v49 = vld [vmem:[%s6743_s6] sm:$0xff]  ;;  %s4331_s6 = scalar_lea.hbm %s6707_s15, 16 }
 0x311   : > { %4009 = vmatpush.bf16.msrb.mxu2 %v3990_v49  ;;  %p4333_p1 = scmp.lt.s32.totalorder %s4331_s6, %s4327_s3 }
 0x312   : > { %1813 = vmatpush.bf16.msra.mxu0 %v3990_v49 }
 0x313   : > { %p4334_p2 = por %p4333_p1, %p4332_p0 }
 0x314   : > { %v1235_v0 = vpop.f32.mrf.mxu1 }
 0x315   : > { %v4930_v51 = vadd.f32 %v1235_v0, %v4643_v2  ;;  %1418 = vadd.xlane.f32.xlu0 %v1417_v58  ;;  %p4335_p3 = pnand %p4334_p2, %p4330_p13 }
 0x317   : > { %v1333_v16 = vsel %vm728_vm3, %v4930_v51, 0.0  ;;  %v1388_v17 = vmul.f32 %v4930_v51, %v4930_v51 }
 0x318   : > { %1334 = vadd.xlane.f32.xlu1 %v1333_v16 }
 0x319   : > { %v1420_v20 = vsel %vm728_vm3, %v1388_v17, 0.0 }
 0x31c   : > { %v1237_v21 = vpop.f32.mrf.mxu1 }
 0x31d   : > { %v4939_v39 = vadd.f32 %v1237_v21, %v4649_v6  ;;  %1310 = vadd.xlane.f32.xlu0 %v1309_v63  ;;  %v1380_v6 = vmul.f32 %v4936_v14, %v4936_v14 }
 0x31f   : > { %v1336_v2 = vsel %vm728_vm3, %v4939_v39, 0.0  ;;  %v1389_v12 = vmul.f32 %v4939_v39, %v4939_v39  ;;  %v1396_v59 = vsel %vm728_vm3, %v1380_v6, 0.0 }
 0x320   : > { %1337 = vadd.xlane.f32.xlu2 %v1336_v2 }
 0x321   : > { %v1423_v7 = vsel %vm728_vm3, %v1389_v12, 0.0 }
 0x322   : > { %1424 = vadd.xlane.f32.xlu1 %v1423_v7 }
 0x325   : > { %1421 = vadd.xlane.f32.xlu0 %v1420_v20 }
 0x328   : > { %1397 = vadd.xlane.f32.xlu2 %v1396_v59 }
 0x329   : > { %v1258_v36 = vpop.f32.mrf.mxu2 }
 0x32a   : > { %1313 = vadd.xlane.f32.xlu1 %v1312_v52  ;;  %v4960_v8 = vadd.f32 %v1258_v36, %v4657_v15 }
 0x32c   : > { %v1390_v28 = vmul.f32 %v4960_v8, %v4960_v8  ;;  %v1339_v22 = vsel %vm728_vm3, %v4960_v8, 0.0 }
 0x32e   : > { %v1426_v43 = vsel %vm728_vm3, %v1390_v28, 0.0 }
 0x330   : > { %1340 = vadd.xlane.f32.xlu2 %v1339_v22  ;;  %v5019_v22 = vadd.f32 %v4915_v46, %v4598_v34  ;;  %v5034_v46 = vadd.f32 %v4904_v50, %v4592_v30 }
 0x331   : > { %v1260_v47 = vpop.f32.mrf.mxu2 }
 0x332   : > { %1427 = vadd.xlane.f32.xlu1 %v1426_v43  ;;  %v4968_v45 = vadd.f32 %v1260_v47, %v4663_v23  ;;  %v4145_v23 = vpop.eup %4144  ;;  %v1382_v57 = vmul.f32 %v5034_v46, %v5034_v46 }
 0x333   : > { %v1358_v11 = vmul.f32 64.0, %v4145_v23  ;;  %vm1362_vm6 = vweird.f32 %v4145_v23 }
 0x334   : > { %v1342_v24 = vsel %vm728_vm3, %v4968_v45, 0.0  ;;  %v1391_v15 = vmul.f32 %v4968_v45, %v4968_v45 }
 0x335   : > { %1343 = vadd.xlane.f32.xlu0 %v1342_v24  ;;  %v1359_v35 = vsub.f32 1.0, %v1358_v11 }
 0x336   : > { %v1429_v5 = vsel %vm728_vm3, %v1391_v15, 0.0 }
 0x337   : > { %v1360_v42 = vmul.f32 %v4145_v23, %v1359_v35 }
 0x338   : > { %1430 = vadd.xlane.f32.xlu2 %v1429_v5 }
 0x339   : > { %v1361_v26 = vadd.f32 %v4145_v23, %v1360_v42  ;;  %v1318_v42 = vsel %vm728_vm3, %v5019_v22, 0.0 }
 0x33b   : > { %v4981_v25 = vsel %vm1362_vm6, %v4145_v23, %v1361_v26 }
 0x33c   : > { %6744 = vst [vmem:[#allocation11_spill] sm:$0xff] %v4981_v25 }
 0x33d   : > { %1400 = vadd.xlane.f32.xlu0 %v1399_v37 }
 0x370   : > { %v1323_v29 = vpop.xlane.xlu2 %1322 }
 0x371   : > { %v4987_v4 = vmul.f32 %v4981_v25, %v1323_v29 }
 0x372   : > { %v1410_v31 = vpop.xlane.xlu1 %1409 }
 0x373   : > { %v1464_v32 = vmul.f32 %v4987_v4, %v4987_v4  ;;  %v1448_v40 = vmul.f32 %v1410_v31, %v4981_v25 }
 0x375   : > { %v1480_v56 = vsub.f32 %v1448_v40, %v1464_v32 }
 0x377   : > { %v1512_v54 = vadd.f32 1e-05, %v1480_v56 }
 0x378   : > { %v1326_v27 = vpop.xlane.xlu0 %1325 }
 0x379   : > { %4146 = vrsqrt.f32 %v1512_v54  ;;  %v4999_v0 = vmul.f32 %v4981_v25, %v1326_v27  ;;  %v1281_v58 = vpop.f32.mrf.mxu3  ;;  %vm1570_vm8 = vweird.f32 %v1512_v54 }
 0x37a   : > { %v5002_v16 = vadd.f32 %v1281_v58, %v4671_v33  ;;  %v1413_v63 = vpop.xlane.xlu2 %1412 }
 0x37b   : > { %v1465_v21 = vmul.f32 %v4999_v0, %v4999_v0  ;;  %v1449_v2 = vmul.f32 %v1413_v63, %v4981_v25 }
 0x37c   : > { %v1345_v12 = vsel %vm728_vm3, %v5002_v16, 0.0  ;;  %v1392_v7 = vmul.f32 %v5002_v16, %v5002_v16 }
 0x37d   : > { %1346 = vadd.xlane.f32.xlu1 %v1345_v12  ;;  %v1481_v17 = vsub.f32 %v1449_v2, %v1465_v21  ;;  %v1315_v21 = vsel %vm728_vm3, %v5034_v46, 0.0 }
 0x37e   : > { %v1432_v6 = vsel %vm728_vm3, %v1392_v7, 0.0 }
 0x37f   : > { %v4147_v33 = vpop.eup %4146  ;;  %1433 = vadd.xlane.f32.xlu0 %v1432_v6  ;;  %v5012_v59 = vadd.f32 1e-05, %v1481_v17  ;;  %v1402_v17 = vsel %vm728_vm3, %v1382_v57, 0.0 }
 0x380   : > { %v1565_v20 = vmul.f32 %v4147_v33, %v1512_v54  ;;  %v1329_v52 = vpop.xlane.xlu0 %1328  ;;  %vm1571_vm7 = vweird.f32 %v4147_v33  ;;  %v1496_v54 = vsub.f32 %v4892_v18, %v4987_v4  ;;  %v5078_v18 = vld [vmem:[%s6747_s4] ss:$0 sm:$0xff] }
 0x381   : > { %v5015_v36 = vmul.f32 %v4981_v25, %v1329_v52  ;;  %v1283_v28 = vpop.f32.mrf.mxu3  ;;  %4148 = vrsqrt.f32 %v5012_v59  ;;  %vm5054_vm9 = vmor %vm1570_vm8, %vm1571_vm7  ;;  %v1383_v52 = vmul.f32 %v5019_v22, %v5019_v22  ;;  %vm1580_vm11 = vweird.f32 %v5012_v59 }
 0x382   : > { %v1566_v43 = vmul.f32 %v4147_v33, %v1565_v20  ;;  %v5023_v47 = vadd.f32 %v1283_v28, %v4678_v38  ;;  %v1332_v24 = vpop.xlane.xlu1 %1331  ;;  %v1416_v5 = vpop.xlane.xlu2 %1415 }
 0x383   : > { %v1466_v15 = vmul.f32 %v5015_v36, %v5015_v36  ;;  %v1450_v37 = vmul.f32 %v1416_v5, %v4981_v25  ;;  %v5037_v38 = vmul.f32 %v4981_v25, %v1332_v24  ;;  %v1497_v24 = vsub.f32 %v4902_v41, %v4999_v0  ;;  %v5098_v41 = vld [vmem:[%s6748_s5] ss:$0 sm:$0xff] }
 0x384   : > { %v1567_v9 = vmul.f32 0.5, %v1566_v43  ;;  %v1348_v10 = vsel %vm728_vm3, %v5023_v47, 0.0  ;;  %v1393_v34 = vmul.f32 %v5023_v47, %v5023_v47 }
 0x385   : > { %1349 = vadd.xlane.f32.xlu2 %v1348_v10  ;;  %v1304_v23 = vpop.f32.mrf.mxu1  ;;  %v1482_v35 = vsub.f32 %v1450_v37, %v1466_v15  ;;  %v1467_v31 = vmul.f32 %v5037_v38, %v5037_v38 }
 0x386   : > { %v1568_v11 = vsub.f32 1.5, %v1567_v9  ;;  %v1435_v26 = vsel %vm728_vm3, %v1393_v34, 0.0  ;;  %v5050_v40 = vadd.f32 %v1304_v23, %v4689_v48 }
 0x387   : > { %1319 = vadd.xlane.f32.xlu0 %v1318_v42  ;;  %1436 = vadd.xlane.f32.xlu1 %v1435_v26  ;;  %v4149_v1 = vpop.eup %4148  ;;  %v5042_v3 = vadd.f32 1e-05, %v1482_v35 }
 0x388   : > { %v1419_v30 = vpop.xlane.xlu0 %1418  ;;  %v1569_v50 = vmul.f32 %v4147_v33, %v1568_v11  ;;  %v1575_v29 = vmul.f32 %v4149_v1, %v5012_v59  ;;  %v1351_v6 = vsel %vm728_vm3, %v5050_v40, 0.0  ;;  %vm1581_vm10 = vweird.f32 %v4149_v1 }
 0x389   : > { %v1451_v32 = vmul.f32 %v1419_v30, %v4981_v25  ;;  %4150 = vrsqrt.f32 %v5042_v3  ;;  %vm1582_vm12 = vmor %vm1580_vm11, %vm1581_vm10  ;;  %v1405_v11 = vsel %vm728_vm3, %v1383_v52, 0.0  ;;  %vm1590_vm14 = vweird.f32 %v5042_v3 }
 0x38a   : > { %v1576_v56 = vmul.f32 %v4149_v1, %v1575_v29  ;;  %v1573_v63 = vsel %vm5054_vm9, %v4147_v33, %v1569_v50 }
 0x38b   : > { %v1483_v27 = vsub.f32 %v1451_v32, %v1467_v31  ;;  %v1335_v58 = vpop.xlane.xlu1 %1334 }
 0x38c   : > { %v1577_v2 = vmul.f32 0.5, %v1576_v56  ;;  %v5101_v42 = vmul.f32 %v4981_v25, %v1335_v58  ;;  %v1394_v56 = vmul.f32 %v5050_v40, %v5050_v40 }
 0x38d   : > { %v5062_v48 = vadd.f32 1e-05, %v1483_v27  ;;  %1316 = vadd.xlane.f32.xlu2 %v1315_v21  ;;  %v1306_v12 = vpop.f32.mrf.mxu1 }
 0x38e   : > { %v5067_v7 = vadd.f32 %v1306_v12, %v4696_v53  ;;  %v1578_v20 = vsub.f32 1.5, %v1577_v2  ;;  %v1688_v53 = vmul.f32 %v1573_v63, %v1496_v54  ;;  %v1468_v12 = vmul.f32 %v5101_v42, %v5101_v42 }
 0x38f   : > { %4152 = vrsqrt.f32 %v5062_v48  ;;  %1403 = vadd.xlane.f32.xlu1 %v1402_v17  ;;  %1352 = vadd.xlane.f32.xlu0 %v1351_v6  ;;  %v5073_v33 = vpop.eup %4150  ;;  %vm1600_vm1 = vweird.f32 %v5062_v48 }
 0x390   : > { %v1311_v4 = vpop.xlane.xlu0 %1310  ;;  %v1579_v28 = vmul.f32 %v4149_v1, %v1578_v20  ;;  %v1585_v43 = vmul.f32 %v5073_v33, %v5042_v3  ;;  %v1395_v5 = vmul.f32 %v5067_v7, %v5067_v7  ;;  %v1707_v10 = vmul.f32 %v5078_v18, %v1688_v53 }
 0x391   : > { %v5112_v57 = vmul.f32 %v4981_v25, %v1311_v4  ;;  %vm1591_vm13 = vweird.f32 %v5073_v33 }
 0x392   : > { %v1583_v9 = vsel %vm1582_vm12, %v4149_v1, %v1579_v28  ;;  %v1586_v37 = vmul.f32 %v5073_v33, %v1585_v43  ;;  %v1354_v1 = vsel %vm728_vm3, %v5067_v7, 0.0  ;;  %v1441_v31 = vsel %vm728_vm3, %v1395_v5, 0.0  ;;  %vm5133_vm15 = vmor %vm1590_vm14, %vm1591_vm13 }
 0x393   : > { %v1338_v15 = vpop.xlane.xlu2 %1337  ;;  %v1689_v34 = vmul.f32 %v1583_v9, %v1497_v24  ;;  %v5117_v21 = vadd.f32 %v5098_v41, %v1707_v10  ;;  %v1460_v4 = vmul.f32 %v5112_v57, %v5112_v57  ;;  %v1438_v5 = vsel %vm728_vm3, %v1394_v56, 0.0 }
 0x394   : > { %v5092_v23 = vmul.f32 %v4981_v25, %v1338_v15  ;;  %v1587_v35 = vmul.f32 0.5, %v1586_v37  ;;  %v1498_v10 = vsub.f32 %v4911_v55, %v5015_v36 }
 0x395   : > { %v1425_v59 = vpop.xlane.xlu1 %1424  ;;  %v4153_v0 = vpop.eup %4152  ;;  %1406 = vadd.xlane.f32.xlu2 %v1405_v11  ;;  %v1708_v30 = vmul.f32 %v5078_v18, %v1689_v34 }
 0x396   : > { %v1453_v26 = vmul.f32 %v1425_v59, %v4981_v25  ;;  %v1595_v50 = vmul.f32 %v4153_v0, %v5062_v48  ;;  %v1469_v29 = vmul.f32 %v5092_v23, %v5092_v23  ;;  %v1588_v32 = vsub.f32 1.5, %v1587_v35 }
 0x397   : > { %1355 = vadd.xlane.f32.xlu1 %v1354_v1  ;;  %1442 = vadd.xlane.f32.xlu0 %v1441_v31  ;;  %v5120_v63 = vadd.f32 %v5098_v41, %v1708_v30  ;;  %vm1601_vm0 = vweird.f32 %v4153_v0  ;;  %v1499_v59 = vsub.f32 %v4920_v44, %v5037_v38 }
 0x398   : > { %v1596_v27 = vmul.f32 %v4153_v0, %v1595_v50  ;;  %v1485_v49 = vsub.f32 %v1453_v26, %v1469_v29  ;;  %v1422_v58 = vpop.xlane.xlu0 %1421  ;;  %v1589_v2 = vmul.f32 %v5073_v33, %v1588_v32  ;;  %vm1602_vm2 = vmor %vm1600_vm1, %vm1601_vm0 }
 0x399   : > { %v1452_v54 = vmul.f32 %v1422_v58, %v4981_v25  ;;  %v1740_v53 = vpack.c.bf16 %v5120_v63, %v5117_v21 }
 0x39a   : > { %v1597_v17 = vmul.f32 0.5, %v1596_v27  ;;  %v1517_v6 = vadd.f32 1e-05, %v1485_v49  ;;  %v1593_v3 = vsel %vm5133_vm15, %v5073_v33, %v1589_v2 }
 0x39b   : > { %v1398_v20 = vpop.xlane.xlu2 %1397  ;;  %v1484_v52 = vsub.f32 %v1452_v54, %v1468_v12  ;;  %3921 = vmatmul.msk.bf16.vlgmr.msrb.gmra.mxu2 %vm728_vm3, %v1740_v53  ;;  %v1690_v35 = vmul.f32 %v1593_v3, %v1498_v10  ;;  %v1501_v10 = vsub.f32 %v4939_v39, %v5092_v23 }
 0x39c   : > { %v1444_v28 = vmul.f32 %v1398_v20, %v4981_v25  ;;  %v1598_v24 = vsub.f32 1.5, %v1597_v17  ;;  %4154 = vrsqrt.f32 %v1517_v6  ;;  %vm1620_vm6 = vweird.f32 %v1517_v6 }
 0x39d   : > { %v1314_v15 = vpop.xlane.xlu1 %1313  ;;  %v1516_v9 = vadd.f32 1e-05, %v1484_v52  ;;  %1439 = vadd.xlane.f32.xlu2 %v1438_v5  ;;  %v1709_v48 = vmul.f32 %v5078_v18, %v1690_v35 }
 0x39e   : > { %v1476_v37 = vsub.f32 %v1444_v28, %v1460_v4  ;;  %v1599_v34 = vmul.f32 %v4153_v0, %v1598_v24 }
 0x39f   : > { %4156 = vrsqrt.f32 %v1516_v9  ;;  %v5162_v12 = vadd.f32 %v5098_v41, %v1709_v48  ;;  %vm1610_vm9 = vweird.f32 %v1516_v9 }
 0x3a0   : > { %v1603_v11 = vsel %vm1602_vm2, %v4153_v0, %v1599_v34  ;;  %v5147_v26 = vadd.f32 1e-05, %v1476_v37  ;;  %v5184_v34 = vmul.f32 %v4981_v25, %v1314_v15 }
 0x3a1   : > { %v1691_v1 = vmul.f32 %v1603_v11, %v1499_v59 }
 0x3a2   : > { %v4155_v33 = vpop.eup %4154  ;;  %4158 = vrsqrt.f32 %v5147_v26  ;;  %vm1530_vm0 = vweird.f32 %v5147_v26 }
 0x3a3   : > { %v1341_v30 = vpop.xlane.xlu2 %1340  ;;  %v1615_v50 = vmul.f32 %v4155_v33, %v1517_v6  ;;  %v1710_v55 = vmul.f32 %v5078_v18, %v1691_v1  ;;  %vm1621_vm4 = vweird.f32 %v4155_v33  ;;  %v1500_v1 = vsub.f32 %v4930_v51, %v5101_v42 }
 0x3a4   : > { %v5150_v29 = vmul.f32 %v4981_v25, %v1341_v30  ;;  %vm5173_vm7 = vmor %vm1620_vm6, %vm1621_vm4 }
 0x3a5   : > { %v1428_v36 = vpop.xlane.xlu1 %1427  ;;  %v4157_v31 = vpop.eup %4156  ;;  %v1616_v44 = vmul.f32 %v4155_v33, %v1615_v50  ;;  %v5159_v56 = vadd.f32 %v5098_v41, %v1710_v55 }
 0x3a6   : > { %v1470_v38 = vmul.f32 %v5150_v29, %v5150_v29  ;;  %v1454_v0 = vmul.f32 %v1428_v36, %v4981_v25  ;;  %v1605_v32 = vmul.f32 %v4157_v31, %v1516_v9  ;;  %vm1611_vm8 = vweird.f32 %v4157_v31 }
 0x3a7   : > { %v1617_v27 = vmul.f32 0.5, %v1616_v44  ;;  %v1741_v52 = vpack.c.bf16 %v5159_v56, %v5162_v12  ;;  %vm1612_vm10 = vmor %vm1610_vm9, %vm1611_vm8 }
 0x3a8   : > { %v1486_v49 = vsub.f32 %v1454_v0, %v1470_v38  ;;  %v1606_v58 = vmul.f32 %v4157_v31, %v1605_v32  ;;  %v1344_v2 = vpop.xlane.xlu0 %1343  ;;  %v5169_v28 = vpop.eup %4158 }
 0x3a9   : > { %v1618_v54 = vsub.f32 1.5, %v1617_v27  ;;  %v5165_v20 = vmul.f32 %v4981_v25, %v1344_v2  ;;  %v1525_v11 = vmul.f32 %v5169_v28, %v5147_v26  ;;  %vm1531_vm14 = vweird.f32 %v5169_v28 }
 0x3aa   : > { %v1518_v17 = vadd.f32 1e-05, %v1486_v49  ;;  %v1607_v53 = vmul.f32 0.5, %v1606_v58  ;;  %vm1532_vm1 = vmor %vm1530_vm0, %vm1531_vm14 }
 0x3ab   : > { %v1431_v4 = vpop.xlane.xlu2 %1430  ;;  %v1619_v43 = vmul.f32 %v4155_v33, %v1618_v54  ;;  %v1471_v24 = vmul.f32 %v5165_v20, %v5165_v20  ;;  %3922 = vmatmul.msk.bf16.gmra.mxu2 %vm728_vm3, %v1741_v52  ;;  %v1526_v9 = vmul.f32 %v5169_v28, %v1525_v11 }
 0x3ac   : > { %4160 = vrsqrt.f32 %v1518_v17  ;;  %v1608_v3 = vsub.f32 1.5, %v1607_v53  ;;  %v1455_v37 = vmul.f32 %v1431_v4, %v4981_v25  ;;  %vm1630_vm12 = vweird.f32 %v1518_v17 }
 0x3ad   : > { %v1623_v6 = vsel %vm5173_vm7, %v4155_v33, %v1619_v43  ;;  %v1461_v33 = vmul.f32 %v5184_v34, %v5184_v34  ;;  %v1527_v0 = vmul.f32 0.5, %v1526_v9 }
 0x3ae   : > { %v1609_v59 = vmul.f32 %v4157_v31, %v1608_v3  ;;  %v1487_v35 = vsub.f32 %v1455_v37, %v1471_v24  ;;  %v1693_v39 = vmul.f32 %v1623_v6, %v1501_v10  ;;  %v1502_v10 = vsub.f32 %v4960_v8, %v5150_v29 }
 0x3af   : > { %v1528_v53 = vsub.f32 1.5, %v1527_v0  ;;  %v1492_v8 = vsub.f32 %v4936_v14, %v5112_v57 }
 0x3b0   : > { %v1613_v30 = vsel %vm1612_vm10, %v4157_v31, %v1609_v59  ;;  %v1519_v50 = vadd.f32 1e-05, %v1487_v35  ;;  %v1401_v55 = vpop.xlane.xlu0 %1400  ;;  %v1712_v42 = vmul.f32 %v5078_v18, %v1693_v39 }
 0x3b1   : > { %v1445_v15 = vmul.f32 %v1401_v55, %v4981_v25  ;;  %v1692_v36 = vmul.f32 %v1613_v30, %v1500_v1  ;;  %v1529_v37 = vmul.f32 %v5169_v28, %v1528_v53  ;;  %v1503_v30 = vsub.f32 %v4968_v45, %v5165_v20 }
 0x3b2   : > { %v4161_v23 = vpop.eup %4160  ;;  %4162 = vrsqrt.f32 %v1519_v50  ;;  %v5200_v2 = vadd.f32 %v5098_v41, %v1712_v42  ;;  %vm1640_vm2 = vweird.f32 %v1519_v50 }
 0x3b3   : > { %v1625_v48 = vmul.f32 %v4161_v23, %v1518_v17  ;;  %v1477_v44 = vsub.f32 %v1445_v15, %v1461_v33  ;;  %v1711_v38 = vmul.f32 %v5078_v18, %v1692_v36  ;;  %vm1631_vm11 = vweird.f32 %v4161_v23 }
 0x3b4   : > { %vm1632_vm13 = vmor %vm1630_vm12, %vm1631_vm11  ;;  %v1533_v1 = vsel %vm1532_vm1, %v5169_v28, %v1529_v37  ;;  %v1493_v28 = vsub.f32 %v4953_v62, %v5184_v34  ;;  %v4001_v37 = vld [vmem:[%s6700_s8 + $0x38] sm:$0xff] }
 0x3b5   : > { %v1626_v51 = vmul.f32 %v4161_v23, %v1625_v48  ;;  %v1509_v31 = vadd.f32 1e-05, %v1477_v44  ;;  %v5197_v27 = vadd.f32 %v5098_v41, %v1711_v38  ;;  %v1684_v33 = vmul.f32 %v1533_v1, %v1492_v8  ;;  %4010 = vmatpush.bf16.msrb.mxu3 %v4001_v37  ;;  %1943 = vmatpush.bf16.msrb.mxu1 %v4001_v37 }
 0x3b7   : > { %v1627_v32 = vmul.f32 0.5, %v1626_v51  ;;  %4164 = vrsqrt.f32 %v1509_v31  ;;  %v1742_v52 = vpack.c.bf16 %v5200_v2, %v5197_v27  ;;  %vm1540_vm7 = vweird.f32 %v1509_v31 }
 0x3b8   : > { %v4163_v49 = vpop.eup %4162  ;;  %v1703_v57 = vmul.f32 %v5078_v18, %v1684_v33 }
 0x3b9   : > { %v1628_v58 = vsub.f32 1.5, %v1627_v32  ;;  %v1635_v54 = vmul.f32 %v4163_v49, %v1519_v50  ;;  %vm1641_vm15 = vweird.f32 %v4163_v49 }
 0x3ba   : > { %vm1642_vm4 = vmor %vm1640_vm2, %vm1641_vm15  ;;  %v5231_v62 = vadd.f32 %v5098_v41, %v1703_v57 }
 0x3bb   : > { %v1629_v4 = vmul.f32 %v4161_v23, %v1628_v58  ;;  %v1636_v43 = vmul.f32 %v4163_v49, %v1635_v54  ;;  %3923 = vmatmul.msk.bf16.gmra.mxu2 %vm728_vm3, %v1742_v52 }
 0x3bd   : > { %v4165_v24 = vpop.eup %4164  ;;  %v1633_v5 = vsel %vm1632_vm13, %v4161_v23, %v1629_v4  ;;  %v1637_v3 = vmul.f32 0.5, %v1636_v43 }
 0x3be   : > { %v1535_v6 = vmul.f32 %v4165_v24, %v1509_v31  ;;  %v1694_v11 = vmul.f32 %v1633_v5, %v1502_v10  ;;  %vm1541_vm6 = vweird.f32 %v4165_v24 }
 0x3bf   : > { %v1638_v59 = vsub.f32 1.5, %v1637_v3  ;;  %vm1542_vm8 = vmor %vm1540_vm7, %vm1541_vm6 }
 0x3c0   : > { %v1536_v17 = vmul.f32 %v4165_v24, %v1535_v6  ;;  %v1713_v26 = vmul.f32 %v5078_v18, %v1694_v11 }
 0x3c1   : > { %v1639_v35 = vmul.f32 %v4163_v49, %v1638_v59 }
 0x3c2   : > { %v1537_v55 = vmul.f32 0.5, %v1536_v17  ;;  %v5220_v20 = vadd.f32 %v5098_v41, %v1713_v26 }
 0x3c3   : > { %v1643_v29 = vsel %vm1642_vm4, %v4163_v49, %v1639_v35 }
 0x3c4   : > { %v1538_v39 = vsub.f32 1.5, %v1537_v55  ;;  %v1695_v23 = vmul.f32 %v1643_v29, %v1503_v30  ;;  %v4000_v55 = vld [vmem:[%s6700_s8 + $0x30] sm:$0xff] }
 0x3c5   : > { %4011 = vmatpush.bf16.msrb.mxu3 %v4000_v55  ;;  %1944 = vmatpush.bf16.msrb.mxu1 %v4000_v55 }
 0x3c6   : > { %v1539_v15 = vmul.f32 %v4165_v24, %v1538_v39  ;;  %v1714_v50 = vmul.f32 %v5078_v18, %v1695_v23 }
 0x3c8   : > { %v1543_v45 = vsel %vm1542_vm8, %v4165_v24, %v1539_v15  ;;  %v5223_v14 = vadd.f32 %v5098_v41, %v1714_v50  ;;  %v3999_v15 = vld [vmem:[%s6700_s8 + $0x28] sm:$0xff] }
 0x3c9   : > { %v1685_v36 = vmul.f32 %v1543_v45, %v1493_v28  ;;  %4012 = vmatpush.bf16.msrb.mxu3 %v3999_v15  ;;  %1945 = vmatpush.bf16.msrb.mxu1 %v3999_v15 }
 0x3ca   : > { %v1743_v9 = vpack.c.bf16 %v5223_v14, %v5220_v20 }
 0x3cb   : > { %v1704_v48 = vmul.f32 %v5078_v18, %v1685_v36 }
 0x3cc   : > { %3924 = vmatmul.msk.bf16.gmra.mxu2 %vm728_vm3, %v1743_v9 }
 0x3cd   : > { %v5234_v34 = vadd.f32 %v5098_v41, %v1704_v48 }
 0x3cf   : > { %v1738_v44 = vpack.c.bf16 %v5234_v34, %v5231_v62 }
 0x3d1   : > { %3919 = vmatmul.msk.bf16.vlgmr.msra.gmra.mxu0 %vm728_vm3, %v1738_v44 }
 0x3f0   : > { %v1347_v38 = vpop.xlane.xlu1 %1346 }
 0x3f1   : > { %v5240_v51 = vmul.f32 %v4981_v25, %v1347_v38  ;;  %v3998_v38 = vld [vmem:[%s6700_s8 + $0x20] sm:$0xff] }
 0x3f2   : > { %v1434_v42 = vpop.xlane.xlu0 %1433  ;;  %4013 = vmatpush.bf16.msrb.mxu3 %v3998_v38  ;;  %1946 = vmatpush.bf16.msrb.mxu1 %v3998_v38 }
 0x3f3   : > { %v1472_v31 = vmul.f32 %v5240_v51, %v5240_v51  ;;  %v1456_v0 = vmul.f32 %v1434_v42, %v4981_v25 }
 0x3f5   : > { %v1488_v32 = vsub.f32 %v1456_v0, %v1472_v31 }
 0x3f7   : > { %v1520_v49 = vadd.f32 1e-05, %v1488_v32  ;;  %v1504_v32 = vsub.f32 %v5002_v16, %v5240_v51 }
 0x3f8   : > { %v1350_v58 = vpop.xlane.xlu2 %1349 }
 0x3f9   : > { %4166 = vrsqrt.f32 %v1520_v49  ;;  %v5246_v54 = vmul.f32 %v4981_v25, %v1350_v58  ;;  %vm1650_vm10 = vweird.f32 %v1520_v49 }
 0x3fa   : > { %v1437_v53 = vpop.xlane.xlu1 %1436  ;;  %v1320_v4 = vpop.xlane.xlu0 %1319 }
 0x3fb   : > { %v1473_v52 = vmul.f32 %v5246_v54, %v5246_v54  ;;  %v1457_v43 = vmul.f32 %v1437_v53, %v4981_v25  ;;  %v5264_v29 = vmul.f32 %v4981_v25, %v1320_v4 }
 0x3fd   : > { %v1489_v24 = vsub.f32 %v1457_v43, %v1473_v52  ;;  %v1463_v57 = vmul.f32 %v5264_v29, %v5264_v29 }
 0x3ff   : > { %v4167_v5 = vpop.eup %4166  ;;  %v1521_v3 = vadd.f32 1e-05, %v1489_v24 }
 0x400   : > { %v1645_v10 = vmul.f32 %v4167_v5, %v1520_v49  ;;  %v1317_v6 = vpop.xlane.xlu2 %1316  ;;  %vm1651_vm9 = vweird.f32 %v4167_v5 }
 0x401   : > { %4168 = vrsqrt.f32 %v1521_v3  ;;  %v5255_v59 = vmul.f32 %v4981_v25, %v1317_v6  ;;  %vm5278_vm11 = vmor %vm1650_vm10, %vm1651_vm9  ;;  %vm1660_vm13 = vweird.f32 %v1521_v3 }
 0x402   : > { %v1646_v17 = vmul.f32 %v4167_v5, %v1645_v10  ;;  %v1404_v11 = vpop.xlane.xlu1 %1403  ;;  %v1353_v35 = vpop.xlane.xlu0 %1352 }
 0x403   : > { %v1462_v1 = vmul.f32 %v5255_v59, %v5255_v59  ;;  %v1446_v30 = vmul.f32 %v1404_v11, %v4981_v25  ;;  %v5290_v53 = vmul.f32 %v4981_v25, %v1353_v35  ;;  %v1505_v11 = vsub.f32 %v5023_v47, %v5246_v54 }
 0x404   : > { %v1647_v8 = vmul.f32 0.5, %v1646_v17 }
 0x405   : > { %v1478_v39 = vsub.f32 %v1446_v30, %v1462_v1  ;;  %v1474_v35 = vmul.f32 %v5290_v53, %v5290_v53 }
 0x406   : > { %v1648_v23 = vsub.f32 1.5, %v1647_v8 }
 0x407   : > { %v4169_v26 = vpop.eup %4168  ;;  %v5266_v33 = vadd.f32 1e-05, %v1478_v39 }
 0x408   : > { %v1649_v50 = vmul.f32 %v4167_v5, %v1648_v23  ;;  %v1655_v28 = vmul.f32 %v4169_v26, %v1521_v3  ;;  %v1407_v45 = vpop.xlane.xlu2 %1406  ;;  %vm1661_vm12 = vweird.f32 %v4169_v26  ;;  %v3996_v3 = vld [vmem:[%s6700_s8 + $0x10] sm:$0xff] }
 0x409   : > { %4170 = vrsqrt.f32 %v5266_v33  ;;  %v1447_v36 = vmul.f32 %v1407_v45, %v4981_v25  ;;  %vm1662_vm14 = vmor %vm1660_vm13, %vm1661_vm12  ;;  %vm1550_vm0 = vweird.f32 %v5266_v33 }
 0x40a   : > { %v1656_v9 = vmul.f32 %v4169_v26, %v1655_v28  ;;  %v1356_v48 = vpop.xlane.xlu1 %1355  ;;  %v1443_v44 = vpop.xlane.xlu0 %1442  ;;  %v1653_v49 = vsel %vm5278_vm11, %v4167_v5, %v1649_v50  ;;  %v3997_v5 = vld [vmem:[%s6700_s8 + $0x18] sm:$0xff] }
 0x40b   : > { %v1479_v31 = vsub.f32 %v1447_v36, %v1463_v57  ;;  %v5283_v0 = vmul.f32 %v4981_v25, %v1356_v48  ;;  %v1459_v43 = vmul.f32 %v1443_v44, %v4981_v25  ;;  %v1696_v51 = vmul.f32 %v1653_v49, %v1504_v32  ;;  %4014 = vmatpush.bf16.msrb.mxu3 %v3997_v5 }
 0x40c   : > { %v1657_v58 = vmul.f32 0.5, %v1656_v9  ;;  %1947 = vmatpush.bf16.msrb.mxu1 %v3997_v5  ;;  %v3995_v9 = vld [vmem:[%s6700_s8 + $0x8] sm:$0xff] }
 0x40d   : > { %v5292_v4 = vadd.f32 1e-05, %v1479_v31  ;;  %v1475_v52 = vmul.f32 %v5283_v0, %v5283_v0  ;;  %v1715_v54 = vmul.f32 %v5078_v18, %v1696_v51 }
 0x40e   : > { %v1658_v24 = vsub.f32 1.5, %v1657_v58  ;;  %v1494_v58 = vsub.f32 %v5034_v46, %v5255_v59  ;;  %v1495_v46 = vsub.f32 %v5019_v22, %v5264_v29  ;;  %v1507_v22 = vsub.f32 %v5067_v7, %v5283_v0 }
 0x40f   : > { %v4171_v37 = vpop.eup %4170  ;;  %4172 = vrsqrt.f32 %v5292_v4  ;;  %v1491_v16 = vsub.f32 %v1459_v43, %v1475_v52  ;;  %4015 = vmatpush.bf16.msrb.mxu3 %v3996_v3  ;;  %v5317_v57 = vadd.f32 %v5098_v41, %v1715_v54  ;;  %vm1560_vm4 = vweird.f32 %v5292_v4 }
 0x410   : > { %v1659_v10 = vmul.f32 %v4169_v26, %v1658_v24  ;;  %v1545_v6 = vmul.f32 %v4171_v37, %v5266_v33  ;;  %v1440_v17 = vpop.xlane.xlu2 %1439  ;;  %1948 = vmatpush.bf16.msrb.mxu1 %v3996_v3  ;;  %vm1551_vm15 = vweird.f32 %v4171_v37  ;;  %v3994_v33 = vld [vmem:[%s6700_s8] sm:$0xff]  ;;  %v1506_v7 = vsub.f32 %v5050_v40, %v5290_v53 }
 0x411   : > { %v5306_v1 = vadd.f32 1e-05, %v1491_v16  ;;  %v1458_v30 = vmul.f32 %v1440_v17, %v4981_v25  ;;  %vm1552_vm1 = vmor %vm1550_vm0, %vm1551_vm15 }
 0x412   : > { %v1663_v55 = vsel %vm1662_vm14, %v4169_v26, %v1659_v10  ;;  %v1546_v8 = vmul.f32 %v4171_v37, %v1545_v6 }
 0x413   : > { %4174 = vrsqrt.f32 %v5306_v1  ;;  %v1490_v39 = vsub.f32 %v1458_v30, %v1474_v35  ;;  %v1697_v47 = vmul.f32 %v1663_v55, %v1505_v11  ;;  %4016 = vmatpush.bf16.msrb.mxu3 %v3995_v9  ;;  %vm1680_vm8 = vweird.f32 %v5306_v1 }
 0x414   : > { %v1547_v23 = vmul.f32 0.5, %v1546_v8  ;;  %1949 = vmatpush.bf16.msrb.mxu1 %v3995_v9 }
 0x415   : > { %v4173_v15 = vpop.eup %4172  ;;  %v1522_v50 = vadd.f32 1e-05, %v1490_v39  ;;  %v1716_v28 = vmul.f32 %v5078_v18, %v1697_v47 }
 0x416   : > { %v1548_v45 = vsub.f32 1.5, %v1547_v23  ;;  %v1555_v26 = vmul.f32 %v4173_v15, %v5292_v4  ;;  %vm1561_vm2 = vweird.f32 %v4173_v15  ;;  %v5343_v4 = vld [vmem:[%s6699_s7] ss:$0 sm:$0xff] }
 0x417   : > { %4176 = vrsqrt.f32 %v1522_v50  ;;  %v5320_v36 = vadd.f32 %v5098_v41, %v1716_v28  ;;  %4017 = vmatpush.bf16.msrb.mxu3 %v3994_v33  ;;  %vm1562_vm6 = vmor %vm1560_vm4, %vm1561_vm2  ;;  %vm1670_vm11 = vweird.f32 %v1522_v50 }
 0x418   : > { %v1549_v48 = vmul.f32 %v4171_v37, %v1548_v45  ;;  %v1556_v44 = vmul.f32 %v4173_v15, %v1555_v26  ;;  %1950 = vmatpush.bf16.msrb.mxu1 %v3994_v33 }
 0x419   : > { %v4175_v38 = vpop.eup %4174  ;;  %v1744_v42 = vpack.c.bf16 %v5320_v36, %v5317_v57 }
 0x41a   : > { %v1553_v31 = vsel %vm1552_vm1, %v4171_v37, %v1549_v48  ;;  %v1557_v32 = vmul.f32 0.5, %v1556_v44  ;;  %v1675_v49 = vmul.f32 %v4175_v38, %v5306_v1  ;;  %vm1681_vm7 = vweird.f32 %v4175_v38 }
 0x41b   : > { %3925 = vmatmul.msk.bf16.gmra.mxu2 %vm728_vm3, %v1744_v42  ;;  %v1686_v16 = vmul.f32 %v1553_v31, %v1494_v58  ;;  %vm1682_vm9 = vmor %vm1680_vm8, %vm1681_vm7 }
 0x41c   : > { %v1558_v52 = vsub.f32 1.5, %v1557_v32  ;;  %v1676_v43 = vmul.f32 %v4175_v38, %v1675_v49 }
 0x41d   : > { %v4177_v24 = vpop.eup %4176  ;;  %v1705_v35 = vmul.f32 %v5078_v18, %v1686_v16 }
 0x41e   : > { %v1559_v37 = vmul.f32 %v4173_v15, %v1558_v52  ;;  %v1677_v51 = vmul.f32 0.5, %v1676_v43  ;;  %v1665_v5 = vmul.f32 %v4177_v24, %v1522_v50  ;;  %v1825_v59 = vpop.f32.mrf.mxu2  ;;  %vm1671_vm10 = vweird.f32 %v4177_v24 }
 0x41f   : > { %v5349_v39 = vadd.f32 %v5098_v41, %v1705_v35  ;;  %v1826_v23 = vadd.f32 %v5343_v4, %v1825_v59  ;;  %vm1672_vm12 = vmor %vm1670_vm11, %vm1671_vm10 }
 0x420   : > { %v1563_v10 = vsel %vm1562_vm6, %v4173_v15, %v1559_v37  ;;  %v1678_v6 = vsub.f32 1.5, %v1677_v51  ;;  %v1666_v17 = vmul.f32 %v4177_v24, %v1665_v5 }
 0x421   : > { %v1687_v11 = vmul.f32 %v1563_v10, %v1495_v46  ;;  %v1859_v48 = vmax.f32 %v1826_v23, 0.0 }
 0x422   : > { %v1679_v30 = vmul.f32 %v4175_v38, %v1678_v6  ;;  %v1667_v55 = vmul.f32 0.5, %v1666_v17 }
 0x423   : > { %v1706_v29 = vmul.f32 %v5078_v18, %v1687_v11 }
 0x424   : > { %v1683_v8 = vsel %vm1682_vm9, %v4175_v38, %v1679_v30  ;;  %v1668_v3 = vsub.f32 1.5, %v1667_v55 }
 0x425   : > { %v5352_v1 = vadd.f32 %v5098_v41, %v1706_v29  ;;  %v1699_v47 = vmul.f32 %v1683_v8, %v1507_v22 }
 0x426   : > { %v1669_v54 = vmul.f32 %v4177_v24, %v1668_v3  ;;  %v1827_v0 = vpop.f32.mrf.mxu2 }
 0x427   : > { %v1739_v15 = vpack.c.bf16 %v5352_v1, %v5349_v39  ;;  %v1828_v45 = vadd.f32 %v5343_v4, %v1827_v0  ;;  %v1718_v9 = vmul.f32 %v5078_v18, %v1699_v47 }
 0x428   : > { %v1673_v28 = vsel %vm1672_vm12, %v4177_v24, %v1669_v54 }
 0x429   : > { %3920 = vmatmul.msk.bf16.gmra.mxu0 %vm728_vm3, %v1739_v15  ;;  %v1698_v26 = vmul.f32 %v1673_v28, %v1506_v7  ;;  %v1860_v50 = vmax.f32 %v1828_v45, 0.0  ;;  %v5367_v53 = vadd.f32 %v5098_v41, %v1718_v9 }
 0x42b   : > { %v1717_v44 = vmul.f32 %v5078_v18, %v1698_v26  ;;  %v1873_v38 = vpack.c.bf16 %v1860_v50, %v1859_v48 }
 0x42d   : > { %v5364_v40 = vadd.f32 %v5098_v41, %v1717_v44 }
 0x42e   : > { %v1830_v42 = vpop.f32.mrf.mxu2 }
 0x42f   : > { %v1745_v31 = vpack.c.bf16 %v5367_v53, %v5364_v40  ;;  %v1831_v32 = vadd.f32 %v5343_v4, %v1830_v42 }
 0x431   : > { %3926 = vmatmul.msk.bf16.gmra.mxu2 %vm728_vm3, %v1745_v31  ;;  %v1861_v33 = vmax.f32 %v1831_v32, 0.0 }
 0x436   : > { %v1832_v49 = vpop.f32.mrf.mxu2 }
 0x437   : > { %v1833_v58 = vadd.f32 %v5343_v4, %v1832_v49 }
 0x439   : > { %v1862_v18 = vmax.f32 %v1833_v58, 0.0 }
 0x43b   : > { %v1874_v52 = vpack.c.bf16 %v1862_v18, %v1861_v33 }
 0x43d   : > { %1966 = vmatmul.bf16.vlgmr.msrb.gmra.mxu3 %v1874_v52 }
 0x43e   : > { %v1835_v43 = vpop.f32.mrf.mxu2 }
 0x43f   : > { %v1836_v24 = vadd.f32 %v5343_v4, %v1835_v43 }
 0x441   : > { %v1863_v37 = vmax.f32 %v1836_v24, 0.0 }
 0x446   : > { %v1837_v41 = vpop.f32.mrf.mxu2 }
 0x447   : > { %v1838_v16 = vadd.f32 %v5343_v4, %v1837_v41  ;;  %v5389_v41 = vld [vmem:[%s6701_s9] ss:$0 sm:$0xff] }
 0x449   : > { %v1864_v51 = vmax.f32 %v1838_v16, 0.0 }
 0x44b   : > { %v1875_v5 = vpack.c.bf16 %v1864_v51, %v1863_v37 }
 0x44d   : > { %1971 = vmatmul.bf16.gmra.mxu3 %v1875_v5 }
 0x44e   : > { %v1815_v46 = vpop.f32.mrf.mxu0 }
 0x44f   : > { %v1840_v59 = vpop.f32.mrf.mxu2  ;;  %v1816_v10 = vadd.f32 %v5343_v4, %v1815_v46 }
 0x450   : > { %v1841_v6 = vadd.f32 %v5343_v4, %v1840_v59 }
 0x451   : > { %v1855_v55 = vmax.f32 %v1816_v10, 0.0 }
 0x452   : > { %v1865_v29 = vmax.f32 %v1841_v6, 0.0 }
 0x456   : > { %v1817_v17 = vpop.f32.mrf.mxu0 }
 0x457   : > { %v1818_v11 = vadd.f32 %v5343_v4, %v1817_v17  ;;  %v1842_v35 = vpop.f32.mrf.mxu2 }
 0x458   : > { %v1843_v30 = vadd.f32 %v5343_v4, %v1842_v35 }
 0x459   : > { %v1856_v22 = vmax.f32 %v1818_v11, 0.0 }
 0x45a   : > { %v1866_v8 = vmax.f32 %v1843_v30, 0.0 }
 0x45b   : > { %v1871_v3 = vpack.c.bf16 %v1856_v22, %v1855_v55 }
 0x45c   : > { %v1876_v47 = vpack.c.bf16 %v1866_v8, %v1865_v29 }
 0x45d   : > { %1951 = vmatmul.bf16.vlgmr.msrb.gmra.mxu1 %v1871_v3 }
 0x45e   : > { %1976 = vmatmul.bf16.gmra.mxu3 %v1876_v47 }
 0x49e   : > { %v1845_v54 = vpop.f32.mrf.mxu2 }
 0x49f   : > { %v1846_v23 = vadd.f32 %v5343_v4, %v1845_v54 }
 0x4a1   : > { %v1867_v28 = vmax.f32 %v1846_v23, 0.0 }
 0x4a6   : > { %v1820_v7 = vpop.f32.mrf.mxu0  ;;  %v1847_v0 = vpop.f32.mrf.mxu2 }
 0x4a7   : > { %v1848_v15 = vadd.f32 %v5343_v4, %v1847_v0  ;;  %v1821_v9 = vadd.f32 %v5343_v4, %v1820_v7 }
 0x4a9   : > { %v1868_v45 = vmax.f32 %v1848_v15, 0.0  ;;  %v1857_v44 = vmax.f32 %v1821_v9, 0.0 }
 0x4ab   : > { %v1877_v26 = vpack.c.bf16 %v1868_v45, %v1867_v28 }
 0x4ad   : > { %1981 = vmatmul.bf16.gmra.mxu3 %v1877_v26 }
 0x4ae   : > { %v1822_v48 = vpop.f32.mrf.mxu0 }
 0x4af   : > { %v1823_v50 = vadd.f32 %v5343_v4, %v1822_v48 }
 0x4b1   : > { %v1858_v42 = vmax.f32 %v1823_v50, 0.0 }
 0x4b3   : > { %v1872_v31 = vpack.c.bf16 %v1858_v42, %v1857_v44 }
 0x4b4   : > { %v1850_v32 = vpop.f32.mrf.mxu2 }
 0x4b5   : > { %1956 = vmatmul.bf16.gmra.mxu1 %v1872_v31  ;;  %v1851_v49 = vadd.f32 %v5343_v4, %v1850_v32 }
 0x4b7   : > { %v1869_v18 = vmax.f32 %v1851_v49, 0.0 }
 0x4bc   : > { %v1852_v58 = vpop.f32.mrf.mxu2 }
 0x4bd   : > { %v1853_v33 = vadd.f32 %v5343_v4, %v1852_v58 }
 0x4bf   : > { %v1870_v52 = vmax.f32 %v1853_v33, 0.0 }
 0x4c0   : > { %v1967_v17 = vpop.f32.mrf.mxu3 }
 0x4c1   : > { %v1878_v43 = vpack.c.bf16 %v1870_v52, %v1869_v18  ;;  %v1998_v45 = vadd.f32 %v1967_v17, %v5162_v12 }
 0x4c3   : > { %1986 = vmatmul.bf16.gmra.mxu3 %v1878_v43  ;;  %v5435_v48 = vadd.f32 %v5389_v41, %v1998_v45 }
 0x4c5   : > { %1961 = vmatmul.bf16.gmra.mxu1 %v1873_v38  ;;  %v2100_v31 = vmul.f32 %v5435_v48, %v5435_v48 }
 0x4c7   : > { %v2128_v33 = vsel %vm728_vm3, %v2100_v31, 0.0 }
 0x4c8   : > { %v1969_v11 = vpop.f32.mrf.mxu3 }
 0x4c9   : > { %v1999_v32 = vadd.f32 %v1969_v11, %v5159_v56 }
 0x4cb   : > { %v5452_v52 = vadd.f32 %v5389_v41, %v1999_v32 }
 0x4d0   : > { %v1972_v35 = vpop.f32.mrf.mxu3 }
 0x4d8   : > { %v1974_v47 = vpop.f32.mrf.mxu3 }
 0x4da   : > { %v1952_v24 = vpop.f32.mrf.mxu1 }
 0x4db   : > { %v1992_v16 = vadd.f32 %v1952_v24, %v5231_v62  ;;  %v2000_v24 = vadd.f32 %v1972_v35, %v5197_v27  ;;  %v2051_v27 = vsel %vm728_vm3, %v5452_v52, 0.0 }
 0x4dd   : > { %v5393_v37 = vadd.f32 %v5389_v41, %v1992_v16  ;;  %v2001_v16 = vadd.f32 %v1974_v47, %v5200_v2  ;;  %v2048_v2 = vsel %vm728_vm3, %v5435_v48, 0.0 }
 0x4df   : > { %v2030_v51 = vsel %vm728_vm3, %v5393_v37, 0.0  ;;  %v2094_v4 = vmul.f32 %v5393_v37, %v5393_v37 }
 0x4e0   : > { %2031 = vadd.xlane.f32.xlu1 %v2030_v51 }
 0x4e1   : > { %v2110_v38 = vsel %vm728_vm3, %v2094_v4, 0.0  ;;  %v1977_v26 = vpop.f32.mrf.mxu3 }
 0x4e2   : > { %2111 = vadd.xlane.f32.xlu2 %v2110_v38  ;;  %v1954_v5 = vpop.f32.mrf.mxu1 }
 0x4e3   : > { %v1993_v46 = vadd.f32 %v1954_v5, %v5234_v34  ;;  %v2101_v5 = vmul.f32 %v5452_v52, %v5452_v52 }
 0x4e5   : > { %v5402_v59 = vadd.f32 %v5389_v41, %v1993_v46  ;;  %v2131_v11 = vsel %vm728_vm3, %v2101_v5, 0.0 }
 0x4e7   : > { %v2095_v62 = vmul.f32 %v5402_v59, %v5402_v59  ;;  %v2033_v6 = vsel %vm728_vm3, %v5402_v59, 0.0 }
 0x4e9   : > { %v2113_v10 = vsel %vm728_vm3, %v2095_v62, 0.0  ;;  %v1979_v49 = vpop.f32.mrf.mxu3 }
 0x4ea   : > { %2114 = vadd.xlane.f32.xlu0 %v2113_v10  ;;  %2034 = vadd.xlane.f32.xlu2 %v2033_v6  ;;  %v5467_v10 = vadd.f32 %v5389_v41, %v2000_v24  ;;  %v5470_v6 = vadd.f32 %v5389_v41, %v2001_v16 }
 0x530   : > { %v1982_v46 = vpop.f32.mrf.mxu3 }
 0x531   : > { %v2004_v16 = vadd.f32 %v1982_v46, %v5317_v57 }
 0x532   : > { %v1957_v30 = vpop.f32.mrf.mxu1 }
 0x533   : > { %v1994_v55 = vadd.f32 %v1957_v30, %v5349_v39 }
 0x535   : > { %v5411_v34 = vadd.f32 %v5389_v41, %v1994_v55  ;;  %v2103_v55 = vmul.f32 %v5470_v6, %v5470_v6 }
 0x537   : > { %v2036_v22 = vsel %vm728_vm3, %v5411_v34, 0.0  ;;  %v2096_v29 = vmul.f32 %v5411_v34, %v5411_v34 }
 0x538   : > { %2037 = vadd.xlane.f32.xlu0 %v2036_v22  ;;  %v2102_v22 = vmul.f32 %v5467_v10, %v5467_v10 }
 0x539   : > { %v2116_v8 = vsel %vm728_vm3, %v2096_v29, 0.0  ;;  %v2002_v29 = vadd.f32 %v1977_v26, %v5220_v20  ;;  %v2054_v20 = vsel %vm728_vm3, %v5467_v10, 0.0 }
 0x53a   : > { %2117 = vadd.xlane.f32.xlu1 %v2116_v8  ;;  %v1959_v3 = vpop.f32.mrf.mxu1 }
 0x53b   : > { %v1995_v54 = vadd.f32 %v1959_v3, %v5352_v1 }
 0x53d   : > { %v5420_v23 = vadd.f32 %v5389_v41, %v1995_v54  ;;  %v1984_v54 = vpop.f32.mrf.mxu3 }
 0x53f   : > { %v2097_v39 = vmul.f32 %v5420_v23, %v5420_v23  ;;  %v2039_v0 = vsel %vm728_vm3, %v5420_v23, 0.0 }
 0x541   : > { %v2119_v7 = vsel %vm728_vm3, %v2097_v39, 0.0  ;;  %v2137_v39 = vsel %vm728_vm3, %v2103_v55, 0.0 }
 0x542   : > { %2120 = vadd.xlane.f32.xlu2 %v2119_v7  ;;  %2040 = vadd.xlane.f32.xlu1 %v2039_v0  ;;  %v1962_v15 = vpop.f32.mrf.mxu1  ;;  %v2134_v7 = vsel %vm728_vm3, %v2102_v22, 0.0 }
 0x543   : > { %v1996_v28 = vadd.f32 %v1962_v15, %v5117_v21  ;;  %v5494_v15 = vadd.f32 %v5389_v41, %v2002_v29 }
 0x545   : > { %v5430_v1 = vadd.f32 %v5389_v41, %v1996_v28  ;;  %v2060_v32 = vsel %vm728_vm3, %v5494_v15, 0.0 }
 0x546   : > { %v1987_v31 = vpop.f32.mrf.mxu3 }
 0x547   : > { %v2098_v9 = vmul.f32 %v5430_v1, %v5430_v1  ;;  %v2042_v44 = vsel %vm728_vm3, %v5430_v1, 0.0 }
 0x549   : > { %v2122_v50 = vsel %vm728_vm3, %v2098_v9, 0.0  ;;  %v2003_v9 = vadd.f32 %v1979_v49, %v5223_v14 }
 0x54a   : > { %2123 = vadd.xlane.f32.xlu0 %v2122_v50  ;;  %2043 = vadd.xlane.f32.xlu2 %v2042_v44  ;;  %v1964_v21 = vpop.f32.mrf.mxu1  ;;  %v2104_v50 = vmul.f32 %v5494_v15, %v5494_v15 }
 0x54b   : > { %v1997_v12 = vadd.f32 %v1964_v21, %v5120_v63  ;;  %v5503_v21 = vadd.f32 %v5389_v41, %v2003_v9 }
 0x54c   : > { %v2140_v14 = vsel %vm728_vm3, %v2104_v50, 0.0  ;;  %v5570_v50 = vld [vmem:[%s6704_s12] ss:$0 sm:$0xff] }
 0x54d   : > { %v5442_v42 = vadd.f32 %v5389_v41, %v1997_v12  ;;  %v2005_v12 = vadd.f32 %v1984_v54, %v5320_v36  ;;  %v2105_v36 = vmul.f32 %v5503_v21, %v5503_v21 }
 0x54f   : > { %v2099_v58 = vmul.f32 %v5442_v42, %v5442_v42  ;;  %v2045_v63 = vsel %vm728_vm3, %v5442_v42, 0.0 }
 0x551   : > { %v2125_v18 = vsel %vm728_vm3, %v2099_v58, 0.0  ;;  %v2057_v58 = vsel %vm728_vm3, %v5470_v6, 0.0 }
 0x552   : > { %2129 = vadd.xlane.f32.xlu2 %v2128_v33  ;;  %2126 = vadd.xlane.f32.xlu1 %v2125_v18  ;;  %v5512_v18 = vadd.f32 %v5389_v41, %v2005_v12 }
 0x553   : > { %2046 = vadd.xlane.f32.xlu0 %v2045_v63  ;;  %v2032_v43 = vpop.xlane.xlu1 %2031 }
 0x554   : > { %v5457_v56 = vmul.f32 %v2032_v43, %v4981_v25 }
 0x555   : > { %v2112_v51 = vpop.xlane.xlu2 %2111 }
 0x556   : > { %v2174_v4 = vmul.f32 %v5457_v56, %v5457_v56  ;;  %v2158_v38 = vmul.f32 %v2112_v51, %v4981_v25  ;;  %v2006_v51 = vadd.f32 %v1987_v31, %v5364_v40  ;;  %v2107_v40 = vmul.f32 %v5512_v18, %v5512_v18 }
 0x557   : > { %v2206_v55 = vsub.f32 %v5393_v37, %v5457_v56  ;;  %v5546_v37 = vld [vmem:[%s6702_s10] ss:$0 sm:$0xff] }
 0x558   : > { %v2190_v62 = vsub.f32 %v2158_v38, %v2174_v4  ;;  %v2069_v4 = vsel %vm728_vm3, %v5512_v18, 0.0  ;;  %v2143_v38 = vsel %vm728_vm3, %v2105_v36, 0.0  ;;  %v5527_v57 = vadd.f32 %v5389_v41, %v2006_v51 }
 0x559   : > { %v2149_v22 = vsel %vm728_vm3, %v2107_v40, 0.0 }
 0x55a   : > { %v5476_v17 = vadd.f32 1e-05, %v2190_v62  ;;  %2052 = vadd.xlane.f32.xlu2 %v2051_v27  ;;  %2049 = vadd.xlane.f32.xlu1 %v2048_v2  ;;  %v2063_v62 = vsel %vm728_vm3, %v5503_v21, 0.0  ;;  %v1989_v27 = vpop.f32.mrf.mxu3  ;;  %v2108_v56 = vmul.f32 %v5527_v57, %v5527_v57 }
 0x55b   : > { %2132 = vadd.xlane.f32.xlu0 %v2131_v11  ;;  %v5524_v11 = vadd.f32 %v5389_v41, %v2004_v16  ;;  %v2007_v46 = vadd.f32 %v1989_v27, %v5367_v53 }
 0x55c   : > { %4178 = vrsqrt.f32 %v5476_v17  ;;  %vm2244_vm14 = vweird.f32 %v5476_v17 }
 0x55d   : > { %v2035_v35 = vpop.xlane.xlu2 %2034  ;;  %v2115_v30 = vpop.xlane.xlu0 %2114  ;;  %v2066_v29 = vsel %vm728_vm3, %v5524_v11, 0.0 }
 0x55e   : > { %v5486_v8 = vmul.f32 %v2035_v35, %v4981_v25  ;;  %v2159_v47 = vmul.f32 %v2115_v30, %v4981_v25 }
 0x560   : > { %v2175_v3 = vmul.f32 %v5486_v8, %v5486_v8 }
 0x562   : > { %v4179_v0 = vpop.eup %4178  ;;  %v2191_v28 = vsub.f32 %v2159_v47, %v2175_v3  ;;  %2138 = vadd.xlane.f32.xlu2 %v2137_v39  ;;  %2135 = vadd.xlane.f32.xlu1 %v2134_v7  ;;  %v2072_v3 = vsel %vm728_vm3, %v5527_v57, 0.0  ;;  %v5556_v39 = vld [vmem:[%s6703_s11] ss:$0 sm:$0xff] }
 0x563   : > { %v2239_v45 = vmul.f32 %v4179_v0, %v5476_v17  ;;  %2055 = vadd.xlane.f32.xlu0 %v2054_v20  ;;  %vm2245_vm13 = vweird.f32 %v4179_v0  ;;  %v5541_v17 = vadd.f32 %v5389_v41, %v2007_v46 }
 0x564   : > { %v2223_v26 = vadd.f32 1e-05, %v2191_v28  ;;  %vm2246_vm15 = vmor %vm2244_vm14, %vm2245_vm13  ;;  %v2152_v28 = vsel %vm728_vm3, %v2108_v56, 0.0 }
 0x565   : > { %v2240_v44 = vmul.f32 %v4179_v0, %v2239_v45  ;;  %v2109_v41 = vmul.f32 %v5541_v17, %v5541_v17  ;;  %v2075_v20 = vsel %vm728_vm3, %v5541_v17, 0.0 }
 0x566   : > { %4180 = vrsqrt.f32 %v2223_v26  ;;  %vm2254_vm1 = vweird.f32 %v2223_v26 }
 0x567   : > { %v2241_v49 = vmul.f32 0.5, %v2240_v44 }
 0x569   : > { %v2242_v43 = vsub.f32 1.5, %v2241_v49 }
 0x56a   : > { %2061 = vadd.xlane.f32.xlu2 %v2060_v32  ;;  %2058 = vadd.xlane.f32.xlu1 %v2057_v58 }
 0x56b   : > { %2141 = vadd.xlane.f32.xlu0 %v2140_v14  ;;  %v2243_v2 = vmul.f32 %v4179_v0, %v2242_v43 }
 0x56c   : > { %v4181_v33 = vpop.eup %4180 }
 0x56d   : > { %v2249_v63 = vmul.f32 %v4181_v33, %v2223_v26  ;;  %v2247_v30 = vsel %vm2246_vm15, %v4179_v0, %v2243_v2  ;;  %vm2255_vm0 = vweird.f32 %v4181_v33  ;;  %v2207_v0 = vsub.f32 %v5402_v59, %v5486_v8 }
 0x56e   : > { %v2398_v53 = vmul.f32 %v2247_v30, %v2206_v55  ;;  %vm2256_vm2 = vmor %vm2254_vm1, %vm2255_vm0  ;;  %v2155_v26 = vsel %vm728_vm3, %v2109_v41, 0.0  ;;  %v2106_v59 = vmul.f32 %v5524_v11, %v5524_v11 }
 0x56f   : > { %v2250_v24 = vmul.f32 %v4181_v33, %v2249_v63 }
 0x570   : > { %v2417_v54 = vmul.f32 %v5546_v37, %v2398_v53  ;;  %v2146_v12 = vsel %vm728_vm3, %v2106_v59, 0.0 }
 0x571   : > { %v2251_v5 = vmul.f32 0.5, %v2250_v24 }
 0x572   : > { %2070 = vadd.xlane.f32.xlu2 %v2069_v4  ;;  %2144 = vadd.xlane.f32.xlu1 %v2143_v38  ;;  %v5565_v9 = vadd.f32 %v5556_v39, %v2417_v54 }
 0x573   : > { %2064 = vadd.xlane.f32.xlu0 %v2063_v62  ;;  %v2252_v35 = vsub.f32 1.5, %v2251_v5 }
 0x574   : > { %v2456_v44 = vmul.f32 %v5570_v50, %v5565_v9 }
 0x575   : > { %v2253_v47 = vmul.f32 %v4181_v33, %v2252_v35 }
 0x576   : > { %v2472_v32 = vsel %vm728_vm3, %v2456_v44, 0.0 }
 0x577   : > { %v2257_v7 = vsel %vm2256_vm2, %v4181_v33, %v2253_v47 }
 0x578   : > { %v2399_v45 = vmul.f32 %v2257_v7, %v2207_v0 }
 0x57a   : > { %2150 = vadd.xlane.f32.xlu2 %v2149_v22  ;;  %2067 = vadd.xlane.f32.xlu1 %v2066_v29  ;;  %v2418_v8 = vmul.f32 %v5546_v37, %v2399_v45 }
 0x57b   : > { %2073 = vadd.xlane.f32.xlu0 %v2072_v3 }
 0x57c   : > { %v5579_v31 = vadd.f32 %v5556_v39, %v2418_v8 }
 0x57e   : > { %v2457_v58 = vmul.f32 %v5570_v50, %v5579_v31 }
 0x580   : > { %v2475_v14 = vsel %vm728_vm3, %v2457_v58, 0.0 }
 0x582   : > { %2153 = vadd.xlane.f32.xlu2 %v2152_v28  ;;  %2076 = vadd.xlane.f32.xlu1 %v2075_v20 }
 0x583   : > { %2156 = vadd.xlane.f32.xlu0 %v2155_v26 }
 0x58a   : > { %2147 = vadd.xlane.f32.xlu1 %v2146_v12 }
 0x58b   : > { %2473 = vadd.xlane.f32.xlu0 %v2472_v32 }
 0x592   : > { %2476 = vadd.xlane.f32.xlu1 %v2475_v14 }
 0x5ab   : > { %v2038_v49 = vpop.xlane.xlu0 %2037 }
 0x5ac   : > { %v2080_v33 = vmul.f32 %v2038_v49, %v4981_v25 }
 0x5ad   : > { %v2118_v63 = vpop.xlane.xlu1 %2117 }
 0x5ae   : > { %v2176_v36 = vmul.f32 %v2080_v33, %v2080_v33  ;;  %v2160_v43 = vmul.f32 %v2118_v63, %v4981_v25  ;;  %v2208_v0 = vsub.f32 %v5411_v34, %v2080_v33 }
 0x5b0   : > { %v2192_v24 = vsub.f32 %v2160_v43, %v2176_v36 }
 0x5b2   : > { %v2224_v16 = vadd.f32 1e-05, %v2192_v24 }
 0x5b4   : > { %4182 = vrsqrt.f32 %v2224_v16  ;;  %vm2264_vm6 = vweird.f32 %v2224_v16 }
 0x5b5   : > { %v2121_v51 = vpop.xlane.xlu2 %2120  ;;  %v2041_v4 = vpop.xlane.xlu1 %2040 }
 0x5b6   : > { %v2081_v38 = vmul.f32 %v2041_v4, %v4981_v25  ;;  %v2161_v5 = vmul.f32 %v2121_v51, %v4981_v25 }
 0x5b8   : > { %v2177_v62 = vmul.f32 %v2081_v38, %v2081_v38 }
 0x5ba   : > { %v4183_v27 = vpop.eup %4182  ;;  %v2193_v2 = vsub.f32 %v2161_v5, %v2177_v62  ;;  %v2209_v5 = vsub.f32 %v5420_v23, %v2081_v38 }
 0x5bb   : > { %v2259_v40 = vmul.f32 %v4183_v27, %v2224_v16  ;;  %vm2265_vm4 = vweird.f32 %v4183_v27 }
 0x5bc   : > { %v2225_v46 = vadd.f32 1e-05, %v2193_v2  ;;  %vm2266_vm7 = vmor %vm2264_vm6, %vm2265_vm4 }
 0x5bd   : > { %v2260_v35 = vmul.f32 %v4183_v27, %v2259_v40  ;;  %v2044_v30 = vpop.xlane.xlu2 %2043  ;;  %v2124_v55 = vpop.xlane.xlu0 %2123 }
 0x5be   : > { %4184 = vrsqrt.f32 %v2225_v46  ;;  %v5590_v22 = vmul.f32 %v2044_v30, %v4981_v25  ;;  %v2162_v47 = vmul.f32 %v2124_v55, %v4981_v25  ;;  %vm2274_vm9 = vweird.f32 %v2225_v46 }
 0x5bf   : > { %v2261_v29 = vmul.f32 0.5, %v2260_v35 }
 0x5c0   : > { %v2178_v3 = vmul.f32 %v5590_v22, %v5590_v22 }
 0x5c1   : > { %v2262_v53 = vsub.f32 1.5, %v2261_v29 }
 0x5c2   : > { %v2194_v56 = vsub.f32 %v2162_v47, %v2178_v3 }
 0x5c3   : > { %v2263_v41 = vmul.f32 %v4183_v27, %v2262_v53 }
 0x5c4   : > { %v4185_v54 = vpop.eup %4184  ;;  %v2226_v7 = vadd.f32 1e-05, %v2194_v56 }
 0x5c5   : > { %v2269_v28 = vmul.f32 %v4185_v54, %v2225_v46  ;;  %v2130_v20 = vpop.xlane.xlu2 %2129  ;;  %v2127_v45 = vpop.xlane.xlu1 %2126  ;;  %v2267_v26 = vsel %vm2266_vm7, %v4183_v27, %v2263_v41  ;;  %vm2275_vm8 = vweird.f32 %v4185_v54 }
 0x5c6   : > { %4186 = vrsqrt.f32 %v2226_v7  ;;  %v2047_v59 = vpop.xlane.xlu0 %2046  ;;  %v2400_v12 = vmul.f32 %v2267_v26, %v2208_v0  ;;  %v2163_v58 = vmul.f32 %v2127_v45, %v4981_v25  ;;  %vm2276_vm10 = vmor %vm2274_vm9, %vm2275_vm8  ;;  %v2164_v55 = vmul.f32 %v2130_v20, %v4981_v25 }
 0x5c7   : > { %v2270_v8 = vmul.f32 %v4185_v54, %v2269_v28  ;;  %v5597_v44 = vmul.f32 %v2047_v59, %v4981_v25  ;;  %vm2284_vm12 = vweird.f32 %v2226_v7 }
 0x5c8   : > { %v2419_v49 = vmul.f32 %v5546_v37, %v2400_v12 }
 0x5c9   : > { %v2271_v32 = vmul.f32 0.5, %v2270_v8  ;;  %v2179_v14 = vmul.f32 %v5597_v44, %v5597_v44 }
 0x5ca   : > { %v5604_v63 = vadd.f32 %v5556_v39, %v2419_v49 }
 0x5cb   : > { %v2272_v34 = vsub.f32 1.5, %v2271_v32  ;;  %v2195_v33 = vsub.f32 %v2163_v58, %v2179_v14  ;;  %v2210_v58 = vsub.f32 %v5430_v1, %v5590_v22 }
 0x5cc   : > { %v4187_v36 = vpop.eup %4186  ;;  %v2458_v40 = vmul.f32 %v5570_v50, %v5604_v63 }
 0x5cd   : > { %v2273_v43 = vmul.f32 %v4185_v54, %v2272_v34  ;;  %v2279_v24 = vmul.f32 %v4187_v36, %v2226_v7  ;;  %v5606_v16 = vadd.f32 1e-05, %v2195_v33  ;;  %v2053_v51 = vpop.xlane.xlu2 %2052  ;;  %v2050_v4 = vpop.xlane.xlu1 %2049  ;;  %vm2285_vm11 = vweird.f32 %v4187_v36 }
 0x5ce   : > { %v5610_v62 = vmul.f32 %v2053_v51, %v4981_v25  ;;  %v5613_v27 = vmul.f32 %v2050_v4, %v4981_v25  ;;  %v2133_v2 = vpop.xlane.xlu0 %2132  ;;  %v2478_v47 = vsel %vm728_vm3, %v2458_v40, 0.0  ;;  %vm2286_vm13 = vmor %vm2284_vm12, %vm2285_vm11 }
 0x5cf   : > { %v2277_v35 = vsel %vm2276_vm10, %v4185_v54, %v2273_v43  ;;  %v2280_v46 = vmul.f32 %v4187_v36, %v2279_v24  ;;  %4188 = vrsqrt.f32 %v5606_v16  ;;  %v2165_v3 = vmul.f32 %v2133_v2, %v4981_v25  ;;  %2479 = vadd.xlane.f32.xlu2 %v2478_v47 }
 0x5d0   : > { %v2401_v30 = vmul.f32 %v2277_v35, %v2209_v5  ;;  %v2181_v23 = vmul.f32 %v5610_v62, %v5610_v62  ;;  %v2180_v38 = vmul.f32 %v5613_v27, %v5613_v27  ;;  %vm2294_vm15 = vweird.f32 %v5606_v16 }
 0x5d1   : > { %v2281_v29 = vmul.f32 0.5, %v2280_v46 }
 0x5d2   : > { %v2196_v53 = vsub.f32 %v2164_v55, %v2180_v38  ;;  %v2420_v56 = vmul.f32 %v5546_v37, %v2401_v30  ;;  %v2197_v54 = vsub.f32 %v2165_v3, %v2181_v23  ;;  %v2211_v3 = vsub.f32 %v5442_v42, %v5597_v44 }
 0x5d3   : > { %v2282_v41 = vsub.f32 1.5, %v2281_v29 }
 0x5d4   : > { %v5626_v0 = vadd.f32 1e-05, %v2196_v53  ;;  %v5629_v28 = vadd.f32 %v5556_v39, %v2420_v56  ;;  %v5631_v26 = vadd.f32 1e-05, %v2197_v54 }
 0x5d5   : > { %v4189_v20 = vpop.eup %4188  ;;  %v2283_v45 = vmul.f32 %v4187_v36, %v2282_v41  ;;  %v2139_v59 = vpop.xlane.xlu2 %2138 }
 0x5d6   : > { %v2136_v8 = vpop.xlane.xlu1 %2135  ;;  %v2289_v12 = vmul.f32 %v4189_v20, %v5606_v16  ;;  %4190 = vrsqrt.f32 %v5626_v0  ;;  %v2056_v32 = vpop.xlane.xlu0 %2055  ;;  %v2459_v34 = vmul.f32 %v5570_v50, %v5629_v28  ;;  %vm2295_vm14 = vweird.f32 %v4189_v20 }
 0x5d7   : > { %4192 = vrsqrt.f32 %v5631_v26  ;;  %v5639_v49 = vmul.f32 %v2056_v32, %v4981_v25  ;;  %v2287_v33 = vsel %vm2286_vm13, %v4187_v36, %v2283_v45  ;;  %v2166_v24 = vmul.f32 %v2136_v8, %v4981_v25  ;;  %vm2296_vm0 = vmor %vm2294_vm15, %vm2295_vm14 }
 0x5d8   : > { %v2290_v14 = vmul.f32 %v4189_v20, %v2289_v12  ;;  %v2402_v7 = vmul.f32 %v2287_v33, %v2210_v58  ;;  %v2481_v1 = vsel %vm728_vm3, %v2459_v34, 0.0  ;;  %v2167_v12 = vmul.f32 %v2139_v59, %v4981_v25 }
 0x5d9   : > { %v2182_v51 = vmul.f32 %v5639_v49, %v5639_v49  ;;  %2482 = vadd.xlane.f32.xlu0 %v2481_v1  ;;  %vm2304_vm2 = vweird.f32 %v5626_v0  ;;  %vm2314_vm7 = vweird.f32 %v5631_v26 }
 0x5da   : > { %v2291_v43 = vmul.f32 0.5, %v2290_v14  ;;  %v2421_v22 = vmul.f32 %v5546_v37, %v2402_v7 }
 0x5db   : > { %v2198_v2 = vsub.f32 %v2166_v24, %v2182_v51  ;;  %v2212_v24 = vsub.f32 %v5435_v48, %v5613_v27 }
 0x5dc   : > { %v4191_v4 = vpop.eup %4190  ;;  %v2292_v5 = vsub.f32 1.5, %v2291_v43  ;;  %v5657_v29 = vadd.f32 %v5556_v39, %v2421_v22 }
 0x5dd   : > { %v5648_v40 = vpop.eup %4192  ;;  %v2299_v36 = vmul.f32 %v4191_v4, %v5626_v0  ;;  %v2062_v35 = vpop.xlane.xlu2 %2061  ;;  %v5654_v23 = vadd.f32 1e-05, %v2198_v2  ;;  %vm2305_vm1 = vweird.f32 %v4191_v4 }
 0x5de   : > { %v2059_v46 = vpop.xlane.xlu1 %2058  ;;  %v2293_v30 = vmul.f32 %v4189_v20, %v2292_v5  ;;  %v2309_v55 = vmul.f32 %v5648_v40, %v5631_v26  ;;  %v2142_v38 = vpop.xlane.xlu0 %2141  ;;  %v5662_v16 = vmul.f32 %v2062_v35, %v4981_v25  ;;  %vm2306_vm4 = vmor %vm2304_vm2, %vm2305_vm1  ;;  %vm2315_vm6 = vweird.f32 %v5648_v40 }
 0x5df   : > { %v2300_v47 = vmul.f32 %v4191_v4, %v2299_v36  ;;  %v5665_v53 = vmul.f32 %v2059_v46, %v4981_v25  ;;  %4194 = vrsqrt.f32 %v5654_v23  ;;  %v2168_v42 = vmul.f32 %v2142_v38, %v4981_v25  ;;  %vm2316_vm8 = vmor %vm2314_vm7, %vm2315_vm6 }
 0x5e0   : > { %v2297_v56 = vsel %vm2296_vm0, %v4189_v20, %v2293_v30  ;;  %v2310_v41 = vmul.f32 %v5648_v40, %v2309_v55  ;;  %v2184_v8 = vmul.f32 %v5662_v16, %v5662_v16  ;;  %v2460_v20 = vmul.f32 %v5570_v50, %v5657_v29 }
 0x5e1   : > { %v2403_v54 = vmul.f32 %v2297_v56, %v2211_v3  ;;  %v2301_v45 = vmul.f32 0.5, %v2300_v47  ;;  %v2183_v32 = vmul.f32 %v5665_v53, %v5665_v53  ;;  %v2213_v30 = vsub.f32 %v5452_v52, %v5610_v62 }
 0x5e2   : > { %v2311_v44 = vmul.f32 0.5, %v2310_v41  ;;  %v2200_v14 = vsub.f32 %v2168_v42, %v2184_v8  ;;  %v2484_v43 = vsel %vm728_vm3, %v2460_v20, 0.0  ;;  %v541_v56 = vshrl.u32 %v536_v13, 7 }
 0x5e3   : > { %v2302_v58 = vsub.f32 1.5, %v2301_v45  ;;  %v2422_v34 = vmul.f32 %v5546_v37, %v2403_v54  ;;  %v2199_v7 = vsub.f32 %v2167_v12, %v2183_v32  ;;  %2485 = vadd.xlane.f32.xlu1 %v2484_v43  ;;  %vm2324_vm9 = vweird.f32 %v5654_v23 }
 0x5e4   : > { %v2312_v33 = vsub.f32 1.5, %v2311_v44  ;;  %v5682_v59 = vadd.f32 1e-05, %v2200_v14  ;;  %4066 = vset.pattern.permute.xlu1 %v541_v56  ;;  %v5712_v8 = vadd.s32 8, %v541_v56 }
 0x5e5   : > { %v2303_v51 = vmul.f32 %v4191_v4, %v2302_v58  ;;  %v2071_v1 = vpop.xlane.xlu2 %2070  ;;  %v4195_v5 = vpop.eup %4194  ;;  %v5686_v36 = vadd.f32 1e-05, %v2199_v7  ;;  %v5689_v46 = vadd.f32 %v5556_v39, %v2422_v34 }
 0x5e6   : > { %v2145_v22 = vpop.xlane.xlu1 %2144  ;;  %v2313_v2 = vmul.f32 %v5648_v40, %v2312_v33  ;;  %v2065_v35 = vpop.xlane.xlu0 %2064  ;;  %v2319_v27 = vmul.f32 %v4195_v5, %v5654_v23  ;;  %4196 = vrsqrt.f32 %v5682_v59  ;;  %v5698_v38 = vmul.f32 %v2071_v1, %v4981_v25  ;;  %4067 = vset.pattern.permute.xlu2 %v5712_v8 }
 0x5e7   : > { %v2307_v48 = vsel %vm2306_vm4, %v4191_v4, %v2303_v51  ;;  %4198 = vrsqrt.f32 %v5686_v36  ;;  %v5701_v3 = vmul.f32 %v2065_v35, %v4981_v25  ;;  %v2461_v4 = vmul.f32 %v5570_v50, %v5689_v46 }
 0x5e8   : > { %v2404_v0 = vmul.f32 %v2307_v48, %v2212_v24  ;;  %v2320_v55 = vmul.f32 %v4195_v5, %v2319_v27  ;;  %v2317_v26 = vsel %vm2316_vm8, %v5648_v40, %v2313_v2  ;;  %v2169_v52 = vmul.f32 %v2145_v22, %v4981_v25 }
 0x5e9   : > { %v2185_v62 = vmul.f32 %v5701_v3, %v5701_v3  ;;  %v2405_v54 = vmul.f32 %v2317_v26, %v2213_v30  ;;  %v2487_v45 = vsel %vm728_vm3, %v2461_v4, 0.0  ;;  %vm2325_vm10 = vweird.f32 %v4195_v5 }
 0x5ea   : > { %v2423_v47 = vmul.f32 %v5546_v37, %v2404_v0  ;;  %v2321_v41 = vmul.f32 0.5, %v2320_v55  ;;  %2488 = vadd.xlane.f32.xlu2 %v2487_v45  ;;  %v2187_v58 = vmul.f32 %v5698_v38, %v5698_v38  ;;  %v2214_v1 = vsub.f32 %v5467_v10, %v5639_v49  ;;  %vm2326_vm11 = vmor %vm2324_vm9, %vm2325_vm10 }
 0x5eb   : > { %v2201_v40 = vsub.f32 %v2169_v52, %v2185_v62  ;;  %v2424_v51 = vmul.f32 %v5546_v37, %v2405_v54  ;;  %v2215_v48 = vsub.f32 %v5470_v6, %v5665_v53  ;;  %vm2344_vm12 = vweird.f32 %v5682_v59 }
 0x5ec   : > { %v5714_v42 = vpop.eup %4196  ;;  %v2322_v44 = vsub.f32 1.5, %v2321_v41  ;;  %v5723_v33 = vadd.f32 %v5556_v39, %v2423_v47  ;;  %vm2334_vm15 = vweird.f32 %v5686_v36 }
 0x5ed   : > { %v2151_v13 = vpop.xlane.xlu2 %2150  ;;  %v4199_v32 = vpop.eup %4198  ;;  %v2339_v20 = vmul.f32 %v5714_v42, %v5682_v59  ;;  %v5727_v24 = vadd.f32 1e-05, %v2201_v40  ;;  %vm2345_vm14 = vweird.f32 %v5714_v42 }
 0x5ee   : > { %v2068_v12 = vpop.xlane.xlu1 %2067  ;;  %v2171_v14 = vmul.f32 %v2151_v13, %v4981_v25  ;;  %v2074_v34 = vpop.xlane.xlu0 %2073  ;;  %v2323_v7 = vmul.f32 %v4195_v5, %v2322_v44  ;;  %v2329_v43 = vmul.f32 %v4199_v32, %v5686_v36  ;;  %v2462_v23 = vmul.f32 %v5570_v50, %v5723_v33  ;;  %vm5768_vm0 = vmor %vm2344_vm12, %vm2345_vm14 }
 0x5ef   : > { %v2340_v22 = vmul.f32 %v5714_v42, %v2339_v20  ;;  %4200 = vrsqrt.f32 %v5727_v24  ;;  %v5742_v10 = vmul.f32 %v2074_v34, %v4981_v25  ;;  %vm2335_vm13 = vweird.f32 %v4199_v32 }
 0x5f0   : > { %v2203_v2 = vsub.f32 %v2171_v14, %v2187_v58  ;;  %v2327_v35 = vsel %vm2326_vm11, %v4195_v5, %v2323_v7  ;;  %v2330_v27 = vmul.f32 %v4199_v32, %v2329_v43  ;;  %v5748_v5 = vadd.f32 %v5556_v39, %v2424_v51  ;;  %vm2336_vm1 = vmor %vm2334_vm15, %vm2335_vm13 }
 0x5f1   : > { %v2406_v0 = vmul.f32 %v2327_v35, %v2214_v1  ;;  %v2341_v30 = vmul.f32 0.5, %v2340_v22  ;;  %v2188_v4 = vmul.f32 %v5742_v10, %v5742_v10  ;;  %v2490_v47 = vsel %vm728_vm3, %v2462_v23, 0.0 }
 0x5f2   : > { %v5739_v55 = vadd.f32 1e-05, %v2203_v2  ;;  %v2331_v49 = vmul.f32 0.5, %v2330_v27  ;;  %v2463_v26 = vmul.f32 %v5570_v50, %v5748_v5  ;;  %2491 = vadd.xlane.f32.xlu0 %v2490_v47  ;;  %v5773_v58 = vmul.f32 %v2068_v12, %v4981_v25 }
 0x5f3   : > { %v2342_v6 = vsub.f32 1.5, %v2341_v30  ;;  %v2425_v44 = vmul.f32 %v5546_v37, %v2406_v0  ;;  %v2216_v43 = vsub.f32 %v5494_v15, %v5662_v16  ;;  %vm2354_vm4 = vweird.f32 %v5727_v24 }
 0x5f4   : > { %4202 = vrsqrt.f32 %v5739_v55  ;;  %v2332_v53 = vsub.f32 1.5, %v2331_v49  ;;  %v2493_v14 = vsel %vm728_vm3, %v2463_v26, 0.0  ;;  %vm2374_vm8 = vweird.f32 %v5739_v55 }
 0x5f5   : > { %v2154_v56 = vpop.xlane.xlu2 %2153  ;;  %v2343_v52 = vmul.f32 %v5714_v42, %v2342_v6  ;;  %v4201_v40 = vpop.eup %4200  ;;  %2494 = vadd.xlane.f32.xlu1 %v2493_v14  ;;  %v5784_v12 = vadd.f32 %v5556_v39, %v2425_v44  ;;  %v2217_v44 = vsub.f32 %v5503_v21, %v5701_v3 }
 0x5f6   : > { %v2077_v41 = vpop.xlane.xlu1 %2076  ;;  %v2172_v62 = vmul.f32 %v2154_v56, %v4981_v25  ;;  %v2157_v45 = vpop.xlane.xlu0 %2156  ;;  %v2333_v13 = vmul.f32 %v4199_v32, %v2332_v53  ;;  %v2349_v34 = vmul.f32 %v4201_v40, %v5727_v24  ;;  %vm2355_vm2 = vweird.f32 %v4201_v40 }
 0x5f7   : > { %v5760_v54 = vmul.f32 %v2077_v41, %v4981_v25  ;;  %v2173_v59 = vmul.f32 %v2157_v45, %v4981_v25  ;;  %v2347_v1 = vsel %vm5768_vm0, %v5714_v42, %v2343_v52  ;;  %v2464_v49 = vmul.f32 %v5570_v50, %v5784_v12  ;;  %vm2356_vm6 = vmor %vm2354_vm4, %vm2355_vm2 }
 0x5f8   : > { %v2204_v7 = vsub.f32 %v2172_v62, %v2188_v4  ;;  %v2337_v51 = vsel %vm2336_vm1, %v4199_v32, %v2333_v13  ;;  %v2350_v35 = vmul.f32 %v4201_v40, %v2349_v34  ;;  %v2408_v15 = vmul.f32 %v2347_v1, %v2216_v43 }
 0x5f9   : > { %v2189_v36 = vmul.f32 %v5760_v54, %v5760_v54  ;;  %v2407_v2 = vmul.f32 %v2337_v51, %v2215_v48  ;;  %v2186_v32 = vmul.f32 %v5773_v58, %v5773_v58  ;;  %v2496_v48 = vsel %vm728_vm3, %v2464_v49, 0.0 }
 0x5fa   : > { %v4203_v22 = vpop.eup %4202  ;;  %v5789_v27 = vadd.f32 1e-05, %v2204_v7  ;;  %v2351_v16 = vmul.f32 0.5, %v2350_v35  ;;  %v2427_v4 = vmul.f32 %v5546_v37, %v2408_v15  ;;  %2497 = vadd.xlane.f32.xlu2 %v2496_v48  ;;  %vm544_vm4 = vcmp.lt.s32.totalorder %v5712_v8, 11 }
 0x5fb   : > { %v2205_v0 = vsub.f32 %v2173_v59, %v2189_v36  ;;  %v2369_v30 = vmul.f32 %v4203_v22, %v5739_v55  ;;  %v2426_v53 = vmul.f32 %v5546_v37, %v2407_v2  ;;  %vm2375_vm7 = vweird.f32 %v4203_v22 }
 0x5fc   : > { %4204 = vrsqrt.f32 %v5789_v27  ;;  %v2352_v47 = vsub.f32 1.5, %v2351_v16  ;;  %v5808_v52 = vadd.f32 %v5556_v39, %v2427_v4  ;;  %v2219_v59 = vsub.f32 %v5512_v18, %v5698_v38  ;;  %vm2376_vm9 = vmor %vm2374_vm8, %vm2375_vm7 }
 0x5fd   : > { %v5797_v23 = vadd.f32 1e-05, %v2205_v0  ;;  %v2370_v42 = vmul.f32 %v4203_v22, %v2369_v30  ;;  %v5805_v41 = vadd.f32 %v5556_v39, %v2426_v53  ;;  %vm2384_vm11 = vweird.f32 %v5789_v27 }
 0x5fe   : > { %v2148_v6 = vpop.xlane.xlu1 %2147  ;;  %6758 = vst [vmem:[#allocation13_spill] sm:$0xff] %v5808_v52  ;;  %v2353_v62 = vmul.f32 %v4201_v40, %v2352_v47  ;;  %v2466_v14 = vmul.f32 %v5570_v50, %v5808_v52  ;;  %v2220_v53 = vsub.f32 %v5527_v57, %v5742_v10 }
 0x5ff   : > { %4206 = vrsqrt.f32 %v5797_v23  ;;  %v2170_v26 = vmul.f32 %v2148_v6, %v4981_v25  ;;  %v2371_v56 = vmul.f32 0.5, %v2370_v42  ;;  %6757 = vst [vmem:[#allocation12_spill] sm:$0xff] %v5805_v41  ;;  %v2465_v20 = vmul.f32 %v5570_v50, %v5805_v41 }
 0x600   : > { %v2357_v7 = vsel %vm2356_vm6, %v4201_v40, %v2353_v62  ;;  %v2502_v1 = vsel %vm728_vm3, %v2466_v14, 0.0  ;;  %vm2394_vm14 = vweird.f32 %v5797_v23 }
 0x601   : > { %v2202_v45 = vsub.f32 %v2170_v26, %v2186_v32  ;;  %v2372_v13 = vsub.f32 1.5, %v2371_v56  ;;  %v2409_v24 = vmul.f32 %v2357_v7, %v2217_v44  ;;  %v2499_v3 = vsel %vm728_vm3, %v2465_v20, 0.0  ;;  %2503 = vadd.xlane.f32.xlu1 %v2502_v1 }
 0x602   : > { %v4205_v34 = vpop.eup %4204  ;;  %2500 = vadd.xlane.f32.xlu0 %v2499_v3  ;;  %v2218_v7 = vsub.f32 %v5524_v11, %v5773_v58 }
 0x603   : > { %v2234_v36 = vadd.f32 1e-05, %v2202_v45  ;;  %v2373_v43 = vmul.f32 %v4203_v22, %v2372_v13  ;;  %v2379_v51 = vmul.f32 %v4205_v34, %v5789_v27  ;;  %v2428_v18 = vmul.f32 %v5546_v37, %v2409_v24 }
 0x604   : > { %vm2385_vm10 = vweird.f32 %v4205_v34 }
 0x605   : > { %v4207_v21 = vpop.eup %4206  ;;  %4208 = vrsqrt.f32 %v2234_v36  ;;  %v2380_v2 = vmul.f32 %v4205_v34, %v2379_v51  ;;  %v2377_v38 = vsel %vm2376_vm9, %v4203_v22, %v2373_v43  ;;  %v5826_v30 = vadd.f32 %v5556_v39, %v2428_v18  ;;  %vm2386_vm12 = vmor %vm2384_vm11, %vm2385_vm10 }
 0x606   : > { %v2389_v40 = vmul.f32 %v4207_v21, %v5797_v23  ;;  %v2411_v55 = vmul.f32 %v2377_v38, %v2219_v59  ;;  %vm2395_vm13 = vweird.f32 %v4207_v21  ;;  %vm2364_vm1 = vweird.f32 %v2234_v36 }
 0x607   : > { %v2381_v35 = vmul.f32 0.5, %v2380_v2  ;;  %6759 = vst [vmem:[#allocation14_spill] sm:$0xff] %v5826_v30  ;;  %v2467_v16 = vmul.f32 %v5570_v50, %v5826_v30  ;;  %vm2396_vm0 = vmor %vm2394_vm14, %vm2395_vm13  ;;  %v2221_v59 = vsub.f32 %v5541_v17, %v5760_v54  ;;  %v5873_v18 = vsel %vm544_vm4, 0.0, %v4408_v60 }
 0x608   : > { %v2390_v0 = vmul.f32 %v4207_v21, %v2389_v40  ;;  %v2430_v32 = vmul.f32 %v5546_v37, %v2411_v55 }
 0x609   : > { %v2382_v49 = vsub.f32 1.5, %v2381_v35  ;;  %v2505_v4 = vsel %vm728_vm3, %v2467_v16, 0.0 }
 0x60a   : > { %v2391_v15 = vmul.f32 0.5, %v2390_v0  ;;  %v5836_v47 = vadd.f32 %v5556_v39, %v2430_v32  ;;  %2506 = vadd.xlane.f32.xlu2 %v2505_v4 }
 0x60b   : > { %v4209_v42 = vpop.eup %4208  ;;  %v2383_v48 = vmul.f32 %v4205_v34, %v2382_v49 }
 0x60c   : > { %v2392_v6 = vsub.f32 1.5, %v2391_v15  ;;  %v2359_v22 = vmul.f32 %v4209_v42, %v2234_v36  ;;  %6760 = vst [vmem:[#allocation15_spill] sm:$0xff] %v5836_v47  ;;  %v2469_v62 = vmul.f32 %v5570_v50, %v5836_v47  ;;  %vm2365_vm15 = vweird.f32 %v4209_v42 }
 0x60d   : > { %v2387_v56 = vsel %vm2386_vm12, %v4205_v34, %v2383_v48  ;;  %vm2366_vm2 = vmor %vm2364_vm1, %vm2365_vm15 }
 0x60e   : > { %v2360_v26 = vmul.f32 %v4209_v42, %v2359_v22  ;;  %v2412_v45 = vmul.f32 %v2387_v56, %v2220_v53  ;;  %v2393_v44 = vmul.f32 %v4207_v21, %v2392_v6  ;;  %v2511_v13 = vsel %vm728_vm3, %v2469_v62, 0.0 }
 0x60f   : > { %2512 = vadd.xlane.f32.xlu1 %v2511_v13 }
 0x610   : > { %v2361_v27 = vmul.f32 0.5, %v2360_v26  ;;  %v2431_v57 = vmul.f32 %v5546_v37, %v2412_v45  ;;  %v2397_v34 = vsel %vm2396_vm0, %v4207_v21, %v2393_v44 }
 0x611   : > { %v2413_v3 = vmul.f32 %v2397_v34, %v2221_v59 }
 0x612   : > { %v2362_v10 = vsub.f32 1.5, %v2361_v27  ;;  %v5844_v20 = vadd.f32 %v5556_v39, %v2431_v57 }
 0x613   : > { %v2432_v11 = vmul.f32 %v5546_v37, %v2413_v3 }
 0x614   : > { %6761 = vst [vmem:[#allocation16_spill] sm:$0xff] %v5844_v20  ;;  %v2363_v14 = vmul.f32 %v4209_v42, %v2362_v10  ;;  %v2470_v23 = vmul.f32 %v5570_v50, %v5844_v20 }
 0x615   : > { %v5862_v58 = vadd.f32 %v5556_v39, %v2432_v11 }
 0x616   : > { %v2367_v24 = vsel %vm2366_vm2, %v4209_v42, %v2363_v14  ;;  %v2514_v43 = vsel %vm728_vm3, %v2470_v23, 0.0 }
 0x617   : > { %v2410_v51 = vmul.f32 %v2367_v24, %v2218_v7  ;;  %2515 = vadd.xlane.f32.xlu2 %v2514_v43  ;;  %6763 = vst [vmem:[#allocation18_spill] sm:$0xff] %v5862_v58  ;;  %v2471_v21 = vmul.f32 %v5570_v50, %v5862_v58 }
 0x619   : > { %v2429_v1 = vmul.f32 %v5546_v37, %v2410_v51  ;;  %v2517_v2 = vsel %vm728_vm3, %v2471_v21, 0.0  ;;  %v2477_v37 = vpop.xlane.xlu1 %2476 }
 0x61a   : > { %v5870_v40 = vmul.f32 0.125, %v2477_v37 }
 0x61b   : > { %v5855_v36 = vadd.f32 %v5556_v39, %v2429_v1  ;;  %v2474_v39 = vpop.xlane.xlu0 %2473 }
 0x61c   : > { %v2985_v38 = vadd.f32 %v5870_v40, %v5873_v18 }
 0x61d   : > { %6762 = vst [vmem:[#allocation17_spill] sm:$0xff] %v5855_v36  ;;  %v2468_v17 = vmul.f32 %v5570_v50, %v5855_v36  ;;  %v5877_v50 = vmul.f32 0.125, %v2474_v39 }
 0x61f   : > { %v2508_v54 = vsel %vm728_vm3, %v2468_v17, 0.0  ;;  %v3000_v35 = vmax.f32 %v5877_v50, %v2985_v38 }
 0x620   : > { %2509 = vadd.xlane.f32.xlu0 %v2508_v54 }
 0x621   : > { %v3001_v0 = vrot.slane %v3000_v35, 4 }
 0x623   : > { %v3002_v55 = vmax.f32 %v3000_v35, %v3001_v0 }
 0x625   : > { %v3003_v49 = vrot.slane %v3002_v55, 2 }
 0x628   : > { %2518 = vadd.xlane.f32.xlu0 %v2517_v2  ;;  %2541 = vperm.xlu1 %4066, %v4714_v61  }
 0x62f   : > { %2547 = vperm.xlu2 %4067, %v4714_v61   ;;  %v3004_v61 = vmax.f32 %v3002_v55, %v3003_v49 }
 0x631   : > { %v3005_v8 = vrot.slane %v3004_v61, 1 }
 0x633   : > { %v3006_v48 = vmax.f32 %v3004_v61, %v3005_v8 }
 0x635   : > { %v3056_v53 = vsub.f32 %v5877_v50, %v3006_v48  ;;  %v3057_v26 = vsub.f32 %v2985_v38, %v3006_v48 }
 0x637   : > { %v3072_v62 = vmul.f32 1.442695, %v3056_v53  ;;  %v3074_v44 = vmul.f32 1.442695, %v3057_v26 }
 0x639   : > { %4210 = vpow2.f32 %v3072_v62 }
 0x63a   : > { %4212 = vpow2.f32 %v3074_v44 }
 0x63f   : > { %v5895_v51 = vpop.eup %4210 }
 0x640   : > { %v5898_v1 = vpop.eup %4212 }
 0x641   : > { %v3104_v17 = vadd.f32 %v5898_v1, %v5895_v51 }
 0x642   : > { %v2480_v15 = vpop.xlane.xlu2 %2479 }
 0x643   : > { %v5882_v42 = vmul.f32 0.125, %v2480_v15  ;;  %v3105_v0 = vrot.slane %v3104_v17, 4 }
 0x64c   : > { %v2483_v16 = vpop.xlane.xlu0 %2482 }
 0x64d   : > { %v5880_v32 = vmul.f32 0.125, %v2483_v16 }
 0x64f   : > { %v2987_v60 = vadd.f32 %v5880_v32, %v5873_v18 }
 0x651   : > { %v3007_v6 = vmax.f32 %v5882_v42, %v2987_v60 }
 0x653   : > { %v3008_v22 = vrot.slane %v3007_v6, 4 }
 0x655   : > { %v3009_v4 = vmax.f32 %v3007_v6, %v3008_v22 }
 0x656   : > { %v2486_v57 = vpop.xlane.xlu1 %2485 }
 0x657   : > { %v3010_v56 = vrot.slane %v3009_v4, 2  ;;  %v5891_v24 = vmul.f32 0.125, %v2486_v57 }
 0x659   : > { %v3011_v45 = vmax.f32 %v3009_v4, %v3010_v56 }
 0x65b   : > { %v3012_v27 = vrot.slane %v3011_v45, 1 }
 0x65d   : > { %v3013_v13 = vmax.f32 %v3011_v45, %v3012_v27  ;;  %v2489_v10 = vpop.xlane.xlu2 %2488 }
 0x65e   : > { %v5889_v7 = vmul.f32 0.125, %v2489_v10 }
 0x65f   : > { %v3058_v14 = vsub.f32 %v5882_v42, %v3013_v13  ;;  %v3059_v34 = vsub.f32 %v2987_v60, %v3013_v13  ;;  %v3106_v60 = vadd.f32 %v3105_v0, %v3104_v17 }
 0x660   : > { %v2989_v43 = vadd.f32 %v5889_v7, %v5873_v18 }
 0x661   : > { %v3076_v59 = vmul.f32 1.442695, %v3058_v14  ;;  %v3078_v23 = vmul.f32 1.442695, %v3059_v34  ;;  %v3107_v56 = vrot.slane %v3106_v60, 2 }
 0x662   : > { %v3014_v3 = vmax.f32 %v5891_v24, %v2989_v43 }
 0x663   : > { %4214 = vpow2.f32 %v3076_v59  ;;  %v3108_v14 = vadd.f32 %v3107_v56, %v3106_v60 }
 0x664   : > { %4216 = vpow2.f32 %v3078_v23  ;;  %v3015_v11 = vrot.slane %v3014_v3, 4 }
 0x665   : > { %v2492_v39 = vpop.xlane.xlu0 %2491 }
 0x666   : > { %v3016_v54 = vmax.f32 %v3014_v3, %v3015_v11  ;;  %v5912_v15 = vmul.f32 0.125, %v2492_v39 }
 0x668   : > { %v3017_v2 = vrot.slane %v3016_v54, 2  ;;  %v2495_v37 = vpop.xlane.xlu1 %2494 }
 0x669   : > { %v5902_v21 = vpop.eup %4214  ;;  %v5906_v35 = vmul.f32 0.125, %v2495_v37  ;;  %v4410_v37 = vmov 0  }
 0x66a   : > { %v5904_v38 = vpop.eup %4216  ;;  %v3018_v49 = vmax.f32 %v3016_v54, %v3017_v2  ;;  %v3109_v54 = vrot.slane %v3108_v14, 1  ;;  %4069 = vset.pattern.permute.xlu2 %v4410_v37  ;;  %4068 = vset.pattern.permute.xlu0 %v4410_v37 }
 0x66b   : > { %v3111_v55 = vadd.f32 %v5904_v38, %v5902_v21  ;;  %v2991_v61 = vadd.f32 %v5906_v35, %v5873_v18  ;;  %4070 = vset.pattern.permute.xlu1 %v4410_v37 }
 0x66c   : > { %v3019_v16 = vrot.slane %v3018_v49, 1 }
 0x66d   : > { %v3021_v8 = vmax.f32 %v5912_v15, %v2991_v61  ;;  %v3112_v48 = vrot.slane %v3111_v55, 4  ;;  %v2498_v57 = vpop.xlane.xlu2 %2497 }
 0x66e   : > { %v3020_v6 = vmax.f32 %v3018_v49, %v3019_v16  ;;  %v5918_v11 = vmul.f32 0.125, %v2498_v57 }
 0x66f   : > { %v3022_v22 = vrot.slane %v3021_v8, 4  ;;  %v3113_v62 = vadd.f32 %v3112_v48, %v3111_v55 }
 0x670   : > { %v3060_v53 = vsub.f32 %v5891_v24, %v3020_v6  ;;  %v3061_v4 = vsub.f32 %v2989_v43, %v3020_v6 }
 0x671   : > { %v3023_v26 = vmax.f32 %v3021_v8, %v3022_v22  ;;  %v3114_v34 = vrot.slane %v3113_v62, 2 }
 0x672   : > { %v3080_v45 = vmul.f32 1.442695, %v3060_v53  ;;  %v3082_v44 = vmul.f32 1.442695, %v3061_v4  ;;  %v5930_v53 = vadd.f32 %v3109_v54, %v3108_v14 }
 0x673   : > { %v3024_v27 = vrot.slane %v3023_v26, 2  ;;  %v3115_v2 = vadd.f32 %v3114_v34, %v3113_v62 }
 0x674   : > { %4218 = vpow2.f32 %v3080_v45  ;;  %v2504_v48 = vpop.xlane.xlu1 %2503  ;;  %vm3165_vm7 = vweird.f32 %v5930_v53 }
 0x675   : > { %4220 = vpow2.f32 %v3082_v44  ;;  %v3025_v13 = vmax.f32 %v3023_v26, %v3024_v27  ;;  %v2501_v10 = vpop.xlane.xlu0 %2500  ;;  %v3116_v4 = vrot.slane %v3115_v2, 1 }
 0x676   : > { %v5916_v59 = vmul.f32 0.125, %v2501_v10 }
 0x677   : > { %v3026_v23 = vrot.slane %v3025_v13, 1 }
 0x678   : > { %v2993_v43 = vadd.f32 %v5916_v59, %v5873_v18 }
 0x679   : > { %v3027_v3 = vmax.f32 %v3025_v13, %v3026_v23  ;;  %v5939_v13 = vadd.f32 %v3116_v4, %v3115_v2 }
 0x67a   : > { %v5922_v17 = vpop.eup %4218  ;;  %v3028_v49 = vmax.f32 %v5918_v11, %v2993_v43 }
 0x67b   : > { %v5924_v39 = vpop.eup %4220  ;;  %v3062_v0 = vsub.f32 %v5912_v15, %v3027_v3  ;;  %v3063_v55 = vsub.f32 %v2991_v61, %v3027_v3  ;;  %v5934_v61 = vmul.f32 0.125, %v2504_v48  ;;  %vm3181_vm11 = vweird.f32 %v5939_v13 }
 0x67c   : > { %v3118_v16 = vadd.f32 %v5924_v39, %v5922_v17  ;;  %v3029_v6 = vrot.slane %v3028_v49, 4 }
 0x67d   : > { %v3084_v8 = vmul.f32 1.442695, %v3062_v0  ;;  %v3086_v60 = vmul.f32 1.442695, %v3063_v55  ;;  %v2507_v22 = vpop.xlane.xlu2 %2506 }
 0x67e   : > { %v3119_v26 = vrot.slane %v3118_v16, 4  ;;  %v5932_v56 = vmul.f32 0.125, %v2507_v22  ;;  %v3030_v62 = vmax.f32 %v3028_v49, %v3029_v6 }
 0x67f   : > { %4222 = vpow2.f32 %v3084_v8 }
 0x680   : > { %4224 = vpow2.f32 %v3086_v60  ;;  %v2995_v45 = vadd.f32 %v5932_v56, %v5873_v18  ;;  %v3120_v44 = vadd.f32 %v3119_v26, %v3118_v16  ;;  %v3031_v27 = vrot.slane %v3030_v62, 2 }
 0x681   : > { %4226 = vrcp.f32 %v5930_v53 }
 0x682   : > { %v3035_v57 = vmax.f32 %v5934_v61, %v2995_v45  ;;  %v3032_v10 = vmax.f32 %v3030_v62, %v3031_v27  ;;  %v3121_v23 = vrot.slane %v3120_v44, 2  ;;  %4228 = vrcp.f32 %v5939_v13  ;;  %v2513_v6 = vpop.xlane.xlu1 %2512 }
 0x684   : > { %v3036_v14 = vrot.slane %v3035_v57, 4  ;;  %v3033_v3 = vrot.slane %v3032_v10, 1  ;;  %v3122_v8 = vadd.f32 %v3121_v23, %v3120_v44 }
 0x685   : > { %v5942_v34 = vpop.eup %4222 }
 0x686   : > { %v5944_v54 = vpop.eup %4224  ;;  %v3037_v37 = vmax.f32 %v3035_v57, %v3036_v14  ;;  %v3034_v55 = vmax.f32 %v3032_v10, %v3033_v3  ;;  %v5958_v10 = vmul.f32 0.125, %v2513_v6  ;;  %v3123_v14 = vrot.slane %v3122_v8, 1 }
 0x687   : > { %v3125_v0 = vadd.f32 %v5944_v54, %v5942_v34  ;;  %v5951_v2 = vpop.eup %4226 }
 0x688   : > { %v3038_v16 = vrot.slane %v3037_v37, 2  ;;  %v3064_v48 = vsub.f32 %v5918_v11, %v3034_v55  ;;  %v3161_v22 = vmul.f32 %v5951_v2, %v5930_v53  ;;  %v3065_v26 = vsub.f32 %v2993_v43, %v3034_v55  ;;  %v5956_v62 = vpop.eup %4228 }
 0x689   : > { %v3126_v60 = vrot.slane %v3125_v0, 4  ;;  %v3177_v19 = vmul.f32 %v5956_v62, %v5939_v13  ;;  %vm3166_vm6 = vweird.f32 %v5951_v2  ;;  %vm3182_vm9 = vweird.f32 %v5956_v62 }
 0x68a   : > { %v5949_v49 = vpop.xlane.xlu2 %2515  ;;  %v3088_v27 = vmul.f32 1.442695, %v3064_v48  ;;  %v3039_v57 = vmax.f32 %v3037_v37, %v3038_v16  ;;  %v3090_v25 = vmul.f32 1.442695, %v3065_v26  ;;  %v3162_v23 = vsub.f32 1.0, %v3161_v22  ;;  %vm6015_vm10 = vmor %vm3165_vm7, %vm3166_vm6 }
 0x68b   : > { %v3127_v4 = vadd.f32 %v3126_v60, %v3125_v0  ;;  %v5966_v37 = vadd.f32 %v5958_v10, %v5873_v18  ;;  %v5974_v60 = vadd.f32 %v3123_v14, %v3122_v8  ;;  %v3169_v8 = vand.u32 2147483647, %v5930_v53  ;;  %vm6044_vm12 = vmor %vm3181_vm11, %vm3182_vm9 }
 0x68c   : > { %4230 = vpow2.f32 %v3088_v27  ;;  %v3040_v44 = vrot.slane %v3039_v57, 1  ;;  %v3163_v27 = vmul.f32 %v5951_v2, %v3162_v23 }
 0x68d   : > { %v3128_v3 = vrot.slane %v3127_v4, 2  ;;  %4232 = vpow2.f32 %v3090_v25  ;;  %vm6004_vm8 = vcmp.eq.f32.partialorder %v3169_v8, 8.507059e+37  ;;  %vm3197_vm14 = vweird.f32 %v5974_v60 }
 0x68e   : > { %v3041_v0 = vmax.f32 %v3039_v57, %v3040_v44  ;;  %4234 = vrcp.f32 %v5974_v60 }
 0x68f   : > { %v3129_v58 = vadd.f32 %v3128_v3, %v3127_v4  ;;  %v3178_v4 = vsub.f32 1.0, %v3177_v19 }
 0x690   : > { %v3066_v6 = vsub.f32 %v5934_v61, %v3041_v0  ;;  %v3067_v25 = vsub.f32 %v2995_v45, %v3041_v0  ;;  %v3171_v45 = vand.u32 2147483648, %v5930_v53 }
 0x691   : > { %v3130_v48 = vrot.slane %v3129_v58, 1  ;;  %v3179_v23 = vmul.f32 %v5956_v62, %v3178_v4 }
 0x692   : > { %v5962_v20 = vpop.permute.xlu2 %2547  ;;  %v5980_v26 = vpop.eup %4230  ;;  %v3092_v57 = vmul.f32 1.442695, %v3066_v6  ;;  %v3094_v3 = vmul.f32 1.442695, %v3067_v25  ;;  %v3164_v6 = vadd.f32 %v5951_v2, %v3163_v27  ;;  %v6021_v27 = vmul.f32 0.125, %v5949_v49 }
 0x693   : > { %v2510_v43 = vpop.xlane.xlu0 %2509  ;;  %v5972_v16 = vadd.f32 %v5962_v20, %v5870_v40  ;;  %v5983_v44 = vpop.eup %4232  ;;  %v5988_v14 = vadd.f32 %v3130_v48, %v3129_v58  ;;  %v5999_v58 = vadd.f32 %v5962_v20, %v5880_v32  ;;  %v3180_v53 = vadd.f32 %v5956_v62, %v3179_v23 }
 0x694   : > { %v5968_v55 = vmul.f32 0.125, %v2510_v43  ;;  %v3132_v19 = vadd.f32 %v5983_v44, %v5980_v26  ;;  %4236 = vpow2.f32 %v3092_v57  ;;  %v6011_v4 = vpop.eup %4234  ;;  %v3187_v49 = vand.u32 2147483648, %v5939_v13 }
 0x695   : > { %6764 = vst [vmem:[#allocation19_spill] sm:$0xff] %v5972_v16  ;;  %2587 = vperm.xlu2 %4069, %v5972_v16   ;;  %4238 = vpow2.f32 %v3094_v3  ;;  %v3184_v36 = vsel %vm6044_vm12, %v5956_v62, %v3180_v53  ;;  %vm3198_vm0 = vweird.f32 %v6011_v4  ;;  %vm3213_vm1 = vweird.f32 %v5988_v14 }
 0x696   : > { %v3042_v22 = vmax.f32 %v5968_v55, %v5966_v37  ;;  %v3133_v25 = vrot.slane %v3132_v19, 4  ;;  %6766 = vst [vmem:[#allocation21_spill] sm:$0xff] %v5999_v58  ;;  %4240 = vrcp.f32 %v5988_v14  ;;  %v3188_v47 = vor.u32 1.1754944e-38, %v3187_v49  ;;  %vm6145_vm2 = vmor %vm3197_vm14, %vm3198_vm0 }
 0x698   : > { %v3043_v40 = vrot.slane %v3042_v22, 4 }
 0x69a   : > { %v3044_v43 = vmax.f32 %v3042_v22, %v3043_v40  ;;  %v6002_v57 = vpop.permute.xlu1 %2541  ;;  %v3134_v22 = vadd.f32 %v3133_v25, %v3132_v19  ;;  %v6027_v8 = vpop.eup %4236  ;;  %v3168_v19 = vsel %vm6015_vm10, %v5951_v2, %v3164_v6 }
 0x69b   : > { %v2519_v0 = vpop.xlane.xlu0 %2518  ;;  %v6036_v23 = vpop.eup %4238 }
 0x69c   : > { %v5995_v16 = vmul.f32 0.125, %v2519_v0  ;;  %v3045_v48 = vrot.slane %v3044_v43, 2  ;;  %v3172_v0 = vor.u32 1.1754944e-38, %v3171_v45  ;;  %v3135_v25 = vrot.slane %v3134_v22, 2 }
 0x69d   : > { %2593 = vperm.xlu2 %4069, %v5999_v58   ;;  %v6034_v58 = vadd.f32 %v6002_v57, %v5882_v42  ;;  %v3185_v45 = vand.u32 2147483647, %v5939_v13  ;;  %v3139_v6 = vadd.f32 %v6036_v23, %v6027_v8  ;;  %v6061_v13 = vpop.eup %4240 }
 0x69e   : > { %6765 = vst [vmem:[#allocation20_spill] sm:$0xff] %v5995_v16  ;;  %v3046_v3 = vmax.f32 %v3044_v43, %v3045_v48  ;;  %v6025_v40 = vadd.f32 %v5995_v16, %v5873_v18  ;;  %v3136_v42 = vadd.f32 %v3135_v25, %v3134_v22  ;;  %v6054_v48 = vadd.f32 %v6002_v57, %v5877_v50 }
 0x69f   : > { %6771 = vst [vmem:[#allocation22_spill] sm:$0xff] %v6034_v58  ;;  %2590 = vperm.xlu1 %4070, %v6034_v58   ;;  %v3173_v32 = vsel %vm6004_vm8, %v3172_v0, %v3168_v19  ;;  %v3193_v22 = vmul.f32 %v6011_v4, %v5974_v60  ;;  %v3140_v58 = vrot.slane %v3139_v6, 4  ;;  %v6068_v50 = vadd.f32 %v5962_v20, %v5889_v7 }
 0x6a0   : > { %v3047_v18 = vrot.slane %v3046_v3, 1  ;;  %v3049_v43 = vmax.f32 %v6021_v27, %v6025_v40  ;;  %6774 = vst [vmem:[#allocation23_spill] sm:$0xff] %v6054_v48  ;;  %v3137_v25 = vrot.slane %v3136_v42, 1  ;;  %2584 = vperm.xlu0 %4068, %v6054_v48   ;;  %vm3186_vm13 = vcmp.eq.f32.partialorder %v3185_v45, 8.507059e+37 }
 0x6a1   : > { %v3141_v0 = vadd.f32 %v3140_v58, %v3139_v6  ;;  %v3189_v2 = vsel %vm3186_vm13, %v3188_v47, %v3184_v36  ;;  %v3209_v48 = vmul.f32 %v6061_v13, %v5988_v14  ;;  %v3194_v49 = vsub.f32 1.0, %v3193_v22 }
 0x6a2   : > { %v3048_v16 = vmax.f32 %v3046_v3, %v3047_v18  ;;  %v3050_v30 = vrot.slane %v3049_v43, 4  ;;  %v6072_v3 = vadd.f32 %v3137_v25, %v3136_v42  ;;  %v3174_v18 = vmul.f32 %v5895_v51, %v3173_v32 }
 0x6a3   : > { %v3190_v58 = vmul.f32 %v5902_v21, %v3189_v2  ;;  %v3191_v36 = vmul.f32 %v5904_v38, %v3189_v2  ;;  %v6089_v51 = vadd.f32 %v5962_v20, %v5906_v35  ;;  %v3210_v45 = vsub.f32 1.0, %v3209_v48 }
 0x6a4   : > { %v3068_v19 = vsub.f32 %v5968_v55, %v3048_v16  ;;  %v3069_v62 = vsub.f32 %v5966_v37, %v3048_v16  ;;  %v3051_v53 = vmax.f32 %v3049_v43, %v3050_v30  ;;  %4242 = vrcp.f32 %v6072_v3 }
 0x6a5   : > { %2599 = vperm.xlu2 %4069, %v6068_v50   ;;  %v6081_v30 = vadd.f32 %v6002_v57, %v5891_v24  ;;  %v3175_v37 = vmul.f32 %v5898_v1, %v3173_v32  ;;  %v3142_v16 = vrot.slane %v3141_v0, 2  ;;  %v3201_v43 = vand.u32 2147483647, %v5974_v60 }
 0x6a6   : > { %v3096_v7 = vmul.f32 1.442695, %v3068_v19  ;;  %v3098_v52 = vmul.f32 1.442695, %v3069_v62  ;;  %v3052_v41 = vrot.slane %v3051_v53, 2  ;;  %v3195_v24 = vmul.f32 %v6011_v4, %v3194_v49 }
 0x6a7   : > { %2596 = vperm.xlu1 %4070, %v6081_v30   ;;  %v3143_v42 = vadd.f32 %v3142_v16, %v3141_v0  ;;  %v6095_v21 = vmul.f32 %v3174_v18, %v5565_v9  ;;  %v3203_v38 = vand.u32 2147483648, %v5974_v60  ;;  %v6100_v35 = vadd.f32 %v6002_v57, %v5918_v11 }
 0x6a8   : > { %4244 = vpow2.f32 %v3096_v7  ;;  %v3053_v1 = vmax.f32 %v3051_v53, %v3052_v41  ;;  %2605 = vperm.xlu0 %4068, %v6089_v51   ;;  %v6103_v32 = vmul.f32 %v3175_v37, %v5579_v31  ;;  %v6109_v41 = vmul.f32 %v3191_v36, %v5629_v28 }
 0x6a9   : > { %4246 = vpow2.f32 %v3098_v52  ;;  %v3144_v6 = vrot.slane %v3143_v42, 1  ;;  %v3290_v52 = vmul.f32 %v3190_v58, %v5604_v63  ;;  %vm6112_vm15 = vcmp.eq.f32.partialorder %v3201_v43, 8.507059e+37 }
 0x6aa   : > { %v6105_v48 = vpop.eup %4242  ;;  %v3054_v9 = vrot.slane %v3053_v1, 1  ;;  %v3211_v11 = vmul.f32 %v6061_v13, %v3210_v45  ;;  %v3196_v28 = vadd.f32 %v6011_v4, %v3195_v24  ;;  %v6128_v19 = vadd.f32 %v6002_v57, %v5912_v15 }
 0x6ab   : > { %v3225_v31 = vmul.f32 %v6105_v48, %v6072_v3  ;;  %v6119_v25 = vadd.f32 %v3144_v6, %v3143_v42  ;;  %v3204_v53 = vor.u32 1.1754944e-38, %v3203_v38  ;;  %v3219_v18 = vand.u32 2147483648, %v5988_v14 }
 0x6ac   : > { %v3055_v47 = vmax.f32 %v3053_v1, %v3054_v9  ;;  %v6140_v49 = vadd.f32 %v6002_v57, %v5934_v61  ;;  %v3212_v37 = vadd.f32 %v6061_v13, %v3211_v11  ;;  %vm3214_vm4 = vweird.f32 %v6061_v13 }
 0x6ad   : > { %2608 = vperm.xlu2 %4069, %v6100_v35   ;;  %v3226_v0 = vsub.f32 1.0, %v3225_v31  ;;  %4248 = vrcp.f32 %v6119_v25  ;;  %v3200_v61 = vsel %vm6145_vm2, %v6011_v4, %v3196_v28  ;;  %v3217_v36 = vand.u32 2147483647, %v5988_v14  ;;  %vm6166_vm7 = vmor %vm3213_vm1, %vm3214_vm4 }
 0x6ae   : > { %v6122_v63 = vpop.eup %4244  ;;  %v3070_v7 = vsub.f32 %v6021_v27, %v3055_v47  ;;  %v3071_v58 = vsub.f32 %v6025_v40, %v3055_v47  ;;  %vm3230_vm6 = vweird.f32 %v6105_v48  ;;  %v6162_v24 = vadd.f32 %v5962_v20, %v5932_v56 }
 0x6af   : > { %v6130_v62 = vpop.eup %4246  ;;  %2602 = vperm.xlu1 %4070, %v6128_v19   ;;  %v3227_v16 = vmul.f32 %v6105_v48, %v3226_v0  ;;  %v3220_v4 = vor.u32 1.1754944e-38, %v3219_v18  ;;  %v3235_v1 = vand.u32 2147483648, %v6072_v3  ;;  %v3216_v9 = vsel %vm6166_vm7, %v6061_v13, %v3212_v37 }
 0x6b0   : > { %v3146_v2 = vadd.f32 %v6130_v62, %v6122_v63  ;;  %v3100_v60 = vmul.f32 1.442695, %v3070_v7  ;;  %2614 = vperm.xlu0 %4068, %v6140_v49   ;;  %v3102_v42 = vmul.f32 1.442695, %v3071_v58  ;;  %vm3229_vm8 = vweird.f32 %v6072_v3 }
 0x6b1   : > { %v3228_v45 = vadd.f32 %v6105_v48, %v3227_v16  ;;  %v3233_v56 = vand.u32 2147483647, %v6072_v3  ;;  %v3205_v14 = vsel %vm6112_vm15, %v3204_v53, %v3200_v61  ;;  %vm6181_vm9 = vmor %vm3229_vm8, %vm3230_vm6  ;;  %v6188_v13 = vadd.f32 %v5962_v20, %v5916_v59 }
 0x6b2   : > { %v3147_v43 = vrot.slane %v3146_v2, 4  ;;  %4250 = vpow2.f32 %v3100_v60  ;;  %v3313_v3 = vsel %vm728_vm3, %v3290_v52, 0.0  ;;  %vm3218_vm10 = vcmp.eq.f32.partialorder %v3217_v36, 8.507059e+37 }
 0x6b3   : > { %v4249_v6 = vpop.eup %4248  ;;  %4252 = vpow2.f32 %v3102_v42  ;;  %v3232_v22 = vsel %vm6181_vm9, %v6105_v48, %v3228_v45  ;;  %v6196_v47 = vadd.f32 %v5962_v20, %v5958_v10  ;;  %v3221_v53 = vsel %vm3218_vm10, %v3220_v4, %v3216_v9 }
 0x6b4   : > { %v3148_v38 = vadd.f32 %v3147_v43, %v3146_v2  ;;  %v3241_v31 = vmul.f32 %v4249_v6, %v6119_v25  ;;  %v3236_v0 = vor.u32 1.1754944e-38, %v3235_v1  ;;  %v3206_v59 = vmul.f32 %v5922_v17, %v3205_v14 }
 0x6b5   : > { %2617 = vperm.xlu2 %4069, %v6162_v24   ;;  %vm3234_vm11 = vcmp.eq.f32.partialorder %v3233_v56, 8.507059e+37  ;;  %v3249_v52 = vand.u32 2147483647, %v6119_v25  ;;  %v3251_v7 = vand.u32 2147483648, %v6119_v25  ;;  %vm3246_vm12 = vweird.f32 %v4249_v6 }
 0x6b6   : > { %v3149_v28 = vrot.slane %v3148_v38, 2  ;;  %v3242_v18 = vsub.f32 1.0, %v3241_v31  ;;  %v3237_v48 = vsel %vm3234_vm11, %v3236_v0, %v3232_v22  ;;  %v3207_v58 = vmul.f32 %v5924_v39, %v3205_v14  ;;  %v6784_v31 = vld [vmem:[#allocation13_spill] sm:$0xff]  ;;  %v6785_v22 = vld [vmem:[#allocation14_spill] sm:$0xff] }
 0x6b7   : > { %2611 = vperm.xlu1 %4070, %v6188_v13   ;;  %v3222_v61 = vmul.f32 %v5942_v34, %v3221_v53  ;;  %v3223_v17 = vmul.f32 %v5944_v54, %v3221_v53  ;;  %v6212_v36 = vadd.f32 %v6002_v57, %v6021_v27  ;;  %vm3245_vm13 = vweird.f32 %v6119_v25 }
 0x6b8   : > { %v3150_v2 = vadd.f32 %v3149_v28, %v3148_v38  ;;  %v6202_v15 = vpop.eup %4250  ;;  %v3243_v37 = vmul.f32 %v4249_v6, %v3242_v18  ;;  %2623 = vperm.xlu0 %4068, %v6196_v47   ;;  %v3314_v42 = vsel %vm728_vm3, %v6109_v41, 0.0  ;;  %v3238_v39 = vmul.f32 %v5980_v26, %v3237_v48  ;;  %vm3247_vm14 = vmor %vm3245_vm13, %vm3246_vm12 }
 0x6b9   : > { %v6205_v16 = vpop.eup %4252  ;;  %v3239_v34 = vmul.f32 %v5983_v44, %v3237_v48  ;;  %v3252_v54 = vor.u32 1.1754944e-38, %v3251_v7  ;;  %vm3250_vm15 = vcmp.eq.f32.partialorder %v3249_v52, 8.507059e+37  ;;  %v6228_v25 = vadd.f32 %v6002_v57, %v5968_v55  ;;  %v6783_v55 = vld [vmem:[#allocation12_spill] sm:$0xff] }
 0x6ba   : > { %v3151_v10 = vrot.slane %v3150_v2, 1  ;;  %v3244_v43 = vadd.f32 %v4249_v6, %v3243_v37  ;;  %v3153_v45 = vadd.f32 %v6205_v16, %v6202_v15  ;;  %v3292_v40 = vmul.f32 %v3206_v59, %v5657_v29  ;;  %v6786_v59 = vld [vmem:[#allocation20_spill] sm:$0xff] }
 0x6bb   : > { %v3293_v41 = vmul.f32 %v3207_v58, %v5689_v46  ;;  %v3294_v44 = vmul.f32 %v3222_v61, %v5723_v33  ;;  %v3295_v1 = vmul.f32 %v3223_v17, %v5748_v5  ;;  %v3296_v9 = vmul.f32 %v3238_v39, %v5784_v12 }
 0x6bc   : > { %v6215_v60 = vadd.f32 %v3151_v10, %v3150_v2  ;;  %v3248_v27 = vsel %vm3247_vm14, %v4249_v6, %v3244_v43  ;;  %v3154_v4 = vrot.slane %v3153_v45, 4  ;;  %v3297_v57 = vmul.f32 %v3239_v34, %v6783_v55 }
 0x6bd   : > { %2626 = vperm.xlu2 %4069, %v6212_v36   ;;  %v3253_v26 = vsel %vm3250_vm15, %v3252_v54, %v3248_v27  ;;  %v3315_v29 = vadd.f32 %v3314_v42, %v3313_v3  ;;  %v3304_v46 = vsel %vm728_vm3, %v6095_v21, 0.0  ;;  %v3322_v14 = vsel %vm728_vm3, %v3292_v40, 0.0 }
 0x6be   : > { %4254 = vrcp.f32 %v6215_v60  ;;  %v3254_v38 = vmul.f32 %v6027_v8, %v3253_v26  ;;  %v3255_v6 = vmul.f32 %v6036_v23, %v3253_v26  ;;  %v3155_v56 = vadd.f32 %v3154_v4, %v3153_v45 }
 0x6bf   : > { %2620 = vperm.xlu1 %4070, %v6228_v25   ;;  %v3323_v33 = vsel %vm728_vm3, %v3293_v41, 0.0  ;;  %v3305_v8 = vsel %vm728_vm3, %v6103_v32, 0.0  ;;  %v3331_v11 = vsel %vm728_vm3, %v3294_v44, 0.0  ;;  %v3332_v12 = vsel %vm728_vm3, %v3295_v1, 0.0 }
 0x6c0   : > { %v3156_v5 = vrot.slane %v3155_v56, 2  ;;  %v3298_v28 = vmul.f32 %v3254_v38, %v6784_v31  ;;  %v3299_v3 = vmul.f32 %v3255_v6, %v6785_v22  ;;  %v3340_v53 = vsel %vm728_vm3, %v3296_v9, 0.0 }
 0x6c1   : > { %v3341_v21 = vsel %vm728_vm3, %v3297_v57, 0.0  ;;  %v3316_v2 = vrot.slane %v3315_v29, 4  ;;  %v6254_v32 = vadd.f32 %v5962_v20, %v6786_v59  ;;  %v3306_v52 = vadd.f32 %v3305_v8, %v3304_v46 }
 0x6c2   : > { %v3157_v18 = vadd.f32 %v3156_v5, %v3155_v56  ;;  %v3324_v7 = vadd.f32 %v3323_v33, %v3322_v14  ;;  %v3333_v48 = vadd.f32 %v3332_v12, %v3331_v11  ;;  %v3342_v58 = vadd.f32 %v3341_v21, %v3340_v53  ;;  %v6787_v14 = vld [vmem:[#allocation17_spill] sm:$0xff]  ;;  %v6788_v5 = vld [vmem:[#allocation15_spill] sm:$0xff] }
 0x6c3   : > { %v3349_v61 = vsel %vm728_vm3, %v3298_v28, 0.0  ;;  %v3350_v17 = vsel %vm728_vm3, %v3299_v3, 0.0  ;;  %v3267_v43 = vand.u32 2147483648, %v6215_v60  ;;  %v3265_v42 = vand.u32 2147483647, %v6215_v60 }
 0x6c4   : > { %v4255_v23 = vpop.eup %4254  ;;  %v3158_v10 = vrot.slane %v3157_v18, 1  ;;  %v3351_v39 = vadd.f32 %v3350_v17, %v3349_v61  ;;  %vm3261_vm1 = vweird.f32 %v6215_v60  ;;  %v3317_v54 = vadd.f32 %v3316_v2, %v3315_v29 }
 0x6c5   : > { %v3257_v0 = vmul.f32 %v4255_v23, %v6215_v60  ;;  %vm3262_vm0 = vweird.f32 %v4255_v23  ;;  %v3325_v27 = vrot.slane %v3324_v7, 4  ;;  %v3268_v40 = vor.u32 1.1754944e-38, %v3267_v43 }
 0x6c6   : > { %v3159_v20 = vadd.f32 %v3158_v10, %v3157_v18  ;;  %vm3263_vm2 = vmor %vm3261_vm1, %vm3262_vm0  ;;  %v3307_v41 = vrot.slane %v3306_v52, 4  ;;  %v3334_v26 = vrot.slane %v3333_v48, 4  ;;  %v3343_v4 = vrot.slane %v3342_v58, 4 }
 0x6c7   : > { %v3258_v37 = vsub.f32 1.0, %v3257_v0  ;;  %2629 = vperm.xlu1 %4070, %v6254_v32   ;;  %vm3266_vm4 = vcmp.eq.f32.partialorder %v3265_v42, 8.507059e+37  ;;  %v3352_v38 = vrot.slane %v3351_v39, 4  ;;  %v3318_v55 = vrot.slane %v3317_v54, 2 }
 0x6c8   : > { %4256 = vrcp.f32 %v3159_v20  ;;  %v3326_v57 = vadd.f32 %v3325_v27, %v3324_v7  ;;  %v3308_v56 = vadd.f32 %v3307_v41, %v3306_v52  ;;  %v3335_v46 = vadd.f32 %v3334_v26, %v3333_v48 }
 0x6c9   : > { %v3259_v45 = vmul.f32 %v4255_v23, %v3258_v37  ;;  %v3344_v29 = vadd.f32 %v3343_v4, %v3342_v58  ;;  %v3353_v12 = vadd.f32 %v3352_v38, %v3351_v39  ;;  %v3319_v3 = vadd.f32 %v3318_v55, %v3317_v54  ;;  %v6790_v38 = vld [vmem:[#allocation18_spill] sm:$0xff] }
 0x6ca   : > { %v3327_v28 = vrot.slane %v3326_v57, 2  ;;  %v3336_v53 = vrot.slane %v3335_v46, 2  ;;  %v3283_v0 = vand.u32 2147483648, %v3159_v20  ;;  %v3281_v59 = vand.u32 2147483647, %v3159_v20 }
 0x6cb   : > { %v3260_v34 = vadd.f32 %v4255_v23, %v3259_v45  ;;  %v3345_v21 = vrot.slane %v3344_v29, 2  ;;  %v3354_v52 = vrot.slane %v3353_v12, 2  ;;  %vm3277_vm7 = vweird.f32 %v3159_v20 }
 0x6cc   : > { %v3328_v7 = vadd.f32 %v3327_v28, %v3326_v57  ;;  %v3320_v10 = vrot.slane %v3319_v3, 1  ;;  %v3337_v58 = vadd.f32 %v3336_v53, %v3335_v46  ;;  %v3284_v61 = vor.u32 1.1754944e-38, %v3283_v0 }
 0x6cd   : > { %v3264_v44 = vsel %vm3263_vm2, %v4255_v23, %v3260_v34  ;;  %vm3282_vm9 = vcmp.eq.f32.partialorder %v3281_v59, 8.507059e+37  ;;  %v3346_v45 = vadd.f32 %v3345_v21, %v3344_v29  ;;  %v3355_v34 = vadd.f32 %v3354_v52, %v3353_v12 }
 0x6ce   : > { %v3269_v1 = vsel %vm3266_vm4, %v3268_v40, %v3264_v44  ;;  %v4257_v60 = vpop.eup %4256  ;;  %v3329_v54 = vrot.slane %v3328_v7, 1  ;;  %v3321_v4 = vadd.f32 %v3320_v10, %v3319_v3  ;;  %v6789_v44 = vld [vmem:[#allocation16_spill] sm:$0xff]  ;;  %vm2657_vm10 = vcmask 1041409  }
 0x6cf   : > { %v3270_v6 = vmul.f32 %v6122_v63, %v3269_v1  ;;  %v3271_v9 = vmul.f32 %v6130_v62, %v3269_v1  ;;  %v3273_v11 = vmul.f32 %v4257_v60, %v3159_v20  ;;  %v3309_v62 = vrot.slane %v3308_v56, 2 }
 0x6d0   : > { %vm3278_vm6 = vweird.f32 %v4257_v60  ;;  %v3338_v20 = vrot.slane %v3337_v58, 1  ;;  %v3356_v55 = vrot.slane %v3355_v34, 1  ;;  %v3330_v57 = vadd.f32 %v3329_v54, %v3328_v7 }
 0x6d1   : > { %v3300_v33 = vmul.f32 %v3270_v6, %v6787_v14  ;;  %v3301_v8 = vmul.f32 %v3271_v9, %v6788_v5  ;;  %v3274_v22 = vsub.f32 1.0, %v3273_v11  ;;  %vm3279_vm8 = vmor %vm3277_vm7, %vm3278_vm6  ;;  %v3310_v17 = vadd.f32 %v3309_v62, %v3308_v56 }
 0x6d2   : > { %v3347_v9 = vrot.slane %v3346_v45, 1  ;;  %vm2659_vm11 = vcmask 1042434   ;;  %vm2661_vm12 = vcmask 1043459   ;;  %vm2663_vm13 = vcmask 1044484  }
 0x6d3   : > { %v3358_v23 = vsel %vm728_vm3, %v3300_v33, 0.0  ;;  %v3359_v31 = vsel %vm728_vm3, %v3301_v8, 0.0  ;;  %v3275_v2 = vmul.f32 %v4257_v60, %v3274_v22  ;;  %v3311_v26 = vrot.slane %v3310_v17, 1  ;;  %v4308_v33 = vld [vmem:[%s6704_s12] ss:$0 sm:$0xff] }
 0x6d4   : > { %v3360_v63 = vadd.f32 %v3359_v31, %v3358_v23  ;;  %v6277_v5 = vadd.f32 %v4308_v33, %v3321_v4  ;;  %v3357_v8 = vadd.f32 %v3356_v55, %v3355_v34  ;;  %v6279_v23 = vadd.f32 %v4308_v33, %v3330_v57 }
 0x6d5   : > { %v3276_v48 = vadd.f32 %v4257_v60, %v3275_v2  ;;  %v3312_v14 = vadd.f32 %v3311_v26, %v3310_v17  ;;  %vm2665_vm14 = vcmask 1045509   ;;  %vm2667_vm15 = vcmask 1046534  }
 0x6d6   : > { %v3361_v18 = vrot.slane %v3360_v63, 4  ;;  %v3412_v62 = vmul.f32 %v6277_v5, %v6277_v5  ;;  %v6289_v53 = vadd.f32 %v4308_v33, %v3357_v8  ;;  %v3392_v21 = vrot.slane %v6277_v5, 7 }
 0x6d7   : > { %v3280_v43 = vsel %vm3279_vm8, %v4257_v60, %v3276_v48  ;;  %v3413_v2 = vmul.f32 %v6279_v23, %v6279_v23  ;;  %vm2669_vm0 = vcmask 1047559   ;;  %vm2634_vm1 = vcmask 130112  }
 0x6d8   : > { %v3362_v37 = vadd.f32 %v3361_v18, %v3360_v63  ;;  %v3285_v39 = vsel %vm3282_vm9, %v3284_v61, %v3280_v43  ;;  %v6283_v63 = vadd.f32 %v4308_v33, %v3312_v14  ;;  %v3394_v18 = vrot.slane %v6279_v23, 6 }
 0x6d9   : > { %v3286_v27 = vmul.f32 %v6202_v15, %v3285_v39  ;;  %v3287_v40 = vmul.f32 %v6205_v16, %v3285_v39  ;;  %v3339_v15 = vadd.f32 %v3338_v20, %v3337_v58  ;;  %v3348_v16 = vadd.f32 %v3347_v9, %v3346_v45 }
 0x6da   : > { %v3363_v42 = vrot.slane %v3362_v37, 2  ;;  %v3411_v7 = vmul.f32 %v6283_v63, %v6283_v63  ;;  %v3393_v58 = vsel %vm2657_vm10, %v3392_v21, %v6283_v63  ;;  %v3416_v17 = vmul.f32 %v6289_v53, %v6289_v53 }
 0x6db   : > { %v3302_v1 = vmul.f32 %v3286_v27, %v6789_v44  ;;  %v3303_v6 = vmul.f32 %v3287_v40, %v6790_v38  ;;  %v6281_v28 = vadd.f32 %v4308_v33, %v3339_v15  ;;  %v6285_v22 = vadd.f32 %v4308_v33, %v3348_v16 }
 0x6dc   : > { %v3364_v41 = vadd.f32 %v3363_v42, %v3362_v37  ;;  %v3427_v37 = vrot.slane %v3412_v62, 7  ;;  %v3395_v43 = vsel %vm2659_vm11, %v3394_v18, %v3393_v58  ;;  %v3429_v39 = vrot.slane %v3413_v2, 6 }
 0x6dd   : > { %v3367_v56 = vsel %vm728_vm3, %v3302_v1, 0.0  ;;  %v3368_v60 = vsel %vm728_vm3, %v3303_v6, 0.0  ;;  %v3414_v52 = vmul.f32 %v6281_v28, %v6281_v28  ;;  %v3415_v48 = vmul.f32 %v6285_v22, %v6285_v22 }
 0x6de   : > { %v3365_v46 = vrot.slane %v3364_v41, 1  ;;  %v3369_v29 = vadd.f32 %v3368_v60, %v3367_v56  ;;  %v3396_v61 = vrot.slane %v6281_v28, 5  ;;  %v3398_v45 = vrot.slane %v6285_v22, 4 }
 0x6df   : > { %v3400_v54 = vrot.slane %v6289_v53, 3  ;;  %v3431_v27 = vrot.slane %v3414_v52, 5  ;;  %v3433_v26 = vrot.slane %v3415_v48, 4  ;;  %v3435_v44 = vrot.slane %v3416_v17, 3 }
 0x6e0   : > { %v3370_v11 = vrot.slane %v3369_v29, 4  ;;  %v3366_v12 = vadd.f32 %v3365_v46, %v3364_v41  ;;  %v3428_v41 = vsel %vm2657_vm10, %v3427_v37, %v3411_v7  ;;  %v3397_v4 = vsel %vm2661_vm12, %v3396_v61, %v3395_v43  ;;  %v6791_v37 = vld [vmem:[#allocation10_spill] sm:$0xff] }
 0x6e1   : > { %v3399_v1 = vsel %vm2663_vm13, %v3398_v45, %v3397_v4  ;;  %v3430_v38 = vsel %vm2659_vm11, %v3429_v39, %v3428_v41 }
 0x6e2   : > { %v3371_v31 = vadd.f32 %v3370_v11, %v3369_v29  ;;  %v6292_v0 = vadd.f32 %v4308_v33, %v3366_v12  ;;  %v3401_v9 = vsel %vm2665_vm14, %v3400_v54, %v3399_v1  ;;  %v3432_v56 = vsel %vm2661_vm12, %v3431_v27, %v3430_v38 }
 0x6e3   : > { %v3434_v46 = vsel %vm2663_vm13, %v3433_v26, %v3432_v56 }
 0x6e4   : > { %v3372_v3 = vrot.slane %v3371_v31, 2  ;;  %v3417_v42 = vmul.f32 %v6292_v0, %v6292_v0  ;;  %v3402_v40 = vrot.slane %v6292_v0, 2  ;;  %v3436_v15 = vsel %vm2665_vm14, %v3435_v44, %v3434_v46 }
 0x6e6   : > { %v3373_v59 = vadd.f32 %v3372_v3, %v3371_v31  ;;  %v3437_v6 = vrot.slane %v3417_v42, 2  ;;  %v3403_v60 = vsel %vm2667_vm15, %v3402_v40, %v3401_v9 }
 0x6e8   : > { %v3374_v10 = vrot.slane %v3373_v59, 1 }
 0x6ea   : > { %v3375_v34 = vadd.f32 %v3374_v10, %v3373_v59  ;;  %v6334_v10 = vadd.s32 4294967288, %v6791_v37 }
 0x6ec   : > { %v6315_v20 = vadd.f32 %v4308_v33, %v3375_v34  ;;  %v3438_v33 = vsel %vm2667_vm15, %v3437_v6, %v3436_v15 }
 0x6ee   : > { %v3404_v55 = vrot.slane %v6315_v20, 1  ;;  %v3418_v57 = vmul.f32 %v6315_v20, %v6315_v20 }
 0x6ef   : > { %v2588_v12 = vpop.permute.xlu2 %2587 }
 0x6f0   : > { %v3405_v29 = vsel %vm2669_vm0, %v3404_v55, %v3403_v60  ;;  %v3439_v14 = vrot.slane %v3418_v57, 1  ;;  %v2633_v45 = vperm.slane %v2588_v12, %v6334_v10 }
 0x6f1   : > { %v3407_v16 = vsel %vm728_vm3, %v3405_v29, 0.0 }
 0x6f2   : > { %3408 = vadd.xlane.f32.xlu1 %v3407_v16  ;;  %v3440_v8 = vsel %vm2669_vm0, %v3439_v14, %v3438_v33 }
 0x6f3   : > { %v3442_v11 = vsel %vm728_vm3, %v3440_v8, 0.0 }
 0x6f4   : > { %3443 = vadd.xlane.f32.xlu2 %v3442_v11 }
 0x6f7   : > { %v2594_v31 = vpop.permute.xlu2 %2593 }
 0x6f8   : > { %v2637_v42 = vperm.slane %v2594_v31, %v6334_v10 }
 0x6ff   : > { %v2600_v21 = vpop.permute.xlu2 %2599 }
 0x700   : > { %v2640_v34 = vperm.slane %v2600_v21, %v6334_v10 }
 0x707   : > { %v2609_v52 = vpop.permute.xlu2 %2608 }
 0x708   : > { %v2645_v4 = vperm.slane %v2609_v52, %v6791_v37  ;;  %v6792_v52 = vld [vmem:[#allocation11_spill] sm:$0xff] }
 0x70f   : > { %v2618_v58 = vpop.permute.xlu2 %2617 }
 0x710   : > { %v2649_v15 = vperm.slane %v2618_v58, %v6334_v10  ;;  %v4004_v58 = vld [vmem:[%s6705_s13 + $0x10] sm:$0xff] }
 0x711   : > { %v2591_v62 = vpop.permute.xlu1 %2590 }
 0x712   : > { %v2585_v3 = vpop.permute.xlu0 %2584  ;;  %v2636_v61 = vperm.slane %v2591_v62, %v6791_v37 }
 0x713   : > { %v2631_v17 = vperm.slane %v2585_v3, %v6791_v37 }
 0x714   : > { %v2638_v40 = vsel %vm2634_vm1, %v2637_v42, %v2636_v61 }
 0x715   : > { %v2635_v41 = vsel %vm2634_vm1, %v2633_v45, %v2631_v17  ;;  %v4003_v45 = vld [vmem:[%s6705_s13 + $0x8] sm:$0xff] }
 0x716   : > { %v2658_v6 = vsel %vm2657_vm10, %v2638_v40, %v2635_v41 }
 0x717   : > { %v2627_v60 = vpop.permute.xlu2 %2626 }
 0x718   : > { %v2654_v8 = vperm.slane %v2627_v60, %v6791_v37 }
 0x719   : > { %v2597_v18 = vpop.permute.xlu1 %2596 }
 0x71a   : > { %v2606_v2 = vpop.permute.xlu0 %2605  ;;  %v2639_v43 = vperm.slane %v2597_v18, %v6791_v37 }
 0x71b   : > { %v2643_v26 = vperm.slane %v2606_v2, %v6334_v10 }
 0x71c   : > { %v2641_v44 = vsel %vm2634_vm1, %v2640_v34, %v2639_v43 }
 0x71d   : > { %v2660_v57 = vsel %vm2659_vm11, %v2641_v44, %v2658_v6 }
 0x721   : > { %v2603_v59 = vpop.permute.xlu1 %2602 }
 0x722   : > { %v2615_v48 = vpop.permute.xlu0 %2614  ;;  %v2642_v39 = vperm.slane %v2603_v59, %v6791_v37  ;;  %v4005_v59 = vld [vmem:[%s6705_s13 + $0x18] sm:$0xff] }
 0x723   : > { %v2648_v56 = vperm.slane %v2615_v48, %v6791_v37  ;;  %3605 = vmatpush.bf16.msra.mxu1 %v4005_v59 }
 0x724   : > { %v2644_v1 = vsel %vm2634_vm1, %v2643_v26, %v2642_v39  ;;  %v4002_v39 = vld [vmem:[%s6705_s13] sm:$0xff] }
 0x725   : > { %v2662_v46 = vsel %vm2661_vm12, %v2644_v1, %v2660_v57  ;;  %v2650_v11 = vsel %vm2634_vm1, %v2649_v15, %v2648_v56 }
 0x727   : > { %3606 = vmatpush.bf16.msra.mxu1 %v4004_v58  ;;  %v4310_v58 = vld [vmem:[%s6748_s5] ss:$0 sm:$0xff] }
 0x729   : > { %v2612_v7 = vpop.permute.xlu1 %2611 }
 0x72a   : > { %v2646_v54 = vperm.slane %v2612_v7, %v6334_v10  ;;  %v2624_v38 = vpop.permute.xlu0 %2623 }
 0x72b   : > { %v2652_v29 = vperm.slane %v2624_v38, %v6334_v10  ;;  %3607 = vmatpush.bf16.msra.mxu1 %v4003_v45 }
 0x72c   : > { %v2647_v9 = vsel %vm2634_vm1, %v2646_v54, %v2645_v4 }
 0x72d   : > { %v2664_v14 = vsel %vm2663_vm13, %v2647_v9, %v2662_v46 }
 0x72e   : > { %v2666_v31 = vsel %vm2665_vm14, %v2650_v11, %v2664_v14 }
 0x72f   : > { %3608 = vmatpush.bf16.msra.mxu1 %v4002_v39 }
 0x731   : > { %v2621_v27 = vpop.permute.xlu1 %2620 }
 0x732   : > { %v2651_v55 = vperm.slane %v2621_v27, %v6791_v37 }
 0x734   : > { %v2653_v16 = vsel %vm2634_vm1, %v2652_v29, %v2651_v55 }
 0x735   : > { %v2668_v3 = vsel %vm2667_vm15, %v2653_v16, %v2666_v31 }
 0x739   : > { %v2630_v33 = vpop.permute.xlu1 %2629 }
 0x73a   : > { %v2655_v12 = vperm.slane %v2630_v33, %v6334_v10 }
 0x73c   : > { %v2656_v62 = vsel %vm2634_vm1, %v2655_v12, %v2654_v8 }
 0x73d   : > { %v2670_v21 = vsel %vm2669_vm0, %v2656_v62, %v2668_v3 }
 0x73e   : > { %v2672_v18 = vsel %vm932_vm5, %v2670_v21, -inf }
 0x73f   : > { %2673 = vmax.xlane.f32.xlu0 %v2672_v18 }
 0x765   : > { %v3409_v2 = vpop.xlane.xlu1 %3408 }
 0x766   : > { %v3410_v7 = vmul.f32 %v3409_v2, %v6792_v52 }
 0x767   : > { %v3444_v48 = vpop.xlane.xlu2 %3443 }
 0x768   : > { %v3445_v61 = vmul.f32 %v3444_v48, %v6792_v52  ;;  %v3446_v17 = vmul.f32 %v3410_v7, %v3410_v7  ;;  %v3449_v40 = vrot.slane %v3410_v7, 1  ;;  %v3450_v26 = vrot.slane %v3410_v7, 2 }
 0x769   : > { %v3451_v4 = vrot.slane %v3410_v7, 3  ;;  %v3452_v44 = vrot.slane %v3410_v7, 4  ;;  %v3453_v1 = vrot.slane %v3410_v7, 5  ;;  %v3454_v6 = vrot.slane %v3410_v7, 6 }
 0x76a   : > { %v3447_v43 = vsub.f32 %v3445_v61, %v3446_v17  ;;  %v3455_v9 = vrot.slane %v3410_v7, 7  ;;  %v3464_v55 = vsub.f32 %v6283_v63, %v3410_v7  ;;  %v3465_v56 = vsub.f32 %v6277_v5, %v3449_v40 }
 0x76b   : > { %v3466_v60 = vsub.f32 %v6279_v23, %v3450_v26  ;;  %v3467_v46 = vsub.f32 %v6281_v28, %v3451_v4  ;;  %v3468_v29 = vsub.f32 %v6285_v22, %v3452_v44  ;;  %v3469_v14 = vsub.f32 %v6289_v53, %v3453_v1  ;;  %v4309_v53 = vld [vmem:[%s6747_s4] ss:$0 sm:$0xff] }
 0x76c   : > { %v3472_v42 = vadd.f32 1e-05, %v3447_v43  ;;  %v3470_v16 = vsub.f32 %v6292_v0, %v3454_v6  ;;  %v3471_v33 = vsub.f32 %v6315_v20, %v3455_v9 }
 0x76e   : > { %4258 = vrsqrt.f32 %v3472_v42  ;;  %vm3479_vm4 = vweird.f32 %v3472_v42 }
 0x774   : > { %v4259_v34 = vpop.eup %4258 }
 0x775   : > { %v3474_v54 = vmul.f32 %v4259_v34, %v3472_v42  ;;  %vm3480_vm2 = vweird.f32 %v4259_v34 }
 0x776   : > { %vm3481_vm6 = vmor %vm3479_vm4, %vm3480_vm2 }
 0x777   : > { %v3475_v27 = vmul.f32 %v4259_v34, %v3474_v54 }
 0x779   : > { %v3476_v41 = vmul.f32 0.5, %v3475_v27 }
 0x77b   : > { %v3477_v38 = vsub.f32 1.5, %v3476_v41 }
 0x77d   : > { %v3478_v57 = vmul.f32 %v4259_v34, %v3477_v38 }
 0x77f   : > { %v3482_v15 = vsel %vm3481_vm6, %v4259_v34, %v3478_v57 }
 0x780   : > { %v3484_v8 = vrot.slane %v3482_v15, 1  ;;  %v3485_v63 = vrot.slane %v3482_v15, 2  ;;  %v3486_v11 = vrot.slane %v3482_v15, 3  ;;  %v3487_v12 = vrot.slane %v3482_v15, 4 }
 0x781   : > { %v3488_v31 = vrot.slane %v3482_v15, 5  ;;  %v3499_v5 = vmul.f32 %v3482_v15, %v3464_v55  ;;  %v3489_v62 = vrot.slane %v3482_v15, 6  ;;  %v3490_v23 = vrot.slane %v3482_v15, 7 }
 0x782   : > { %v3500_v3 = vmul.f32 %v3484_v8, %v3465_v56  ;;  %v3501_v28 = vmul.f32 %v3485_v63, %v3466_v60  ;;  %v3502_v21 = vmul.f32 %v3486_v11, %v3467_v46  ;;  %v3503_v22 = vmul.f32 %v3487_v12, %v3468_v29 }
 0x783   : > { %v3507_v18 = vmul.f32 %v4309_v53, %v3499_v5  ;;  %v3504_v0 = vmul.f32 %v3488_v31, %v3469_v14  ;;  %v3505_v2 = vmul.f32 %v3489_v62, %v3470_v16  ;;  %v3506_v20 = vmul.f32 %v3490_v23, %v3471_v33 }
 0x784   : > { %v3508_v59 = vmul.f32 %v4309_v53, %v3500_v3  ;;  %v3509_v52 = vmul.f32 %v4309_v53, %v3501_v28  ;;  %v3510_v7 = vmul.f32 %v4309_v53, %v3502_v21  ;;  %v3511_v48 = vmul.f32 %v4309_v53, %v3503_v22 }
 0x785   : > { %v3515_v61 = vadd.f32 %v4310_v58, %v3507_v18  ;;  %v3512_v17 = vmul.f32 %v4309_v53, %v3504_v0  ;;  %v3513_v43 = vmul.f32 %v4309_v53, %v3505_v2  ;;  %v3514_v45 = vmul.f32 %v4309_v53, %v3506_v20 }
 0x786   : > { %v3516_v42 = vadd.f32 %v4310_v58, %v3508_v59  ;;  %v3517_v39 = vadd.f32 %v4310_v58, %v3509_v52  ;;  %v3518_v34 = vadd.f32 %v4310_v58, %v3510_v7  ;;  %v3519_v54 = vadd.f32 %v4310_v58, %v3511_v48  ;;  %v6793_v59 = vld [vmem:[#allocation22_spill] sm:$0xff]  ;;  %v6794_v7 = vld [vmem:[#allocation19_spill] sm:$0xff] }
 0x787   : > { %v3520_v27 = vadd.f32 %v4310_v58, %v3512_v17  ;;  %v3521_v40 = vadd.f32 %v4310_v58, %v3513_v43  ;;  %v3522_v41 = vadd.f32 %v4310_v58, %v3514_v45  ;;  %v3523_v26 = vpack.c.bf16 %v3515_v61, %v3515_v61  ;;  %v6795_v58 = vld [vmem:[#allocation23_spill] sm:$0xff] }
 0x788   : > { %v3524_v4 = vpack.c.bf16 %v3516_v42, %v3516_v42  ;;  %v3525_v44 = vpack.c.bf16 %v3517_v39, %v3517_v39  ;;  %v3526_v1 = vpack.c.bf16 %v3518_v34, %v3518_v34  ;;  %v3527_v38 = vpack.c.bf16 %v3519_v54, %v3519_v54  ;;  %v6796_v54 = vld [vmem:[#allocation21_spill] sm:$0xff] }
 0x789   : > { %v3528_v6 = vpack.c.bf16 %v3520_v27, %v3520_v27  ;;  %v3529_v9 = vpack.c.bf16 %v3521_v40, %v3521_v40  ;;  %v3530_v55 = vpack.c.bf16 %v3522_v41, %v3522_v41  ;;  %v3551_v29 = vunpack.c.l.b16 %v3523_v26 }
 0x78a   : > { %v3552_v57 = vunpack.c.l.b16 %v3524_v4  ;;  %v3553_v56 = vunpack.c.l.b16 %v3525_v44  ;;  %v3554_v60 = vunpack.c.l.b16 %v3526_v1  ;;  %v3555_v46 = vunpack.c.l.b16 %v3527_v38 }
 0x78b   : > { %v3556_v15 = vunpack.c.l.b16 %v3528_v6  ;;  %v3557_v33 = vunpack.c.l.b16 %v3529_v9  ;;  %v3558_v8 = vunpack.c.l.b16 %v3530_v55 }
 0x78c   : > { %v3559_v14 = vrot.slane %v3552_v57, 7  ;;  %v3561_v16 = vrot.slane %v3553_v56, 6  ;;  %v3563_v11 = vrot.slane %v3554_v60, 5  ;;  %v3565_v31 = vrot.slane %v3555_v46, 4 }
 0x78d   : > { %v3567_v62 = vrot.slane %v3556_v15, 3  ;;  %v3569_v3 = vrot.slane %v3557_v33, 2  ;;  %v3571_v21 = vrot.slane %v3558_v8, 1 }
 0x78e   : > { %v3560_v63 = vsel %vm2657_vm10, %v3559_v14, %v3551_v29 }
 0x78f   : > { %v3562_v12 = vsel %vm2659_vm11, %v3561_v16, %v3560_v63 }
 0x790   : > { %v3564_v5 = vsel %vm2661_vm12, %v3563_v11, %v3562_v12 }
 0x791   : > { %v3566_v23 = vsel %vm2663_vm13, %v3565_v31, %v3564_v5 }
 0x792   : > { %v3568_v28 = vsel %vm2665_vm14, %v3567_v62, %v3566_v23 }
 0x793   : > { %v3570_v22 = vsel %vm2667_vm15, %v3569_v3, %v3568_v28 }
 0x794   : > { %v3572_v53 = vsel %vm2669_vm0, %v3571_v21, %v3570_v22 }
 0x795   : > { %v3573_v18 = vpack.c.b16 %v3572_v53, %v3572_v53 }
 0x797   : > { %3975 = vmatmul.msk.bf16.vlgmr.msra.gmra.mxu1 %vm728_vm3, %v3573_v18 }
 0x7b2   : > { %v6404_v0 = vpop.xlane.xlu0 %2673 }
 0x7b3   : > { %v2677_v2 = vperm.slane %v6404_v0, 1  ;;  %v2676_v20 = vperm.slane %v6404_v0, 0  ;;  %v2678_v17 = vperm.slane %v6404_v0, 2  ;;  %v2680_v41 = vperm.slane %v6404_v0, 4 }
 0x7b4   : > { %v2679_v4 = vperm.slane %v6404_v0, 3  ;;  %v2681_v57 = vperm.slane %v6404_v0, 5  ;;  %v2683_v14 = vperm.slane %v6404_v0, 7  ;;  %v2682_v8 = vperm.slane %v6404_v0, 6 }
 0x7b5   : > { %v2694_v52 = vsub.f32 %v6793_v59, %v2677_v2  ;;  %v2693_v48 = vsub.f32 %v6794_v7, %v2676_v20  ;;  %v2692_v61 = vsub.f32 %v6795_v58, %v2676_v20  ;;  %v2697_v39 = vsub.f32 %v6068_v50, %v2678_v17 }
 0x7b6   : > { %v2696_v34 = vsub.f32 %v6081_v30, %v2678_v17  ;;  %v2695_v27 = vsub.f32 %v6796_v54, %v2677_v2  ;;  %v2700_v30 = vsub.f32 %v6100_v35, %v2680_v41  ;;  %v2698_v6 = vsub.f32 %v6128_v19, %v2679_v4 }
 0x7b7   : > { %v2712_v43 = vmul.f32 1.442695, %v2694_v52  ;;  %v2710_v45 = vmul.f32 1.442695, %v2693_v48  ;;  %v2708_v42 = vmul.f32 1.442695, %v2692_v61  ;;  %v2699_v9 = vsub.f32 %v6089_v51, %v2679_v4 }
 0x7b8   : > { %v2718_v40 = vmul.f32 1.442695, %v2697_v39  ;;  %v2716_v26 = vmul.f32 1.442695, %v2696_v34  ;;  %v2714_v1 = vmul.f32 1.442695, %v2695_v27  ;;  %v2703_v19 = vsub.f32 %v6162_v24, %v2681_v57 }
 0x7b9   : > { %4260 = vpow2.f32 %v2712_v43  ;;  %v2724_v55 = vmul.f32 1.442695, %v2700_v30  ;;  %v2720_v56 = vmul.f32 1.442695, %v2698_v6  ;;  %v2722_v46 = vmul.f32 1.442695, %v2699_v9 }
 0x7ba   : > { %4262 = vpow2.f32 %v2710_v45  ;;  %v2701_v51 = vsub.f32 %v6188_v13, %v2680_v41  ;;  %v2702_v15 = vsub.f32 %v6140_v49, %v2681_v57  ;;  %v2730_v16 = vmul.f32 1.442695, %v2703_v19 }
 0x7bb   : > { %4264 = vpow2.f32 %v2708_v42  ;;  %v2706_v13 = vsub.f32 %v6212_v36, %v2683_v14  ;;  %v2704_v49 = vsub.f32 %v6228_v25, %v2682_v8  ;;  %v2705_v31 = vsub.f32 %v6196_v47, %v2682_v8 }
 0x7bc   : > { %4266 = vpow2.f32 %v2718_v40  ;;  %v2726_v33 = vmul.f32 1.442695, %v2701_v51  ;;  %v2728_v11 = vmul.f32 1.442695, %v2702_v15  ;;  %v2707_v47 = vsub.f32 %v6254_v32, %v2683_v14  ;;  %v4079_v32 = vld [vmem:[%s6706_s14] ss:$0 sm:$0xff] }
 0x7bd   : > { %4268 = vpow2.f32 %v2716_v26  ;;  %v2736_v5 = vmul.f32 1.442695, %v2706_v13  ;;  %v2732_v62 = vmul.f32 1.442695, %v2704_v49  ;;  %v2734_v3 = vmul.f32 1.442695, %v2705_v31 }
 0x7be   : > { %4270 = vpow2.f32 %v2714_v1  ;;  %v2738_v25 = vmul.f32 1.442695, %v2707_v47 }
 0x7bf   : > { %v6417_v44 = vpop.eup %4260  ;;  %4272 = vpow2.f32 %v2724_v55 }
 0x7c0   : > { %v6419_v38 = vpop.eup %4262  ;;  %2763 = vperm.xlu1 %4070, %v6417_v44   ;;  %4274 = vpow2.f32 %v2720_v56 }
 0x7c1   : > { %v6422_v50 = vpop.eup %4264  ;;  %2760 = vperm.xlu0 %4068, %v6419_v38   ;;  %4276 = vpow2.f32 %v2722_v46 }
 0x7c2   : > { %2757 = vperm.xlu2 %4069, %v6422_v50   ;;  %v6430_v60 = vpop.eup %4266  ;;  %4278 = vpow2.f32 %v2730_v16 }
 0x7c3   : > { %v6432_v29 = vpop.eup %4268  ;;  %4280 = vpow2.f32 %v2726_v33 }
 0x7c4   : > { %v6435_v35 = vpop.eup %4270  ;;  %4282 = vpow2.f32 %v2728_v11 }
 0x7c5   : > { %v6444_v63 = vpop.eup %4272  ;;  %4284 = vpow2.f32 %v2736_v5 }
 0x7c6   : > { %v6446_v12 = vpop.eup %4274  ;;  %4286 = vpow2.f32 %v2732_v62 }
 0x7c7   : > { %v6449_v24 = vpop.eup %4276  ;;  %4288 = vpow2.f32 %v2734_v3 }
 0x7c8   : > { %2772 = vperm.xlu1 %4070, %v6430_v60   ;;  %v6456_v23 = vpop.eup %4278  ;;  %4290 = vpow2.f32 %v2738_v25 }
 0x7c9   : > { %2769 = vperm.xlu0 %4068, %v6432_v29   ;;  %v6458_v28 = vpop.eup %4280 }
 0x7ca   : > { %2766 = vperm.xlu2 %4069, %v6435_v35   ;;  %v6461_v36 = vpop.eup %4282 }
 0x7cb   : > { %v6466_v21 = vpop.eup %4284 }
 0x7cc   : > { %v6468_v22 = vpop.eup %4286 }
 0x7cd   : > { %v6471_v53 = vpop.eup %4288 }
 0x7ce   : > { %v6475_v18 = vpop.eup %4290 }
 0x7d0   : > { %2781 = vperm.xlu1 %4070, %v6444_v63  }
 0x7d1   : > { %2775 = vperm.xlu0 %4068, %v6446_v12  }
 0x7d2   : > { %2778 = vperm.xlu2 %4069, %v6449_v24  }
 0x7d8   : > { %2790 = vperm.xlu1 %4070, %v6456_v23  }
 0x7d9   : > { %2784 = vperm.xlu0 %4068, %v6458_v28  }
 0x7da   : > { %2787 = vperm.xlu2 %4069, %v6461_v36  }
 0x7e0   : > { %2799 = vperm.xlu1 %4070, %v6466_v21  }
 0x7e1   : > { %2793 = vperm.xlu0 %4068, %v6468_v22  }
 0x7e2   : > { %2796 = vperm.xlu2 %4069, %v6471_v53  }
 0x7e9   : > { %2802 = vperm.xlu0 %4068, %v6475_v18  }
 0x814   : > { %v3610_v0 = vpop.f32.mrf.mxu1 }
 0x815   : > { %v3611_v2 = vadd.f32 %v4079_v32, %v3610_v0 }
 0x817   : > { %3614 = vst [vmem:[%s6487_s28] sm:$0xff] %v3611_v2 }
 0x81c   : > { %v3612_v20 = vpop.f32.mrf.mxu1  ;;  %v2758_v59 = vpop.permute.xlu2 %2757 }
 0x81d   : > { %v2804_v26 = vperm.slane %v2758_v59, %v6791_v37 }
 0x824   : > { %v2767_v48 = vpop.permute.xlu2 %2766 }
 0x825   : > { %v2808_v4 = vperm.slane %v2767_v48, %v6334_v10 }
 0x82c   : > { %v2779_v17 = vpop.permute.xlu2 %2778 }
 0x82d   : > { %v2814_v9 = vperm.slane %v2779_v17, %v6334_v10 }
 0x832   : > { %v2764_v52 = vpop.permute.xlu1 %2763 }
 0x833   : > { %v2761_v7 = vpop.permute.xlu0 %2760  ;;  %v2807_v54 = vperm.slane %v2764_v52, %v6791_v37 }
 0x834   : > { %v2788_v39 = vpop.permute.xlu2 %2787  ;;  %v2805_v27 = vperm.slane %v2761_v7, %v6334_v10 }
 0x835   : > { %v2809_v55 = vsel %vm2634_vm1, %v2808_v4, %v2807_v54  ;;  %v2819_v8 = vperm.slane %v2788_v39, %v6791_v37 }
 0x836   : > { %v2806_v57 = vsel %vm2634_vm1, %v2805_v27, %v2804_v26 }
 0x837   : > { %v2828_v14 = vsel %vm2657_vm10, %v2809_v55, %v2806_v57 }
 0x83a   : > { %v2773_v58 = vpop.permute.xlu1 %2772 }
 0x83b   : > { %v2770_v61 = vpop.permute.xlu0 %2769  ;;  %v2811_v40 = vperm.slane %v2773_v58, %v6334_v10 }
 0x83c   : > { %v2810_v41 = vperm.slane %v2770_v61, %v6791_v37  ;;  %v2797_v19 = vpop.permute.xlu2 %2796 }
 0x83d   : > { %v2823_v13 = vperm.slane %v2797_v19, %v6334_v10 }
 0x83e   : > { %v2812_v56 = vsel %vm2634_vm1, %v2811_v40, %v2810_v41 }
 0x83f   : > { %v2829_v11 = vsel %vm2659_vm11, %v2812_v56, %v2828_v14 }
 0x842   : > { %v2782_v45 = vpop.permute.xlu1 %2781 }
 0x843   : > { %v2776_v43 = vpop.permute.xlu0 %2775  ;;  %v2816_v46 = vperm.slane %v2782_v45, %v6791_v37 }
 0x844   : > { %v2813_v1 = vperm.slane %v2776_v43, %v6791_v37 }
 0x846   : > { %v2815_v51 = vsel %vm2634_vm1, %v2814_v9, %v2813_v1 }
 0x847   : > { %v2830_v49 = vsel %vm2661_vm12, %v2815_v51, %v2829_v11 }
 0x84a   : > { %v2791_v34 = vpop.permute.xlu1 %2790 }
 0x84b   : > { %v2785_v42 = vpop.permute.xlu0 %2784  ;;  %v2820_v15 = vperm.slane %v2791_v34, %v6334_v10 }
 0x84c   : > { %v2817_v30 = vperm.slane %v2785_v42, %v6334_v10 }
 0x84d   : > { %v2821_v5 = vsel %vm2634_vm1, %v2820_v15, %v2819_v8 }
 0x84e   : > { %v2818_v16 = vsel %vm2634_vm1, %v2817_v30, %v2816_v46 }
 0x84f   : > { %v2831_v62 = vsel %vm2663_vm13, %v2818_v16, %v2830_v49 }
 0x850   : > { %v2832_v0 = vsel %vm2665_vm14, %v2821_v5, %v2831_v62 }
 0x852   : > { %v2800_v31 = vpop.permute.xlu1 %2799 }
 0x853   : > { %v2794_v6 = vpop.permute.xlu0 %2793  ;;  %v2825_v25 = vperm.slane %v2800_v31, %v6791_v37 }
 0x854   : > { %v2822_v33 = vperm.slane %v2794_v6, %v6791_v37 }
 0x856   : > { %v2824_v3 = vsel %vm2634_vm1, %v2823_v13, %v2822_v33 }
 0x857   : > { %v2833_v20 = vsel %vm2667_vm15, %v2824_v3, %v2832_v0 }
 0x85b   : > { %v2803_v47 = vpop.permute.xlu0 %2802 }
 0x85c   : > { %v2826_v32 = vperm.slane %v2803_v47, %v6334_v10 }
 0x85e   : > { %v2827_v2 = vsel %vm2634_vm1, %v2826_v32, %v2825_v25 }
 0x85f   : > { %v2834_v59 = vsel %vm2669_vm0, %v2827_v2, %v2833_v20 }
 0x860   : > { %v2836_v52 = vsel %vm932_vm5, %v2834_v59, 0.0 }
 0x861   : > { %2837 = vadd.xlane.f32.xlu2 %v2836_v52 }
 0x8d4   : > { %v6522_v7 = vpop.xlane.xlu2 %2837 }
 0x8d5   : > { %v2840_v48 = vperm.slane %v6522_v7, 0  ;;  %v2841_v58 = vperm.slane %v6522_v7, 1  ;;  %v6527_v61 = vperm.slane %v6522_v7, 2  ;;  %v2845_v17 = vperm.slane %v6522_v7, 5 }
 0x8d6   : > { %v6532_v45 = vperm.slane %v6522_v7, 3  ;;  %v6540_v55 = vperm.slane %v6522_v7, 4  ;;  %v6559_v20 = vperm.slane %v6522_v7, 6 }
 0x8d7   : > { %4292 = vrcp.f32 %v2840_v48  ;;  %v2865_v40 = vand.u32 2147483647, %v2840_v48  ;;  %v2867_v41 = vand.u32 2147483648, %v2840_v48  ;;  %v2945_v57 = vand.u32 2147483647, %v2845_v17 }
 0x8d8   : > { %4294 = vrcp.f32 %v2841_v58  ;;  %vm2861_vm7 = vweird.f32 %v2840_v48  ;;  %v2947_v19 = vand.u32 2147483648, %v2845_v17  ;;  %v2883_v13 = vand.u32 2147483648, %v2841_v58 }
 0x8d9   : > { %4296 = vrcp.f32 %v6527_v61  ;;  %vm2866_vm9 = vcmp.eq.f32.partialorder %v2865_v40, 8.507059e+37  ;;  %v2868_v51 = vor.u32 1.1754944e-38, %v2867_v41  ;;  %vm2877_vm6 = vweird.f32 %v2841_v58 }
 0x8da   : > { %4298 = vrcp.f32 %v2845_v17  ;;  %v2881_v5 = vand.u32 2147483647, %v2841_v58  ;;  %v2948_v47 = vor.u32 1.1754944e-38, %v2947_v19  ;;  %v2884_v0 = vor.u32 1.1754944e-38, %v2883_v13 }
 0x8db   : > { %4300 = vrcp.f32 %v6532_v45 }
 0x8dc   : > { %4302 = vrcp.f32 %v6540_v55 }
 0x8dd   : > { %v4293_v43 = vpop.eup %4292  ;;  %4304 = vrcp.f32 %v6559_v20 }
 0x8de   : > { %v4295_v42 = vpop.eup %4294  ;;  %v2857_v39 = vmul.f32 %v4293_v43, %v2840_v48  ;;  %vm2862_vm3 = vweird.f32 %v4293_v43 }
 0x8df   : > { %v6534_v34 = vpop.eup %4296  ;;  %v2873_v54 = vmul.f32 %v4295_v42, %v2841_v58  ;;  %vm2863_vm8 = vmor %vm2861_vm7, %vm2862_vm3  ;;  %vm2878_vm2 = vweird.f32 %v4295_v42  ;;  %vm2941_vm3 = vweird.f32 %v2845_v17 }
 0x8e0   : > { %v2858_v27 = vsub.f32 1.0, %v2857_v39  ;;  %v4299_v4 = vpop.eup %4298  ;;  %v2889_v30 = vmul.f32 %v6534_v34, %v6527_v61  ;;  %vm6547_vm7 = vmor %vm2877_vm6, %vm2878_vm2  ;;  %vm2882_vm2 = vcmp.eq.f32.partialorder %v2881_v5, 8.507059e+37  ;;  %vm2893_vm6 = vweird.f32 %v6527_v61 }
 0x8e1   : > { %v2874_v26 = vsub.f32 1.0, %v2873_v54  ;;  %v2937_v6 = vmul.f32 %v4299_v4, %v2845_v17  ;;  %v6542_v33 = vpop.eup %4300  ;;  %vm2942_vm4 = vweird.f32 %v4299_v4  ;;  %v2897_v54 = vand.u32 2147483647, %v6527_v61 }
 0x8e2   : > { %v2859_v1 = vmul.f32 %v4293_v43, %v2858_v27  ;;  %v2890_v16 = vsub.f32 1.0, %v2889_v30  ;;  %v4303_v17 = vpop.eup %4302 }
 0x8e3   : > { %v2875_v9 = vmul.f32 %v4295_v42, %v2874_v26  ;;  %v2938_v46 = vsub.f32 1.0, %v2937_v6  ;;  %v2921_v40 = vmul.f32 %v4303_v17, %v6540_v55  ;;  %v2913_v6 = vand.u32 2147483647, %v6532_v45 }
 0x8e4   : > { %v2860_v56 = vadd.f32 %v4293_v43, %v2859_v1  ;;  %v2915_v1 = vand.u32 2147483648, %v6532_v45 }
 0x8e5   : > { %v2876_v14 = vadd.f32 %v4295_v42, %v2875_v9  ;;  %v2939_v8 = vmul.f32 %v4299_v4, %v2938_v46 }
 0x8e6   : > { %v2864_v15 = vsel %vm2863_vm8, %v4293_v43, %v2860_v56  ;;  %vm2943_vm8 = vmor %vm2941_vm3, %vm2942_vm4  ;;  %vm2894_vm4 = vweird.f32 %v6534_v34  ;;  %v2899_v43 = vand.u32 2147483648, %v6527_v61  ;;  %v2922_v61 = vsub.f32 1.0, %v2921_v40 }
 0x8e7   : > { %v2869_v11 = vsel %vm2866_vm9, %v2868_v51, %v2864_v15  ;;  %v2940_v62 = vadd.f32 %v4299_v4, %v2939_v8  ;;  %v2880_v25 = vsel %vm6547_vm7, %v4295_v42, %v2876_v14  ;;  %vm2946_vm9 = vcmp.eq.f32.partialorder %v2945_v57, 8.507059e+37  ;;  %vm2895_vm3 = vmor %vm2893_vm6, %vm2894_vm4 }
 0x8e8   : > { %v2871_v49 = vmul.f32 %v6419_v38, %v2869_v11  ;;  %v2870_v31 = vmul.f32 %v6422_v50, %v2869_v11  ;;  %v2891_v38 = vmul.f32 %v6534_v34, %v2890_v16  ;;  %v2905_v50 = vmul.f32 %v6542_v33, %v6532_v45 }
 0x8e9   : > { %v2944_v32 = vsel %vm2943_vm8, %v4299_v4, %v2940_v62  ;;  %v2885_v52 = vsel %vm2882_vm2, %v2884_v0, %v2880_v25  ;;  %v2900_v41 = vor.u32 1.1754944e-38, %v2899_v43  ;;  %vm2898_vm7 = vcmp.eq.f32.partialorder %v2897_v54, 8.507059e+37  ;;  %v4305_v4 = vpop.eup %4304 }
 0x8ea   : > { %3635 = vperm.xlu0 %4068, %v2871_v49   ;;  %3632 = vperm.xlu1 %4070, %v2870_v31   ;;  %v6556_v2 = vsel %vm2946_vm9, %v2948_v47, %v2944_v32  ;;  %v2892_v48 = vadd.f32 %v6534_v34, %v2891_v38  ;;  %v2906_v58 = vsub.f32 1.0, %v2905_v50  ;;  %v2887_v42 = vmul.f32 %v6435_v35, %v2885_v52 }
 0x8eb   : > { %v2950_v59 = vmul.f32 %v6461_v36, %v6556_v2  ;;  %v2886_v39 = vmul.f32 %v6417_v44, %v2885_v52  ;;  %v6575_v35 = vperm.slane %v6522_v7, 7  ;;  %vm2910_vm8 = vweird.f32 %v6542_v33 }
 0x8ec   : > { %v2896_v36 = vsel %vm2895_vm3, %v6534_v34, %v2892_v48  ;;  %v2907_v27 = vmul.f32 %v6542_v33, %v2906_v58  ;;  %vm2909_vm9 = vweird.f32 %v6532_v45  ;;  %v2923_v9 = vmul.f32 %v4303_v17, %v2922_v61 }
 0x8ed   : > { %3662 = vperm.xlu2 %4069, %v2950_v59   ;;  %v2901_v44 = vsel %vm2898_vm7, %v2900_v41, %v2896_v36  ;;  %4306 = vrcp.f32 %v6575_v35  ;;  %vm2911_vm2 = vmor %vm2909_vm9, %vm2910_vm8  ;;  %v2953_v57 = vmul.f32 %v4305_v4, %v6559_v20  ;;  %v2916_v56 = vor.u32 1.1754944e-38, %v2915_v1 }
 0x8ee   : > { %v2908_v26 = vadd.f32 %v6542_v33, %v2907_v27  ;;  %v2903_v34 = vmul.f32 %v6430_v60, %v2901_v44  ;;  %v2902_v30 = vmul.f32 %v6432_v29, %v2901_v44  ;;  %vm2914_vm4 = vcmp.eq.f32.partialorder %v2913_v6, 8.507059e+37 }
 0x8ef   : > { %v2924_v60 = vadd.f32 %v4303_v17, %v2923_v9  ;;  %vm2926_vm6 = vweird.f32 %v4303_v17  ;;  %v2954_v29 = vsub.f32 1.0, %v2953_v57  ;;  %v2931_v51 = vand.u32 2147483648, %v6540_v55 }
 0x8f0   : > { %v2912_v7 = vsel %vm2911_vm2, %v6542_v33, %v2908_v26  ;;  %vm2925_vm3 = vweird.f32 %v6540_v55  ;;  %v2929_v14 = vand.u32 2147483647, %v6540_v55  ;;  %vm2958_vm9 = vweird.f32 %v4305_v4 }
 0x8f1   : > { %v2917_v46 = vsel %vm2914_vm4, %v2916_v56, %v2912_v7  ;;  %vm2927_vm7 = vmor %vm2925_vm3, %vm2926_vm6  ;;  %v2955_v33 = vmul.f32 %v4305_v4, %v2954_v29  ;;  %v2932_v11 = vor.u32 1.1754944e-38, %v2931_v51  ;;  %vm2957_vm2 = vweird.f32 %v6559_v20 }
 0x8f2   : > { %3641 = vperm.xlu0 %4068, %v2887_v42   ;;  %3638 = vperm.xlu1 %4070, %v2886_v39   ;;  %v2919_v45 = vmul.f32 %v6449_v24, %v2917_v46  ;;  %v2918_v15 = vmul.f32 %v6446_v12, %v2917_v46  ;;  %v2928_v16 = vsel %vm2927_vm7, %v4303_v17, %v2924_v60  ;;  %vm2930_vm8 = vcmp.eq.f32.partialorder %v2929_v14, 8.507059e+37  ;;  %vm2959_vm4 = vmor %vm2957_vm2, %vm2958_vm9 }
 0x8f3   : > { %v4307_v19 = vpop.eup %4306  ;;  %v2933_v13 = vsel %vm2930_vm8, %v2932_v11, %v2928_v16  ;;  %v2956_v49 = vadd.f32 %v4305_v4, %v2955_v33  ;;  %v2963_v24 = vand.u32 2147483648, %v6559_v20  ;;  %v2961_v55 = vand.u32 2147483647, %v6559_v20 }
 0x8f4   : > { %v2969_v8 = vmul.f32 %v4307_v19, %v6575_v35  ;;  %v2935_v12 = vmul.f32 %v6458_v28, %v2933_v13  ;;  %v2934_v5 = vmul.f32 %v6444_v63, %v2933_v13  ;;  %vm2974_vm3 = vweird.f32 %v4307_v19 }
 0x8f5   : > { %v2960_v62 = vsel %vm2959_vm4, %v4305_v4, %v2956_v49  ;;  %v2964_v47 = vor.u32 1.1754944e-38, %v2963_v24  ;;  %vm2962_vm6 = vcmp.eq.f32.partialorder %v2961_v55, 8.507059e+37  ;;  %v2979_v28 = vand.u32 2147483648, %v6575_v35 }
 0x8f6   : > { %v2970_v31 = vsub.f32 1.0, %v2969_v8  ;;  %v2951_v50 = vmul.f32 %v6456_v23, %v6556_v2  ;;  %vm2973_vm7 = vweird.f32 %v6575_v35  ;;  %v2977_v32 = vand.u32 2147483647, %v6575_v35 }
 0x8f7   : > { %v2965_v25 = vsel %vm2962_vm6, %v2964_v47, %v2960_v62  ;;  %vm2975_vm8 = vmor %vm2973_vm7, %vm2974_vm3  ;;  %v2980_v20 = vor.u32 1.1754944e-38, %v2979_v28 }
 0x8f8   : > { %v2971_v3 = vmul.f32 %v4307_v19, %v2970_v31  ;;  %v2966_v63 = vmul.f32 %v6468_v22, %v2965_v25  ;;  %vm2978_vm9 = vcmp.eq.f32.partialorder %v2977_v32, 8.507059e+37  ;;  %v2967_v22 = vmul.f32 %v6471_v53, %v2965_v25 }
 0x8fa   : > { %3647 = vperm.xlu0 %4068, %v2903_v34   ;;  %3644 = vperm.xlu1 %4070, %v2902_v30   ;;  %v2972_v38 = vadd.f32 %v4307_v19, %v2971_v3 }
 0x8fc   : > { %v2976_v0 = vsel %vm2975_vm8, %v4307_v19, %v2972_v38 }
 0x8fd   : > { %v2981_v59 = vsel %vm2978_vm9, %v2980_v20, %v2976_v0 }
 0x8fe   : > { %v2982_v52 = vmul.f32 %v6466_v21, %v2981_v59 }
 0x902   : > { %3653 = vperm.xlu0 %4068, %v2919_v45   ;;  %3650 = vperm.xlu1 %4070, %v2918_v15  }
 0x90a   : > { %3659 = vperm.xlu0 %4068, %v2935_v12   ;;  %3656 = vperm.xlu1 %4070, %v2934_v5  }
 0x912   : > { %3668 = vperm.xlu0 %4068, %v2966_v63   ;;  %3665 = vperm.xlu1 %4070, %v2951_v50  }
 0x91a   : > { %3674 = vperm.xlu0 %4068, %v2982_v52   ;;  %3671 = vperm.xlu1 %4070, %v2967_v22  }
 0x91b   : > { %4338 = shalt.err (!%p4335_p3)
}
 0x91c   : > { %4018 = dma.vmem_to_hbm [thread:$0]  (%p4534_p5), %s3731_s26, 128, %s3733_s20, %s3713_s1   ;;  %v2983_v23 = vmul.f32 %v6475_v18, %v2981_v59 }
 0x91d   : > { %s3742_s3 = scalar_lea.hbm %s6708_s16, %s3978_s29  ;;  %s6799_s4 = sshll.u32 %s6479_s19, 3 }
 0x91e   : > { %s526_s5 = scalar_lea.vmem [#allocation4], %s6799_s4  ;;  %s3746_s25 = sshll.u32 %s3742_s3, 4  ;;  %s3747_s25 = int_to_ptr.hbm [resolvable:$true] %s3746_s25 }
 0x91f   : > { %s3744_s6 = sshll.u32 %s526_s5, 4  ;;  %s3718_s20 = scalar_lea.sflag [#allocation5], %s6479_s19  ;;  %s3745_s6 = int_to_ptr.vmem [resolvable:$true] %s3744_s6 }
 0x920   : > { %s4353_s28 = sshra.s32 %s3747_s25, 4  ;;  %s4359_s30 = scalar_lea.hbm %s6708_s16, 16  ;;  %s4354_s28 = int_to_ptr.hbm [resolvable:$true] %s4353_s28 }
 0x921   : > { %s4355_s29 = scalar_lea.hbm %s4354_s28, 8  ;;  %p4360_p9 = scmp.lt.s32.totalorder %s4354_s28, %s6708_s16 }
 0x922   : > { %3677 = vperm.xlu1 %4070, %v2983_v23   ;;  %p4356_p4 = scmp.ne.s32.totalorder %s4354_s28, %s4355_s29  ;;  %p4361_p10 = scmp.lt.s32.totalorder %s4359_s30, %s4355_s29 }
 0x924   : > { %p4357_p7 = pnand %p4356_p4, %p4534_p5  ;;  %p4362_p11 = por %p4361_p10, %p4360_p9 }
 0x926   : > { %p4358_p8 = pneg %p4357_p7 }
 0x928   : > { %p4363_p12 = pnand %p4362_p11, %p4358_p8 }
 0x947   : > { %v3663_v34 = vpop.permute.xlu2 %3662 }
 0x948   : > { %v3694_v46 = vperm.slane %v3663_v34, %v6791_v37 }
 0x95c   : > { %v3636_v21 = vpop.permute.xlu0 %3635  ;;  %v3633_v53 = vpop.permute.xlu1 %3632 }
 0x95d   : > { %v3680_v26 = vperm.slane %v3636_v21, %v6334_v10  ;;  %v3679_v61 = vperm.slane %v3633_v53, %v6791_v37 }
 0x95f   : > { %v3681_v60 = vsel %vm2634_vm1, %v3680_v26, %v3679_v61 }
 0x964   : > { %v3642_v2 = vpop.permute.xlu0 %3641  ;;  %v3639_v48 = vpop.permute.xlu1 %3638 }
 0x965   : > { %v3683_v40 = vperm.slane %v3642_v2, %v6334_v10  ;;  %v3682_v41 = vperm.slane %v3639_v48, %v6791_v37 }
 0x967   : > { %v3684_v7 = vsel %vm2634_vm1, %v3683_v40, %v3682_v41 }
 0x968   : > { %v3703_v19 = vsel %vm2657_vm10, %v3684_v7, %v3681_v60 }
 0x96c   : > { %v3648_v58 = vpop.permute.xlu0 %3647  ;;  %v3645_v17 = vpop.permute.xlu1 %3644 }
 0x96d   : > { %v3686_v35 = vperm.slane %v3648_v58, %v6334_v10  ;;  %v3685_v18 = vperm.slane %v3645_v17, %v6791_v37 }
 0x96f   : > { %v3687_v57 = vsel %vm2634_vm1, %v3686_v35, %v3685_v18 }
 0x970   : > { %v3704_v14 = vsel %vm2659_vm11, %v3687_v57, %v3703_v19 }
 0x974   : > { %v3654_v43 = vpop.permute.xlu0 %3653  ;;  %v3651_v42 = vpop.permute.xlu1 %3650 }
 0x975   : > { %v3689_v4 = vperm.slane %v3654_v43, %v6334_v10  ;;  %v3688_v1 = vperm.slane %v3651_v42, %v6791_v37 }
 0x977   : > { %v3690_v29 = vsel %vm2634_vm1, %v3689_v4, %v3688_v1 }
 0x978   : > { %v3705_v33 = vsel %vm2661_vm12, %v3690_v29, %v3704_v14 }
 0x97c   : > { %v3657_v39 = vpop.permute.xlu1 %3656  ;;  %v3660_v54 = vpop.permute.xlu0 %3659 }
 0x97d   : > { %v3692_v30 = vperm.slane %v3660_v54, %v6334_v10  ;;  %v3691_v6 = vperm.slane %v3657_v39, %v6791_v37 }
 0x97f   : > { %v3693_v51 = vsel %vm2634_vm1, %v3692_v30, %v3691_v6 }
 0x980   : > { %v3706_v13 = vsel %vm2663_vm13, %v3693_v51, %v3705_v33 }
 0x984   : > { %v3666_v36 = vpop.permute.xlu1 %3665  ;;  %v3669_v27 = vpop.permute.xlu0 %3668 }
 0x985   : > { %v3695_v9 = vperm.slane %v3666_v36, %v6334_v10  ;;  %v3697_v45 = vperm.slane %v3669_v27, %v6791_v37 }
 0x987   : > { %v3696_v16 = vsel %vm2634_vm1, %v3695_v9, %v3694_v46 }
 0x988   : > { %v3707_v24 = vsel %vm2665_vm14, %v3696_v16, %v3706_v13 }
 0x98c   : > { %v3672_v44 = vpop.permute.xlu1 %3671  ;;  %v3675_v15 = vpop.permute.xlu0 %3674 }
 0x98d   : > { %v3698_v56 = vperm.slane %v3672_v44, %v6334_v10  ;;  %v3700_v49 = vperm.slane %v3675_v15, %v6791_v37 }
 0x98f   : > { %v3699_v8 = vsel %vm2634_vm1, %v3698_v56, %v3697_v45 }
 0x990   : > { %v3708_v12 = vsel %vm2667_vm15, %v3699_v8, %v3707_v24 }
 0x994   : > { %v3678_v11 = vpop.permute.xlu1 %3677 }
 0x995   : > { %v3701_v31 = vperm.slane %v3678_v11, %v6334_v10 }
 0x997   : > { %v3702_v5 = vsel %vm2634_vm1, %v3701_v31, %v3700_v49 }
 0x998   : > { %v3709_v55 = vsel %vm2669_vm0, %v3702_v5, %v3708_v12 }
 0x999   : > { %3711 = vst.msk [vmem:[%s526_s5] sm:$0xff] %vm932_vm5, %v3709_v55 }
 0x99a   : > { %4366 = shalt.err (!%p4363_p12)
}
 0x99b   : > { %4019 = dma.vmem_to_hbm [thread:$0]  (%p4534_p5), %s3745_s6, 128, %s3747_s25, %s3718_s20  }
 0x99c PF: > { %p4029_p13 = scmp.ge.s32.totalorder %s4405_s24, 2  ;;  %s3758_s19 = sand.u32 1, %s4393_s21  }
 0x99d   : > { %s3759_s2 = scalar_lea.sflag [#allocation3], %s3758_s19 }
 0x99e   : > { %p4023_p0 = pnand %p4029_p13, %p4538_p6 }
 0x9a0   : > { %p4024_p1 = pneg %p4023_p0 }
 0x9a2   : > { %4384 = dma.done.wait (%p4024_p1), %s3759_s2, 128  }
 0x9a3   : > { %4386 = vsyncadd (%p4024_p1), %s3759_s2, 4294967168  ;;  %s3769_s3 = scalar_lea.sflag [#allocation5], %s3758_s19 }
 0x9a4   : > { %4388 = dma.done.wait (%p4024_p1), %s3769_s3, 128  }
 0x9a5   : > { %4390 = vsyncadd (%p4024_p1), %s3769_s3, 4294967168  ;;  %s6800_s4 = sld [smem:[#allocation8_spill]]  ;;  %p30_p5 = scmp.ge.s32.totalorder %s4521_s27, 4  }
 0x9a6   : > { %s6801_s23 = sld [smem:[#allocation9_spill]]  ;;  %s6802_s21 = smov %s4397_s22 }
 0x9a7   : > { %s6804_s24 = smov %s4521_s27  ;;  %32 = sbr.rel (!%p30_p5) target bundleno = 13 (0xd), region = 132 }
 0x9ab   : > { %s6803_s22 = smov %s6800_s4 }
 0x9ac   :  { %3775 = vsyncpa [#allocation3], 1 }
 0x9ad   :  { %3777 = vsyncpa [#allocation3 + $0x1], 1 }
 0x9ae   :  { %3778 = vsyncpa [#allocation5], 1 }
 0x9af   :  { %3780 = vsyncpa [#allocation5 + $0x1], 1 }

</bundles_post_ra>
